<compile_context>
chip_gen: v7x
topology: tpu7x:2x2x1
jax: 0.10.0
libtpu: 0.0.40
codegen_flags: <defaults>
</compile_context>

<pallas_src>
import jax
import jax.numpy as jnp
import numpy as np
from jax.experimental import pallas as pl
from jax.experimental.pallas import tpu as pltpu

# ---- constants from the PyTorch module ----
BOTTLENECK = 16
CONV_W = 5
IN_CH = 5
INPUT_LEN = 36            # LSTM "batch" dim (PyTorch seq-first quirk)
LSTM_OUT = 8
POOL = 4
HID = 8                   # mid_channel
CONV_LEN = INPUT_LEN - CONV_W + 1          # 32
POOL_LEN = CONV_LEN // POOL                # 8
FLAT = LSTM_OUT * POOL_LEN                 # 64
OUT_PAD = 128             # lane-dense linear/output width (sliced to 16 outside)
UNROLL = 8                # fixed fori_loop unroll; t_pad is a multiple of this
TB_MAX = 256              # timesteps per grid step (multiple of UNROLL)


def lstm_encoder_kernel(xT_ref, wih_ref, whh_ref, gb_ref, convw_ref, convb_ref,
                        l1w_ref, l1b_ref, out_ref,
                        h_ref, c_ref, gx_ref, hist_ref):
    tb = xT_ref.shape[0]                              # timesteps in this block

    # LSTM state lives in VMEM scratch across grid blocks; zero it on block 0.
    @pl.when(pl.program_id(0) == 0)
    def _():
        h_ref[...] = jnp.zeros_like(h_ref)
        c_ref[...] = jnp.zeros_like(c_ref)

    # ---- hoisted input projection: gates_x[t] = W_ih @ x_t^T + (b_ih+b_hh) ----
    # Computed once per block with 5 lane-broadcast FMAs (off the serial path).
    xT = xT_ref[...]                                   # (tb, 5, 36)
    wih = wih_ref[...]                                 # (32, 5), rows [i,f,o,g]
    gx = jnp.broadcast_to(gb_ref[...][None, :, :], (tb, 4 * HID, INPUT_LEN))
    for ci in range(IN_CH):
        gx = gx + wih[:, ci:ci + 1][None, :, :] * xT[:, ci:ci + 1, :]
    gx_ref[...] = gx                                   # (tb, 32, 36)

    whh = whh_ref[...]                                 # (32, 8), rows [i,f,o,g]

    # ---- bare (h, c) recurrence; everything else is outside the loop ----
    def step(t, carry):
        h, c = carry                                   # (8, 36) each
        gates = gx_ref[t] + jnp.dot(whh, h, preferred_element_type=jnp.float32)
        s = jax.nn.sigmoid(gates[:3 * HID, :])         # one sigmoid: i, f, o
        g = jnp.tanh(gates[3 * HID:, :])               # one tanh: g
        i_g = s[:HID, :]
        f_g = s[HID:2 * HID, :]
        o_g = s[2 * HID:, :]
        c_new = f_g * c + i_g * g
        h_new = o_g * jnp.tanh(c_new)
        hist_ref[t] = jnp.maximum(h_new, 0.0)          # one dense (8,36) store
        return h_new, c_new

    h_fin, c_fin = jax.lax.fori_loop(0, tb, step, (h_ref[...], c_ref[...]),
                                     unroll=UNROLL)
    h_ref[...] = h_fin                        # carry state to the next block
    c_ref[...] = c_fin

    # ---- batched per-block tail: ReLU already applied in hist ----
    p = jnp.swapaxes(hist_ref[...], 1, 2)              # (tb, 36, 8)
    im2col = jnp.concatenate(
        [p[:, k:k + CONV_LEN, :] for k in range(CONV_W)], axis=2)  # (tb, 32, 40)
    conv = jnp.dot(im2col.reshape(tb * CONV_LEN, CONV_W * LSTM_OUT),
                   convw_ref[...], preferred_element_type=jnp.float32)
    conv = conv.reshape(tb, CONV_LEN, LSTM_OUT) + convb_ref[...][None, :, :]

    # MaxPool1d(4) + ReLU, vectorized over the whole block.
    pooled = jnp.concatenate(
        [jnp.max(conv[:, POOL * j:POOL * j + POOL, :], axis=1)
         for j in range(POOL_LEN)], axis=1)            # (tb, 64), col = j*8 + ch
    pooled = jnp.maximum(pooled, 0.0)

    # weight-normed Linear (zero-padded to 128 lanes) + Sigmoid, lane-dense store.
    lin = jnp.dot(pooled, l1w_ref[...],
                  preferred_element_type=jnp.float32) + l1b_ref[...]
    out_ref[...] = jax.nn.sigmoid(lin)                 # (tb, 128); cols>=16 dropped


@jax.jit
def lstm_encoder(x, kernel_params):
    (w_ih, w_hh, gate_b, conv_w, conv_b, l1_w, l1_b) = kernel_params
    T = x.shape[0]
    if T <= TB_MAX:
        tb = max(UNROLL, -(-T // UNROLL) * UNROLL)     # pad T up to unroll mult
        nb = 1
    else:
        tb = TB_MAX
        nb = -(-T // tb)
    t_pad = tb * nb

    # Layout plumbing only (done in XLA): put the 36-wide dim on lanes.
    xT = jnp.swapaxes(x, 1, 2).astype(jnp.float32)     # (T, 5, 36)
    if t_pad != T:
        xT = jnp.pad(xT, ((0, t_pad - T), (0, 0), (0, 0)))

    grid_spec = pltpu.PrefetchScalarGridSpec(
        num_scalar_prefetch=0,
        grid=(nb,),
        in_specs=[
            pl.BlockSpec((tb, IN_CH, INPUT_LEN), lambda b: (b, 0, 0)),
            pl.BlockSpec((4 * HID, IN_CH), lambda b: (0, 0)),
            pl.BlockSpec((4 * HID, HID), lambda b: (0, 0)),
            pl.BlockSpec((4 * HID, 1), lambda b: (0, 0)),
            pl.BlockSpec((CONV_W * LSTM_OUT, LSTM_OUT), lambda b: (0, 0)),
            pl.BlockSpec((1, LSTM_OUT), lambda b: (0, 0)),
            pl.BlockSpec((FLAT, OUT_PAD), lambda b: (0, 0)),
            pl.BlockSpec((1, OUT_PAD), lambda b: (0, 0)),
        ],
        out_specs=pl.BlockSpec((tb, OUT_PAD), lambda b: (b, 0)),
        scratch_shapes=[
            pltpu.VMEM((HID, INPUT_LEN), jnp.float32),          # h state
            pltpu.VMEM((HID, INPUT_LEN), jnp.float32),          # c state
            pltpu.VMEM((tb, 4 * HID, INPUT_LEN), jnp.float32),  # gates_x per block
            pltpu.VMEM((tb, HID, INPUT_LEN), jnp.float32),      # relu(h) history
        ],
    )
    out = pl.pallas_call(
        lstm_encoder_kernel,
        out_shape=jax.ShapeDtypeStruct((t_pad, OUT_PAD), jnp.float32),
        grid_spec=grid_spec,
        compiler_params=pltpu.CompilerParams(
            dimension_semantics=("arbitrary",),   # sequential: LSTM recurrence
            vmem_limit_bytes=32 * 1024 * 1024),
    )(xT, w_ih, w_hh, gate_b, conv_w, conv_b, l1_w, l1_b)
    return out[:T, :BOTTLENECK].reshape(T, 1, BOTTLENECK)


def init_params(key):
    """Deterministic parameter init (shapes follow the PyTorch __init__)."""
    ks = jax.random.split(key, 10)
    kb = 1.0 / np.sqrt(HID)
    w_ih = jax.random.uniform(ks[0], (4 * HID, IN_CH), jnp.float32, -kb, kb)
    w_hh = jax.random.uniform(ks[1], (4 * HID, HID), jnp.float32, -kb, kb)
    b_ih = jax.random.uniform(ks[2], (4 * HID,), jnp.float32, -kb, kb)
    b_hh = jax.random.uniform(ks[3], (4 * HID,), jnp.float32, -kb, kb)

    # weight_norm(Conv1d(8, 8, 5)): w_eff = g * v / ||v||_(ic,k)
    conv_v = jax.random.uniform(ks[4], (LSTM_OUT, LSTM_OUT, CONV_W),
                                jnp.float32, -0.2, 0.2)
    conv_g = jax.random.uniform(ks[5], (LSTM_OUT, 1, 1), jnp.float32, 0.5, 1.5)
    conv_b = jax.random.uniform(ks[6], (LSTM_OUT,), jnp.float32, -0.2, 0.2)
    conv_w_eff = conv_g * conv_v / jnp.sqrt(
        jnp.sum(conv_v ** 2, axis=(1, 2), keepdims=True))

    # weight_norm(Linear(64, 16)): w_eff = g * v / ||v||_(in)
    l1_v = jax.random.uniform(ks[7], (BOTTLENECK, FLAT), jnp.float32, -0.125, 0.125)
    l1_g = jax.random.uniform(ks[8], (BOTTLENECK, 1), jnp.float32, 0.5, 1.5)
    l1_b = jax.random.uniform(ks[9], (BOTTLENECK,), jnp.float32, -0.125, 0.125)
    l1_w_eff = l1_g * l1_v / jnp.sqrt(jnp.sum(l1_v ** 2, axis=1, keepdims=True))

    raw = (w_ih, w_hh, b_ih, b_hh, conv_w_eff, conv_b, l1_w_eff, l1_b)

    def reorder(a):
        # PyTorch gate row order [i, f, g, o] -> kernel order [i, f, o, g]
        return jnp.concatenate(
            [a[0:2 * HID], a[3 * HID:4 * HID], a[2 * HID:3 * HID]], axis=0)

    # Packed / rearranged for the kernel's transposed layout & fused matmuls.
    kernel_params = (
        reorder(w_ih),                                    # (32, 5)
        reorder(w_hh),                                    # (32, 8)
        reorder(b_ih + b_hh)[:, None],                    # (32, 1)
        conv_w_eff.transpose(2, 1, 0).reshape(CONV_W * LSTM_OUT, LSTM_OUT),
        #                                                   (40, 8), row = k*8+ic
        conv_b[None, :],                                  # (1, 8)
        jnp.pad(l1_w_eff.reshape(BOTTLENECK, LSTM_OUT, POOL_LEN)
                        .transpose(2, 1, 0).reshape(FLAT, BOTTLENECK),
                ((0, 0), (0, OUT_PAD - BOTTLENECK))),     # (64, 128), row = j*8+c
        jnp.pad(l1_b[None, :], ((0, 0), (0, OUT_PAD - BOTTLENECK))),  # (1, 128)
    )
    return raw, kernel_params


def reference(x, raw):
    """Pure-JAX replica of the PyTorch forward, for validation."""
    w_ih, w_hh, b_ih, b_hh, conv_w_eff, conv_b, l1_w_eff, l1_b = raw
    T, N, _ = x.shape
    hi = jax.lax.Precision.HIGHEST

    def step(carry, x_t):
        h, c = carry
        gates = (jnp.dot(x_t, w_ih.T, precision=hi) + b_ih
                 + jnp.dot(h, w_hh.T, precision=hi) + b_hh)
        i, f, g, o = jnp.split(gates, 4, axis=-1)
        c = jax.nn.sigmoid(f) * c + jax.nn.sigmoid(i) * jnp.tanh(g)
        h = jax.nn.sigmoid(o) * jnp.tanh(c)
        return (h, c), h

    init = (jnp.zeros((N, HID)), jnp.zeros((N, HID)))
    _, out = jax.lax.scan(step, init, x)                      # (T, N, 8)
    p = jnp.maximum(out, 0.0).transpose(0, 2, 1)              # (T, 8, 36)
    conv = jnp.zeros((T, LSTM_OUT, CONV_LEN))
    for k in range(CONV_W):
        conv = conv + jnp.einsum('tcl,oc->tol', p[:, :, k:k + CONV_LEN],
                                 conv_w_eff[:, :, k], precision=hi)
    conv = conv + conv_b[None, :, None]
    pooled = conv.reshape(T, LSTM_OUT, POOL_LEN, POOL).max(axis=-1)
    pooled = jnp.maximum(pooled, 0.0).reshape(T, 1, FLAT)
    lin = jnp.einsum('tif,kf->tik', pooled, l1_w_eff, precision=hi) + l1_b
    return jax.nn.sigmoid(lin)


if __name__ == "__main__":
    key = jax.random.PRNGKey(0)
    k_x, k_p = jax.random.split(key)
    B = 2
    x = jax.random.normal(k_x, (B, INPUT_LEN, IN_CH), jnp.float32)

    raw, kernel_params = init_params(k_p)

    out = lstm_encoder(x, kernel_params)
    out = jax.block_until_ready(out)

    ref = jax.block_until_ready(reference(x, raw))
    np.testing.assert_allclose(np.asarray(out), np.asarray(ref),
                               atol=2e-3, rtol=2e-3)
    assert out.shape == (B, 1, BOTTLENECK)
    print("KERNEL_OK")
</pallas_src>

<mosaic_0001>
module attributes {stable_mosaic.version = 11 : i64} {
  func.func @lstm_encoder_kernel(%arg0: i32, %arg1: memref<8x5x36xf32, #tpu.memory_space<vmem>>, %arg2: memref<32x5xf32, #tpu.memory_space<vmem>>, %arg3: memref<32x8xf32, #tpu.memory_space<vmem>>, %arg4: memref<32x1xf32, #tpu.memory_space<vmem>>, %arg5: memref<40x8xf32, #tpu.memory_space<vmem>>, %arg6: memref<1x8xf32, #tpu.memory_space<vmem>>, %arg7: memref<64x128xf32, #tpu.memory_space<vmem>>, %arg8: memref<1x128xf32, #tpu.memory_space<vmem>>, %arg9: memref<8x128xf32, #tpu.memory_space<vmem>>, %arg10: memref<8x36xf32, #tpu.memory_space<vmem>>, %arg11: memref<8x36xf32, #tpu.memory_space<vmem>>, %arg12: memref<8x32x36xf32, #tpu.memory_space<vmem>>, %arg13: memref<8x8x36xf32, #tpu.memory_space<vmem>>) attributes {dimension_semantics = [#tpu.dimension_semantics<arbitrary>], iteration_bounds = array<i64: 1>, scalar_prefetch = 0 : i64, scratch_operands = 4 : i64, tpu.core_type = #tpu.core_type<tc>, window_params = [{transform_indices = @transform_0, window_bounds = array<i64: 8, 5, 36>}, {pipeline_mode = #tpu.pipeline_mode<synchronous>, transform_indices = @transform_1, window_bounds = array<i64: 32, 5>}, {pipeline_mode = #tpu.pipeline_mode<synchronous>, transform_indices = @transform_2, window_bounds = array<i64: 32, 8>}, {pipeline_mode = #tpu.pipeline_mode<synchronous>, transform_indices = @transform_3, window_bounds = array<i64: 32, 1>}, {pipeline_mode = #tpu.pipeline_mode<synchronous>, transform_indices = @transform_4, window_bounds = array<i64: 40, 8>}, {pipeline_mode = #tpu.pipeline_mode<synchronous>, transform_indices = @transform_5, window_bounds = array<i64: 1, 8>}, {pipeline_mode = #tpu.pipeline_mode<synchronous>, transform_indices = @transform_6, window_bounds = array<i64: 64, 128>}, {pipeline_mode = #tpu.pipeline_mode<synchronous>, transform_indices = @transform_7, window_bounds = array<i64: 1, 128>}, {transform_indices = @transform_8, window_bounds = array<i64: 8, 128>}]} {
    %c0_i32 = arith.constant 0 : i32
    %0 = arith.cmpi eq, %arg0, %c0_i32 : i32
    %1 = arith.extui %0 : i1 to i32
    %c0_i32_0 = arith.constant 0 : i32
    %2 = arith.cmpi ne, %1, %c0_i32_0 : i32
    scf.if %2 {
      %cst_101 = arith.constant 0.000000e+00 : f32
      %312 = vector.broadcast %cst_101 : f32 to vector<8x36xf32>
      %c0_102 = arith.constant 0 : index
      %c0_103 = arith.constant 0 : index
      %313 = vector.load %arg10[%c0_102, %c0_103] : memref<8x36xf32, #tpu.memory_space<vmem>>, vector<8x36xf32>
      tpu.vector_store %arg10[%c0_102, %c0_103], %312 {strides = array<i32>} : memref<8x36xf32, #tpu.memory_space<vmem>>, vector<8x36xf32>,
      %cst_104 = arith.constant 0.000000e+00 : f32
      %314 = vector.broadcast %cst_104 : f32 to vector<8x36xf32>
      %c0_105 = arith.constant 0 : index
      %c0_106 = arith.constant 0 : index
      %315 = vector.load %arg11[%c0_105, %c0_106] : memref<8x36xf32, #tpu.memory_space<vmem>>, vector<8x36xf32>
      tpu.vector_store %arg11[%c0_105, %c0_106], %314 {strides = array<i32>} : memref<8x36xf32, #tpu.memory_space<vmem>>, vector<8x36xf32>,
    } else {
    }
    %c0 = arith.constant 0 : index
    %c0_1 = arith.constant 0 : index
    %c0_2 = arith.constant 0 : index
    %3 = vector.load %arg1[%c0, %c0_1, %c0_2] : memref<8x5x36xf32, #tpu.memory_space<vmem>>, vector<8x5x36xf32>
    %c0_3 = arith.constant 0 : index
    %c0_4 = arith.constant 0 : index
    %4 = vector.load %arg2[%c0_3, %c0_4] : memref<32x5xf32, #tpu.memory_space<vmem>>, vector<32x5xf32>
    %c0_5 = arith.constant 0 : index
    %c0_6 = arith.constant 0 : index
    %5 = vector.load %arg4[%c0_5, %c0_6] : memref<32x1xf32, #tpu.memory_space<vmem>>, vector<32x1xf32>
    %6 = vector.shape_cast %5 : vector<32x1xf32> to vector<1x32x1xf32>
    %7 = vector.shape_cast %6 : vector<1x32x1xf32> to vector<1x32x1xf32>
    %8 = vector.broadcast %7 : vector<1x32x1xf32> to vector<8x32x36xf32>
    %9 = vector.extract_strided_slice %4 {offsets = [0, 0], sizes = [32, 1], strides = [1, 1]} : vector<32x5xf32> to vector<32x1xf32>
    %10 = vector.shape_cast %9 : vector<32x1xf32> to vector<1x32x1xf32>
    %11 = vector.extract_strided_slice %3 {offsets = [0, 0, 0], sizes = [8, 1, 36], strides = [1, 1, 1]} : vector<8x5x36xf32> to vector<8x1x36xf32>
    %12 = vector.broadcast %10 : vector<1x32x1xf32> to vector<8x32x36xf32>
    %13 = vector.broadcast %11 : vector<8x1x36xf32> to vector<8x32x36xf32>
    %14 = arith.mulf %12, %13 : vector<8x32x36xf32>
    %15 = arith.addf %8, %14 : vector<8x32x36xf32>
    %16 = vector.extract_strided_slice %4 {offsets = [0, 1], sizes = [32, 1], strides = [1, 1]} : vector<32x5xf32> to vector<32x1xf32>
    %17 = vector.shape_cast %16 : vector<32x1xf32> to vector<1x32x1xf32>
    %18 = vector.extract_strided_slice %3 {offsets = [0, 1, 0], sizes = [8, 1, 36], strides = [1, 1, 1]} : vector<8x5x36xf32> to vector<8x1x36xf32>
    %19 = vector.broadcast %17 : vector<1x32x1xf32> to vector<8x32x36xf32>
    %20 = vector.broadcast %18 : vector<8x1x36xf32> to vector<8x32x36xf32>
    %21 = arith.mulf %19, %20 : vector<8x32x36xf32>
    %22 = arith.addf %15, %21 : vector<8x32x36xf32>
    %23 = vector.extract_strided_slice %4 {offsets = [0, 2], sizes = [32, 1], strides = [1, 1]} : vector<32x5xf32> to vector<32x1xf32>
    %24 = vector.shape_cast %23 : vector<32x1xf32> to vector<1x32x1xf32>
    %25 = vector.extract_strided_slice %3 {offsets = [0, 2, 0], sizes = [8, 1, 36], strides = [1, 1, 1]} : vector<8x5x36xf32> to vector<8x1x36xf32>
    %26 = vector.broadcast %24 : vector<1x32x1xf32> to vector<8x32x36xf32>
    %27 = vector.broadcast %25 : vector<8x1x36xf32> to vector<8x32x36xf32>
    %28 = arith.mulf %26, %27 : vector<8x32x36xf32>
    %29 = arith.addf %22, %28 : vector<8x32x36xf32>
    %30 = vector.extract_strided_slice %4 {offsets = [0, 3], sizes = [32, 1], strides = [1, 1]} : vector<32x5xf32> to vector<32x1xf32>
    %31 = vector.shape_cast %30 : vector<32x1xf32> to vector<1x32x1xf32>
    %32 = vector.extract_strided_slice %3 {offsets = [0, 3, 0], sizes = [8, 1, 36], strides = [1, 1, 1]} : vector<8x5x36xf32> to vector<8x1x36xf32>
    %33 = vector.broadcast %31 : vector<1x32x1xf32> to vector<8x32x36xf32>
    %34 = vector.broadcast %32 : vector<8x1x36xf32> to vector<8x32x36xf32>
    %35 = arith.mulf %33, %34 : vector<8x32x36xf32>
    %36 = arith.addf %29, %35 : vector<8x32x36xf32>
    %37 = vector.extract_strided_slice %4 {offsets = [0, 4], sizes = [32, 1], strides = [1, 1]} : vector<32x5xf32> to vector<32x1xf32>
    %38 = vector.shape_cast %37 : vector<32x1xf32> to vector<1x32x1xf32>
    %39 = vector.extract_strided_slice %3 {offsets = [0, 4, 0], sizes = [8, 1, 36], strides = [1, 1, 1]} : vector<8x5x36xf32> to vector<8x1x36xf32>
    %40 = vector.broadcast %38 : vector<1x32x1xf32> to vector<8x32x36xf32>
    %41 = vector.broadcast %39 : vector<8x1x36xf32> to vector<8x32x36xf32>
    %42 = arith.mulf %40, %41 : vector<8x32x36xf32>
    %43 = arith.addf %36, %42 : vector<8x32x36xf32>
    %c0_7 = arith.constant 0 : index
    %c0_8 = arith.constant 0 : index
    %c0_9 = arith.constant 0 : index
    %44 = vector.load %arg12[%c0_7, %c0_8, %c0_9] : memref<8x32x36xf32, #tpu.memory_space<vmem>>, vector<8x32x36xf32>
    tpu.vector_store %arg12[%c0_7, %c0_8, %c0_9], %43 {strides = array<i32>} : memref<8x32x36xf32, #tpu.memory_space<vmem>>, vector<8x32x36xf32>,
    %c0_10 = arith.constant 0 : index
    %c0_11 = arith.constant 0 : index
    %45 = vector.load %arg3[%c0_10, %c0_11] : memref<32x8xf32, #tpu.memory_space<vmem>>, vector<32x8xf32>
    %c0_12 = arith.constant 0 : index
    %c0_13 = arith.constant 0 : index
    %46 = vector.load %arg10[%c0_12, %c0_13] : memref<8x36xf32, #tpu.memory_space<vmem>>, vector<8x36xf32>
    %c0_14 = arith.constant 0 : index
    %c0_15 = arith.constant 0 : index
    %47 = vector.load %arg11[%c0_14, %c0_15] : memref<8x36xf32, #tpu.memory_space<vmem>>, vector<8x36xf32>
    %c0_i32_16 = arith.constant 0 : i32
    %48 = arith.index_cast %c0_i32_16 : i32 to index
    %c0_17 = arith.constant 0 : index
    %c0_18 = arith.constant 0 : index
    %49 = vector.load %arg12[%48, %c0_17, %c0_18] : memref<8x32x36xf32, #tpu.memory_space<vmem>>, vector<1x32x36xf32>
    %50 = vector.shape_cast %49 : vector<1x32x36xf32> to vector<32x36xf32>
    %cst = arith.constant dense<0.000000e+00> : vector<32x36xf32>
    %51 = tpu.matmul %45, %46, %cst {dimension_numbers = #tpu.dot_dimension_numbers<[1], [0], [0], [1], [0, 0, 1, 1], [], []>} : vector<32x8xf32>, vector<8x36xf32>, vector<32x36xf32> -> vector<32x36xf32>
    %52 = arith.addf %50, %51 : vector<32x36xf32>
    %53 = vector.extract_strided_slice %52 {offsets = [0, 0], sizes = [24, 36], strides = [1, 1]} : vector<32x36xf32> to vector<24x36xf32>
    %54 = arith.negf %53 : vector<24x36xf32>
    %55 = math.exp %54 : vector<24x36xf32>
    %cst_19 = arith.constant 1.000000e+00 : f32
    %56 = vector.broadcast %cst_19 : f32 to vector<24x36xf32>
    %57 = arith.addf %56, %55 : vector<24x36xf32>
    %58 = arith.divf %56, %57 : vector<24x36xf32>
    %59 = vector.extract_strided_slice %52 {offsets = [24, 0], sizes = [8, 36], strides = [1, 1]} : vector<32x36xf32> to vector<8x36xf32>
    %60 = math.tanh %59 : vector<8x36xf32>
    %61 = vector.extract_strided_slice %58 {offsets = [0, 0], sizes = [8, 36], strides = [1, 1]} : vector<24x36xf32> to vector<8x36xf32>
    %62 = vector.extract_strided_slice %58 {offsets = [8, 0], sizes = [8, 36], strides = [1, 1]} : vector<24x36xf32> to vector<8x36xf32>
    %63 = vector.extract_strided_slice %58 {offsets = [16, 0], sizes = [8, 36], strides = [1, 1]} : vector<24x36xf32> to vector<8x36xf32>
    %64 = arith.mulf %62, %47 : vector<8x36xf32>
    %65 = arith.mulf %61, %60 : vector<8x36xf32>
    %66 = arith.addf %64, %65 : vector<8x36xf32>
    %67 = math.tanh %66 : vector<8x36xf32>
    %68 = arith.mulf %63, %67 : vector<8x36xf32>
    %cst_20 = arith.constant 0.000000e+00 : f32
    %69 = vector.broadcast %cst_20 : f32 to vector<8x36xf32>
    %70 = arith.maximumf %68, %69 : vector<8x36xf32>
    %71 = arith.index_cast %c0_i32_16 : i32 to index
    %c0_21 = arith.constant 0 : index
    %c0_22 = arith.constant 0 : index
    %72 = vector.load %arg13[%71, %c0_21, %c0_22] : memref<8x8x36xf32, #tpu.memory_space<vmem>>, vector<1x8x36xf32>
    %73 = vector.shape_cast %72 : vector<1x8x36xf32> to vector<8x36xf32>
    %74 = vector.shape_cast %70 : vector<8x36xf32> to vector<1x8x36xf32>
    tpu.vector_store %arg13[%71, %c0_21, %c0_22], %74 {strides = array<i32>} : memref<8x8x36xf32, #tpu.memory_space<vmem>>, vector<1x8x36xf32>,
    %c1_i32 = arith.constant 1 : i32
    %75 = arith.index_cast %c1_i32 : i32 to index
    %c0_23 = arith.constant 0 : index
    %c0_24 = arith.constant 0 : index
    %76 = vector.load %arg12[%75, %c0_23, %c0_24] : memref<8x32x36xf32, #tpu.memory_space<vmem>>, vector<1x32x36xf32>
    %77 = vector.shape_cast %76 : vector<1x32x36xf32> to vector<32x36xf32>
    %cst_25 = arith.constant dense<0.000000e+00> : vector<32x36xf32>
    %78 = tpu.matmul %45, %68, %cst_25 {dimension_numbers = #tpu.dot_dimension_numbers<[1], [0], [0], [1], [0, 0, 1, 1], [], []>} : vector<32x8xf32>, vector<8x36xf32>, vector<32x36xf32> -> vector<32x36xf32>
    %79 = arith.addf %77, %78 : vector<32x36xf32>
    %80 = vector.extract_strided_slice %79 {offsets = [0, 0], sizes = [24, 36], strides = [1, 1]} : vector<32x36xf32> to vector<24x36xf32>
    %81 = arith.negf %80 : vector<24x36xf32>
    %82 = math.exp %81 : vector<24x36xf32>
    %cst_26 = arith.constant 1.000000e+00 : f32
    %83 = vector.broadcast %cst_26 : f32 to vector<24x36xf32>
    %84 = arith.addf %83, %82 : vector<24x36xf32>
    %85 = arith.divf %83, %84 : vector<24x36xf32>
    %86 = vector.extract_strided_slice %79 {offsets = [24, 0], sizes = [8, 36], strides = [1, 1]} : vector<32x36xf32> to vector<8x36xf32>
    %87 = math.tanh %86 : vector<8x36xf32>
    %88 = vector.extract_strided_slice %85 {offsets = [0, 0], sizes = [8, 36], strides = [1, 1]} : vector<24x36xf32> to vector<8x36xf32>
    %89 = vector.extract_strided_slice %85 {offsets = [8, 0], sizes = [8, 36], strides = [1, 1]} : vector<24x36xf32> to vector<8x36xf32>
    %90 = vector.extract_strided_slice %85 {offsets = [16, 0], sizes = [8, 36], strides = [1, 1]} : vector<24x36xf32> to vector<8x36xf32>
    %91 = arith.mulf %89, %66 : vector<8x36xf32>
    %92 = arith.mulf %88, %87 : vector<8x36xf32>
    %93 = arith.addf %91, %92 : vector<8x36xf32>
    %94 = math.tanh %93 : vector<8x36xf32>
    %95 = arith.mulf %90, %94 : vector<8x36xf32>
    %cst_27 = arith.constant 0.000000e+00 : f32
    %96 = vector.broadcast %cst_27 : f32 to vector<8x36xf32>
    %97 = arith.maximumf %95, %96 : vector<8x36xf32>
    %98 = arith.index_cast %c1_i32 : i32 to index
    %c0_28 = arith.constant 0 : index
    %c0_29 = arith.constant 0 : index
    %99 = vector.load %arg13[%98, %c0_28, %c0_29] : memref<8x8x36xf32, #tpu.memory_space<vmem>>, vector<1x8x36xf32>
    %100 = vector.shape_cast %99 : vector<1x8x36xf32> to vector<8x36xf32>
    %101 = vector.shape_cast %97 : vector<8x36xf32> to vector<1x8x36xf32>
    tpu.vector_store %arg13[%98, %c0_28, %c0_29], %101 {strides = array<i32>} : memref<8x8x36xf32, #tpu.memory_space<vmem>>, vector<1x8x36xf32>,
    %c2_i32 = arith.constant 2 : i32
    %102 = arith.index_cast %c2_i32 : i32 to index
    %c0_30 = arith.constant 0 : index
    %c0_31 = arith.constant 0 : index
    %103 = vector.load %arg12[%102, %c0_30, %c0_31] : memref<8x32x36xf32, #tpu.memory_space<vmem>>, vector<1x32x36xf32>
    %104 = vector.shape_cast %103 : vector<1x32x36xf32> to vector<32x36xf32>
    %cst_32 = arith.constant dense<0.000000e+00> : vector<32x36xf32>
    %105 = tpu.matmul %45, %95, %cst_32 {dimension_numbers = #tpu.dot_dimension_numbers<[1], [0], [0], [1], [0, 0, 1, 1], [], []>} : vector<32x8xf32>, vector<8x36xf32>, vector<32x36xf32> -> vector<32x36xf32>
    %106 = arith.addf %104, %105 : vector<32x36xf32>
    %107 = vector.extract_strided_slice %106 {offsets = [0, 0], sizes = [24, 36], strides = [1, 1]} : vector<32x36xf32> to vector<24x36xf32>
    %108 = arith.negf %107 : vector<24x36xf32>
    %109 = math.exp %108 : vector<24x36xf32>
    %cst_33 = arith.constant 1.000000e+00 : f32
    %110 = vector.broadcast %cst_33 : f32 to vector<24x36xf32>
    %111 = arith.addf %110, %109 : vector<24x36xf32>
    %112 = arith.divf %110, %111 : vector<24x36xf32>
    %113 = vector.extract_strided_slice %106 {offsets = [24, 0], sizes = [8, 36], strides = [1, 1]} : vector<32x36xf32> to vector<8x36xf32>
    %114 = math.tanh %113 : vector<8x36xf32>
    %115 = vector.extract_strided_slice %112 {offsets = [0, 0], sizes = [8, 36], strides = [1, 1]} : vector<24x36xf32> to vector<8x36xf32>
    %116 = vector.extract_strided_slice %112 {offsets = [8, 0], sizes = [8, 36], strides = [1, 1]} : vector<24x36xf32> to vector<8x36xf32>
    %117 = vector.extract_strided_slice %112 {offsets = [16, 0], sizes = [8, 36], strides = [1, 1]} : vector<24x36xf32> to vector<8x36xf32>
    %118 = arith.mulf %116, %93 : vector<8x36xf32>
    %119 = arith.mulf %115, %114 : vector<8x36xf32>
    %120 = arith.addf %118, %119 : vector<8x36xf32>
    %121 = math.tanh %120 : vector<8x36xf32>
    %122 = arith.mulf %117, %121 : vector<8x36xf32>
    %cst_34 = arith.constant 0.000000e+00 : f32
    %123 = vector.broadcast %cst_34 : f32 to vector<8x36xf32>
    %124 = arith.maximumf %122, %123 : vector<8x36xf32>
    %125 = arith.index_cast %c2_i32 : i32 to index
    %c0_35 = arith.constant 0 : index
    %c0_36 = arith.constant 0 : index
    %126 = vector.load %arg13[%125, %c0_35, %c0_36] : memref<8x8x36xf32, #tpu.memory_space<vmem>>, vector<1x8x36xf32>
    %127 = vector.shape_cast %126 : vector<1x8x36xf32> to vector<8x36xf32>
    %128 = vector.shape_cast %124 : vector<8x36xf32> to vector<1x8x36xf32>
    tpu.vector_store %arg13[%125, %c0_35, %c0_36], %128 {strides = array<i32>} : memref<8x8x36xf32, #tpu.memory_space<vmem>>, vector<1x8x36xf32>,
    %c3_i32 = arith.constant 3 : i32
    %129 = arith.index_cast %c3_i32 : i32 to index
    %c0_37 = arith.constant 0 : index
    %c0_38 = arith.constant 0 : index
    %130 = vector.load %arg12[%129, %c0_37, %c0_38] : memref<8x32x36xf32, #tpu.memory_space<vmem>>, vector<1x32x36xf32>
    %131 = vector.shape_cast %130 : vector<1x32x36xf32> to vector<32x36xf32>
    %cst_39 = arith.constant dense<0.000000e+00> : vector<32x36xf32>
    %132 = tpu.matmul %45, %122, %cst_39 {dimension_numbers = #tpu.dot_dimension_numbers<[1], [0], [0], [1], [0, 0, 1, 1], [], []>} : vector<32x8xf32>, vector<8x36xf32>, vector<32x36xf32> -> vector<32x36xf32>
    %133 = arith.addf %131, %132 : vector<32x36xf32>
    %134 = vector.extract_strided_slice %133 {offsets = [0, 0], sizes = [24, 36], strides = [1, 1]} : vector<32x36xf32> to vector<24x36xf32>
    %135 = arith.negf %134 : vector<24x36xf32>
    %136 = math.exp %135 : vector<24x36xf32>
    %cst_40 = arith.constant 1.000000e+00 : f32
    %137 = vector.broadcast %cst_40 : f32 to vector<24x36xf32>
    %138 = arith.addf %137, %136 : vector<24x36xf32>
    %139 = arith.divf %137, %138 : vector<24x36xf32>
    %140 = vector.extract_strided_slice %133 {offsets = [24, 0], sizes = [8, 36], strides = [1, 1]} : vector<32x36xf32> to vector<8x36xf32>
    %141 = math.tanh %140 : vector<8x36xf32>
    %142 = vector.extract_strided_slice %139 {offsets = [0, 0], sizes = [8, 36], strides = [1, 1]} : vector<24x36xf32> to vector<8x36xf32>
    %143 = vector.extract_strided_slice %139 {offsets = [8, 0], sizes = [8, 36], strides = [1, 1]} : vector<24x36xf32> to vector<8x36xf32>
    %144 = vector.extract_strided_slice %139 {offsets = [16, 0], sizes = [8, 36], strides = [1, 1]} : vector<24x36xf32> to vector<8x36xf32>
    %145 = arith.mulf %143, %120 : vector<8x36xf32>
    %146 = arith.mulf %142, %141 : vector<8x36xf32>
    %147 = arith.addf %145, %146 : vector<8x36xf32>
    %148 = math.tanh %147 : vector<8x36xf32>
    %149 = arith.mulf %144, %148 : vector<8x36xf32>
    %cst_41 = arith.constant 0.000000e+00 : f32
    %150 = vector.broadcast %cst_41 : f32 to vector<8x36xf32>
    %151 = arith.maximumf %149, %150 : vector<8x36xf32>
    %152 = arith.index_cast %c3_i32 : i32 to index
    %c0_42 = arith.constant 0 : index
    %c0_43 = arith.constant 0 : index
    %153 = vector.load %arg13[%152, %c0_42, %c0_43] : memref<8x8x36xf32, #tpu.memory_space<vmem>>, vector<1x8x36xf32>
    %154 = vector.shape_cast %153 : vector<1x8x36xf32> to vector<8x36xf32>
    %155 = vector.shape_cast %151 : vector<8x36xf32> to vector<1x8x36xf32>
    tpu.vector_store %arg13[%152, %c0_42, %c0_43], %155 {strides = array<i32>} : memref<8x8x36xf32, #tpu.memory_space<vmem>>, vector<1x8x36xf32>,
    %c4_i32 = arith.constant 4 : i32
    %156 = arith.index_cast %c4_i32 : i32 to index
    %c0_44 = arith.constant 0 : index
    %c0_45 = arith.constant 0 : index
    %157 = vector.load %arg12[%156, %c0_44, %c0_45] : memref<8x32x36xf32, #tpu.memory_space<vmem>>, vector<1x32x36xf32>
    %158 = vector.shape_cast %157 : vector<1x32x36xf32> to vector<32x36xf32>
    %cst_46 = arith.constant dense<0.000000e+00> : vector<32x36xf32>
    %159 = tpu.matmul %45, %149, %cst_46 {dimension_numbers = #tpu.dot_dimension_numbers<[1], [0], [0], [1], [0, 0, 1, 1], [], []>} : vector<32x8xf32>, vector<8x36xf32>, vector<32x36xf32> -> vector<32x36xf32>
    %160 = arith.addf %158, %159 : vector<32x36xf32>
    %161 = vector.extract_strided_slice %160 {offsets = [0, 0], sizes = [24, 36], strides = [1, 1]} : vector<32x36xf32> to vector<24x36xf32>
    %162 = arith.negf %161 : vector<24x36xf32>
    %163 = math.exp %162 : vector<24x36xf32>
    %cst_47 = arith.constant 1.000000e+00 : f32
    %164 = vector.broadcast %cst_47 : f32 to vector<24x36xf32>
    %165 = arith.addf %164, %163 : vector<24x36xf32>
    %166 = arith.divf %164, %165 : vector<24x36xf32>
    %167 = vector.extract_strided_slice %160 {offsets = [24, 0], sizes = [8, 36], strides = [1, 1]} : vector<32x36xf32> to vector<8x36xf32>
    %168 = math.tanh %167 : vector<8x36xf32>
    %169 = vector.extract_strided_slice %166 {offsets = [0, 0], sizes = [8, 36], strides = [1, 1]} : vector<24x36xf32> to vector<8x36xf32>
    %170 = vector.extract_strided_slice %166 {offsets = [8, 0], sizes = [8, 36], strides = [1, 1]} : vector<24x36xf32> to vector<8x36xf32>
    %171 = vector.extract_strided_slice %166 {offsets = [16, 0], sizes = [8, 36], strides = [1, 1]} : vector<24x36xf32> to vector<8x36xf32>
    %172 = arith.mulf %170, %147 : vector<8x36xf32>
    %173 = arith.mulf %169, %168 : vector<8x36xf32>
    %174 = arith.addf %172, %173 : vector<8x36xf32>
    %175 = math.tanh %174 : vector<8x36xf32>
    %176 = arith.mulf %171, %175 : vector<8x36xf32>
    %cst_48 = arith.constant 0.000000e+00 : f32
    %177 = vector.broadcast %cst_48 : f32 to vector<8x36xf32>
    %178 = arith.maximumf %176, %177 : vector<8x36xf32>
    %179 = arith.index_cast %c4_i32 : i32 to index
    %c0_49 = arith.constant 0 : index
    %c0_50 = arith.constant 0 : index
    %180 = vector.load %arg13[%179, %c0_49, %c0_50] : memref<8x8x36xf32, #tpu.memory_space<vmem>>, vector<1x8x36xf32>
    %181 = vector.shape_cast %180 : vector<1x8x36xf32> to vector<8x36xf32>
    %182 = vector.shape_cast %178 : vector<8x36xf32> to vector<1x8x36xf32>
    tpu.vector_store %arg13[%179, %c0_49, %c0_50], %182 {strides = array<i32>} : memref<8x8x36xf32, #tpu.memory_space<vmem>>, vector<1x8x36xf32>,
    %c5_i32 = arith.constant 5 : i32
    %183 = arith.index_cast %c5_i32 : i32 to index
    %c0_51 = arith.constant 0 : index
    %c0_52 = arith.constant 0 : index
    %184 = vector.load %arg12[%183, %c0_51, %c0_52] : memref<8x32x36xf32, #tpu.memory_space<vmem>>, vector<1x32x36xf32>
    %185 = vector.shape_cast %184 : vector<1x32x36xf32> to vector<32x36xf32>
    %cst_53 = arith.constant dense<0.000000e+00> : vector<32x36xf32>
    %186 = tpu.matmul %45, %176, %cst_53 {dimension_numbers = #tpu.dot_dimension_numbers<[1], [0], [0], [1], [0, 0, 1, 1], [], []>} : vector<32x8xf32>, vector<8x36xf32>, vector<32x36xf32> -> vector<32x36xf32>
    %187 = arith.addf %185, %186 : vector<32x36xf32>
    %188 = vector.extract_strided_slice %187 {offsets = [0, 0], sizes = [24, 36], strides = [1, 1]} : vector<32x36xf32> to vector<24x36xf32>
    %189 = arith.negf %188 : vector<24x36xf32>
    %190 = math.exp %189 : vector<24x36xf32>
    %cst_54 = arith.constant 1.000000e+00 : f32
    %191 = vector.broadcast %cst_54 : f32 to vector<24x36xf32>
    %192 = arith.addf %191, %190 : vector<24x36xf32>
    %193 = arith.divf %191, %192 : vector<24x36xf32>
    %194 = vector.extract_strided_slice %187 {offsets = [24, 0], sizes = [8, 36], strides = [1, 1]} : vector<32x36xf32> to vector<8x36xf32>
    %195 = math.tanh %194 : vector<8x36xf32>
    %196 = vector.extract_strided_slice %193 {offsets = [0, 0], sizes = [8, 36], strides = [1, 1]} : vector<24x36xf32> to vector<8x36xf32>
    %197 = vector.extract_strided_slice %193 {offsets = [8, 0], sizes = [8, 36], strides = [1, 1]} : vector<24x36xf32> to vector<8x36xf32>
    %198 = vector.extract_strided_slice %193 {offsets = [16, 0], sizes = [8, 36], strides = [1, 1]} : vector<24x36xf32> to vector<8x36xf32>
    %199 = arith.mulf %197, %174 : vector<8x36xf32>
    %200 = arith.mulf %196, %195 : vector<8x36xf32>
    %201 = arith.addf %199, %200 : vector<8x36xf32>
    %202 = math.tanh %201 : vector<8x36xf32>
    %203 = arith.mulf %198, %202 : vector<8x36xf32>
    %cst_55 = arith.constant 0.000000e+00 : f32
    %204 = vector.broadcast %cst_55 : f32 to vector<8x36xf32>
    %205 = arith.maximumf %203, %204 : vector<8x36xf32>
    %206 = arith.index_cast %c5_i32 : i32 to index
    %c0_56 = arith.constant 0 : index
    %c0_57 = arith.constant 0 : index
    %207 = vector.load %arg13[%206, %c0_56, %c0_57] : memref<8x8x36xf32, #tpu.memory_space<vmem>>, vector<1x8x36xf32>
    %208 = vector.shape_cast %207 : vector<1x8x36xf32> to vector<8x36xf32>
    %209 = vector.shape_cast %205 : vector<8x36xf32> to vector<1x8x36xf32>
    tpu.vector_store %arg13[%206, %c0_56, %c0_57], %209 {strides = array<i32>} : memref<8x8x36xf32, #tpu.memory_space<vmem>>, vector<1x8x36xf32>,
    %c6_i32 = arith.constant 6 : i32
    %210 = arith.index_cast %c6_i32 : i32 to index
    %c0_58 = arith.constant 0 : index
    %c0_59 = arith.constant 0 : index
    %211 = vector.load %arg12[%210, %c0_58, %c0_59] : memref<8x32x36xf32, #tpu.memory_space<vmem>>, vector<1x32x36xf32>
    %212 = vector.shape_cast %211 : vector<1x32x36xf32> to vector<32x36xf32>
    %cst_60 = arith.constant dense<0.000000e+00> : vector<32x36xf32>
    %213 = tpu.matmul %45, %203, %cst_60 {dimension_numbers = #tpu.dot_dimension_numbers<[1], [0], [0], [1], [0, 0, 1, 1], [], []>} : vector<32x8xf32>, vector<8x36xf32>, vector<32x36xf32> -> vector<32x36xf32>
    %214 = arith.addf %212, %213 : vector<32x36xf32>
    %215 = vector.extract_strided_slice %214 {offsets = [0, 0], sizes = [24, 36], strides = [1, 1]} : vector<32x36xf32> to vector<24x36xf32>
    %216 = arith.negf %215 : vector<24x36xf32>
    %217 = math.exp %216 : vector<24x36xf32>
    %cst_61 = arith.constant 1.000000e+00 : f32
    %218 = vector.broadcast %cst_61 : f32 to vector<24x36xf32>
    %219 = arith.addf %218, %217 : vector<24x36xf32>
    %220 = arith.divf %218, %219 : vector<24x36xf32>
    %221 = vector.extract_strided_slice %214 {offsets = [24, 0], sizes = [8, 36], strides = [1, 1]} : vector<32x36xf32> to vector<8x36xf32>
    %222 = math.tanh %221 : vector<8x36xf32>
    %223 = vector.extract_strided_slice %220 {offsets = [0, 0], sizes = [8, 36], strides = [1, 1]} : vector<24x36xf32> to vector<8x36xf32>
    %224 = vector.extract_strided_slice %220 {offsets = [8, 0], sizes = [8, 36], strides = [1, 1]} : vector<24x36xf32> to vector<8x36xf32>
    %225 = vector.extract_strided_slice %220 {offsets = [16, 0], sizes = [8, 36], strides = [1, 1]} : vector<24x36xf32> to vector<8x36xf32>
    %226 = arith.mulf %224, %201 : vector<8x36xf32>
    %227 = arith.mulf %223, %222 : vector<8x36xf32>
    %228 = arith.addf %226, %227 : vector<8x36xf32>
    %229 = math.tanh %228 : vector<8x36xf32>
    %230 = arith.mulf %225, %229 : vector<8x36xf32>
    %cst_62 = arith.constant 0.000000e+00 : f32
    %231 = vector.broadcast %cst_62 : f32 to vector<8x36xf32>
    %232 = arith.maximumf %230, %231 : vector<8x36xf32>
    %233 = arith.index_cast %c6_i32 : i32 to index
    %c0_63 = arith.constant 0 : index
    %c0_64 = arith.constant 0 : index
    %234 = vector.load %arg13[%233, %c0_63, %c0_64] : memref<8x8x36xf32, #tpu.memory_space<vmem>>, vector<1x8x36xf32>
    %235 = vector.shape_cast %234 : vector<1x8x36xf32> to vector<8x36xf32>
    %236 = vector.shape_cast %232 : vector<8x36xf32> to vector<1x8x36xf32>
    tpu.vector_store %arg13[%233, %c0_63, %c0_64], %236 {strides = array<i32>} : memref<8x8x36xf32, #tpu.memory_space<vmem>>, vector<1x8x36xf32>,
    %c7_i32 = arith.constant 7 : i32
    %237 = arith.index_cast %c7_i32 : i32 to index
    %c0_65 = arith.constant 0 : index
    %c0_66 = arith.constant 0 : index
    %238 = vector.load %arg12[%237, %c0_65, %c0_66] : memref<8x32x36xf32, #tpu.memory_space<vmem>>, vector<1x32x36xf32>
    %239 = vector.shape_cast %238 : vector<1x32x36xf32> to vector<32x36xf32>
    %cst_67 = arith.constant dense<0.000000e+00> : vector<32x36xf32>
    %240 = tpu.matmul %45, %230, %cst_67 {dimension_numbers = #tpu.dot_dimension_numbers<[1], [0], [0], [1], [0, 0, 1, 1], [], []>} : vector<32x8xf32>, vector<8x36xf32>, vector<32x36xf32> -> vector<32x36xf32>
    %241 = arith.addf %239, %240 : vector<32x36xf32>
    %242 = vector.extract_strided_slice %241 {offsets = [0, 0], sizes = [24, 36], strides = [1, 1]} : vector<32x36xf32> to vector<24x36xf32>
    %243 = arith.negf %242 : vector<24x36xf32>
    %244 = math.exp %243 : vector<24x36xf32>
    %cst_68 = arith.constant 1.000000e+00 : f32
    %245 = vector.broadcast %cst_68 : f32 to vector<24x36xf32>
    %246 = arith.addf %245, %244 : vector<24x36xf32>
    %247 = arith.divf %245, %246 : vector<24x36xf32>
    %248 = vector.extract_strided_slice %241 {offsets = [24, 0], sizes = [8, 36], strides = [1, 1]} : vector<32x36xf32> to vector<8x36xf32>
    %249 = math.tanh %248 : vector<8x36xf32>
    %250 = vector.extract_strided_slice %247 {offsets = [0, 0], sizes = [8, 36], strides = [1, 1]} : vector<24x36xf32> to vector<8x36xf32>
    %251 = vector.extract_strided_slice %247 {offsets = [8, 0], sizes = [8, 36], strides = [1, 1]} : vector<24x36xf32> to vector<8x36xf32>
    %252 = vector.extract_strided_slice %247 {offsets = [16, 0], sizes = [8, 36], strides = [1, 1]} : vector<24x36xf32> to vector<8x36xf32>
    %253 = arith.mulf %251, %228 : vector<8x36xf32>
    %254 = arith.mulf %250, %249 : vector<8x36xf32>
    %255 = arith.addf %253, %254 : vector<8x36xf32>
    %256 = math.tanh %255 : vector<8x36xf32>
    %257 = arith.mulf %252, %256 : vector<8x36xf32>
    %cst_69 = arith.constant 0.000000e+00 : f32
    %258 = vector.broadcast %cst_69 : f32 to vector<8x36xf32>
    %259 = arith.maximumf %257, %258 : vector<8x36xf32>
    %260 = arith.index_cast %c7_i32 : i32 to index
    %c0_70 = arith.constant 0 : index
    %c0_71 = arith.constant 0 : index
    %261 = vector.load %arg13[%260, %c0_70, %c0_71] : memref<8x8x36xf32, #tpu.memory_space<vmem>>, vector<1x8x36xf32>
    %262 = vector.shape_cast %261 : vector<1x8x36xf32> to vector<8x36xf32>
    %263 = vector.shape_cast %259 : vector<8x36xf32> to vector<1x8x36xf32>
    tpu.vector_store %arg13[%260, %c0_70, %c0_71], %263 {strides = array<i32>} : memref<8x8x36xf32, #tpu.memory_space<vmem>>, vector<1x8x36xf32>,
    %c8_i32 = arith.constant 8 : i32
    %c0_72 = arith.constant 0 : index
    %c0_73 = arith.constant 0 : index
    %264 = vector.load %arg10[%c0_72, %c0_73] : memref<8x36xf32, #tpu.memory_space<vmem>>, vector<8x36xf32>
    tpu.vector_store %arg10[%c0_72, %c0_73], %257 {strides = array<i32>} : memref<8x36xf32, #tpu.memory_space<vmem>>, vector<8x36xf32>,
    %c0_74 = arith.constant 0 : index
    %c0_75 = arith.constant 0 : index
    %265 = vector.load %arg11[%c0_74, %c0_75] : memref<8x36xf32, #tpu.memory_space<vmem>>, vector<8x36xf32>
    tpu.vector_store %arg11[%c0_74, %c0_75], %255 {strides = array<i32>} : memref<8x36xf32, #tpu.memory_space<vmem>>, vector<8x36xf32>,
    %c0_76 = arith.constant 0 : index
    %c0_77 = arith.constant 0 : index
    %c0_78 = arith.constant 0 : index
    %266 = vector.load %arg13[%c0_76, %c0_77, %c0_78] : memref<8x8x36xf32, #tpu.memory_space<vmem>>, vector<8x8x36xf32>
    %267 = tpu.transpose %266, [0, 2, 1] : vector<8x8x36xf32> -> vector<8x36x8xf32>
    %268 = vector.extract_strided_slice %267 {offsets = [0, 0, 0], sizes = [8, 32, 8], strides = [1, 1, 1]} : vector<8x36x8xf32> to vector<8x32x8xf32>
    %269 = vector.extract_strided_slice %267 {offsets = [0, 1, 0], sizes = [8, 32, 8], strides = [1, 1, 1]} : vector<8x36x8xf32> to vector<8x32x8xf32>
    %270 = vector.extract_strided_slice %267 {offsets = [0, 2, 0], sizes = [8, 32, 8], strides = [1, 1, 1]} : vector<8x36x8xf32> to vector<8x32x8xf32>
    %271 = vector.extract_strided_slice %267 {offsets = [0, 3, 0], sizes = [8, 32, 8], strides = [1, 1, 1]} : vector<8x36x8xf32> to vector<8x32x8xf32>
    %272 = vector.extract_strided_slice %267 {offsets = [0, 4, 0], sizes = [8, 32, 8], strides = [1, 1, 1]} : vector<8x36x8xf32> to vector<8x32x8xf32>
    %273 = tpu.concatenate %268, %269, %270, %271, %272 in 2 : vector<8x32x8xf32>, vector<8x32x8xf32>, vector<8x32x8xf32>, vector<8x32x8xf32>, vector<8x32x8xf32> -> vector<8x32x40xf32>
    %274 = vector.shape_cast %273 : vector<8x32x40xf32> to vector<256x40xf32>
    %c0_79 = arith.constant 0 : index
    %c0_80 = arith.constant 0 : index
    %275 = vector.load %arg5[%c0_79, %c0_80] : memref<40x8xf32, #tpu.memory_space<vmem>>, vector<40x8xf32>
    %cst_81 = arith.constant dense<0.000000e+00> : vector<256x8xf32>
    %276 = tpu.matmul %274, %275, %cst_81 {dimension_numbers = #tpu.dot_dimension_numbers<[1], [0], [0], [1], [0, 0, 1, 1], [], []>} : vector<256x40xf32>, vector<40x8xf32>, vector<256x8xf32> -> vector<256x8xf32>
    %277 = vector.shape_cast %276 : vector<256x8xf32> to vector<8x32x8xf32>
    %c0_82 = arith.constant 0 : index
    %c0_83 = arith.constant 0 : index
    %278 = vector.load %arg6[%c0_82, %c0_83] : memref<1x8xf32, #tpu.memory_space<vmem>>, vector<1x8xf32>
    %279 = vector.shape_cast %278 : vector<1x8xf32> to vector<1x1x8xf32>
    %280 = vector.broadcast %279 : vector<1x1x8xf32> to vector<8x32x8xf32>
    %281 = arith.addf %277, %280 : vector<8x32x8xf32>
    %282 = vector.extract_strided_slice %281 {offsets = [0, 0, 0], sizes = [8, 4, 8], strides = [1, 1, 1]} : vector<8x32x8xf32> to vector<8x4x8xf32>
    %cst_84 = arith.constant dense<0xFF800000> : vector<8x8xf32>
    %283 = vector.multi_reduction <maximumf>, %282, %cst_84 [1] : vector<8x4x8xf32> to vector<8x8xf32>
    %284 = vector.extract_strided_slice %281 {offsets = [0, 4, 0], sizes = [8, 4, 8], strides = [1, 1, 1]} : vector<8x32x8xf32> to vector<8x4x8xf32>
    %cst_85 = arith.constant dense<0xFF800000> : vector<8x8xf32>
    %285 = vector.multi_reduction <maximumf>, %284, %cst_85 [1] : vector<8x4x8xf32> to vector<8x8xf32>
    %286 = vector.extract_strided_slice %281 {offsets = [0, 8, 0], sizes = [8, 4, 8], strides = [1, 1, 1]} : vector<8x32x8xf32> to vector<8x4x8xf32>
    %cst_86 = arith.constant dense<0xFF800000> : vector<8x8xf32>
    %287 = vector.multi_reduction <maximumf>, %286, %cst_86 [1] : vector<8x4x8xf32> to vector<8x8xf32>
    %288 = vector.extract_strided_slice %281 {offsets = [0, 12, 0], sizes = [8, 4, 8], strides = [1, 1, 1]} : vector<8x32x8xf32> to vector<8x4x8xf32>
    %cst_87 = arith.constant dense<0xFF800000> : vector<8x8xf32>
    %289 = vector.multi_reduction <maximumf>, %288, %cst_87 [1] : vector<8x4x8xf32> to vector<8x8xf32>
    %290 = vector.extract_strided_slice %281 {offsets = [0, 16, 0], sizes = [8, 4, 8], strides = [1, 1, 1]} : vector<8x32x8xf32> to vector<8x4x8xf32>
    %cst_88 = arith.constant dense<0xFF800000> : vector<8x8xf32>
    %291 = vector.multi_reduction <maximumf>, %290, %cst_88 [1] : vector<8x4x8xf32> to vector<8x8xf32>
    %292 = vector.extract_strided_slice %281 {offsets = [0, 20, 0], sizes = [8, 4, 8], strides = [1, 1, 1]} : vector<8x32x8xf32> to vector<8x4x8xf32>
    %cst_89 = arith.constant dense<0xFF800000> : vector<8x8xf32>
    %293 = vector.multi_reduction <maximumf>, %292, %cst_89 [1] : vector<8x4x8xf32> to vector<8x8xf32>
    %294 = vector.extract_strided_slice %281 {offsets = [0, 24, 0], sizes = [8, 4, 8], strides = [1, 1, 1]} : vector<8x32x8xf32> to vector<8x4x8xf32>
    %cst_90 = arith.constant dense<0xFF800000> : vector<8x8xf32>
    %295 = vector.multi_reduction <maximumf>, %294, %cst_90 [1] : vector<8x4x8xf32> to vector<8x8xf32>
    %296 = vector.extract_strided_slice %281 {offsets = [0, 28, 0], sizes = [8, 4, 8], strides = [1, 1, 1]} : vector<8x32x8xf32> to vector<8x4x8xf32>
    %cst_91 = arith.constant dense<0xFF800000> : vector<8x8xf32>
    %297 = vector.multi_reduction <maximumf>, %296, %cst_91 [1] : vector<8x4x8xf32> to vector<8x8xf32>
    %298 = tpu.concatenate %283, %285, %287, %289, %291, %293, %295, %297 in 1 : vector<8x8xf32>, vector<8x8xf32>, vector<8x8xf32>, vector<8x8xf32>, vector<8x8xf32>, vector<8x8xf32>, vector<8x8xf32>, vector<8x8xf32> -> vector<8x64xf32>
    %cst_92 = arith.constant 0.000000e+00 : f32
    %299 = vector.broadcast %cst_92 : f32 to vector<8x64xf32>
    %300 = arith.maximumf %298, %299 : vector<8x64xf32>
    %c0_93 = arith.constant 0 : index
    %c0_94 = arith.constant 0 : index
    %301 = vector.load %arg7[%c0_93, %c0_94] : memref<64x128xf32, #tpu.memory_space<vmem>>, vector<64x128xf32>
    %cst_95 = arith.constant dense<0.000000e+00> : vector<8x128xf32>
    %302 = tpu.matmul %300, %301, %cst_95 {dimension_numbers = #tpu.dot_dimension_numbers<[1], [0], [0], [1], [0, 0, 1, 1], [], []>} : vector<8x64xf32>, vector<64x128xf32>, vector<8x128xf32> -> vector<8x128xf32>
    %c0_96 = arith.constant 0 : index
    %c0_97 = arith.constant 0 : index
    %303 = vector.load %arg8[%c0_96, %c0_97] : memref<1x128xf32, #tpu.memory_space<vmem>>, vector<1x128xf32>
    %304 = vector.broadcast %303 : vector<1x128xf32> to vector<8x128xf32>
    %305 = arith.addf %302, %304 : vector<8x128xf32>
    %306 = arith.negf %305 : vector<8x128xf32>
    %307 = math.exp %306 : vector<8x128xf32>
    %cst_98 = arith.constant 1.000000e+00 : f32
    %308 = vector.broadcast %cst_98 : f32 to vector<8x128xf32>
    %309 = arith.addf %308, %307 : vector<8x128xf32>
    %310 = arith.divf %308, %309 : vector<8x128xf32>
    %c0_99 = arith.constant 0 : index
    %c0_100 = arith.constant 0 : index
    %311 = vector.load %arg9[%c0_99, %c0_100] : memref<8x128xf32, #tpu.memory_space<vmem>>, vector<8x128xf32>
    tpu.vector_store %arg9[%c0_99, %c0_100], %310 {strides = array<i32>} : memref<8x128xf32, #tpu.memory_space<vmem>>, vector<8x128xf32>,
    return
  }
  func.func @transform_0(%arg0: i32) -> (i32, i32, i32) {
    %c0_i32 = arith.constant 0 : i32
    %c0_i32_0 = arith.constant 0 : i32
    %c0_i32_1 = arith.constant 0 : i32
    return %arg0, %c0_i32, %c0_i32_0 : i32, i32, i32
  }
  func.func @transform_1(%arg0: i32) -> (i32, i32) {
    %c0_i32 = arith.constant 0 : i32
    %c0_i32_0 = arith.constant 0 : i32
    %c0_i32_1 = arith.constant 0 : i32
    return %c0_i32, %c0_i32_0 : i32, i32
  }
  func.func @transform_2(%arg0: i32) -> (i32, i32) {
    %c0_i32 = arith.constant 0 : i32
    %c0_i32_0 = arith.constant 0 : i32
    %c0_i32_1 = arith.constant 0 : i32
    return %c0_i32, %c0_i32_0 : i32, i32
  }
  func.func @transform_3(%arg0: i32) -> (i32, i32) {
    %c0_i32 = arith.constant 0 : i32
    %c0_i32_0 = arith.constant 0 : i32
    %c0_i32_1 = arith.constant 0 : i32
    return %c0_i32, %c0_i32_0 : i32, i32
  }
  func.func @transform_4(%arg0: i32) -> (i32, i32) {
    %c0_i32 = arith.constant 0 : i32
    %c0_i32_0 = arith.constant 0 : i32
    %c0_i32_1 = arith.constant 0 : i32
    return %c0_i32, %c0_i32_0 : i32, i32
  }
  func.func @transform_5(%arg0: i32) -> (i32, i32) {
    %c0_i32 = arith.constant 0 : i32
    %c0_i32_0 = arith.constant 0 : i32
    %c0_i32_1 = arith.constant 0 : i32
    return %c0_i32, %c0_i32_0 : i32, i32
  }
  func.func @transform_6(%arg0: i32) -> (i32, i32) {
    %c0_i32 = arith.constant 0 : i32
    %c0_i32_0 = arith.constant 0 : i32
    %c0_i32_1 = arith.constant 0 : i32
    return %c0_i32, %c0_i32_0 : i32, i32
  }
  func.func @transform_7(%arg0: i32) -> (i32, i32) {
    %c0_i32 = arith.constant 0 : i32
    %c0_i32_0 = arith.constant 0 : i32
    %c0_i32_1 = arith.constant 0 : i32
    return %c0_i32, %c0_i32_0 : i32, i32
  }
  func.func @transform_8(%arg0: i32) -> (i32, i32) {
    %c0_i32 = arith.constant 0 : i32
    %c0_i32_0 = arith.constant 0 : i32
    return %arg0, %c0_i32 : i32, i32
  }
}

</mosaic_0001>

<bundles_post_ra>
// kernel: lstm_encoder.1
= control target key start
LH: loop header
LB: loop body
LE: loop exit
PB: predicated region body
PF: predicated region fallthrough
CT: control target
= control target key end

     0   :  { %vm33_vm0 = vcmask 293888   ;;  %vm679_vm1 = vcmask 64512   ;;  %v4363_v0 = vmov 0   ;;  %v6421_v2 = vmov 0.0   ;;  %s4369_s28 = smov 8   ;;  %s4371_s29 = smov 24   ;;  %s6412_s3 = inlined_call_operand.vmem [shape: f32[32,1], index: 3, kind: input, shape index: {}]   ;;  %s6413_s2 = inlined_call_operand.vmem [shape: f32[32,8], index: 2, kind: input, shape index: {}]   ;;  %s6414_s1 = inlined_call_operand.vmem [shape: f32[32,5], index: 1, kind: input, shape index: {}]   ;;  %s6415_s0 = inlined_call_operand.vmem [shape: f32[8,5,36], index: 0, kind: input, shape index: {}]   ;;  %s6416_s4 = inlined_call_operand.vmem [shape: f32[40,8], index: 4, kind: input, shape index: {}]   ;;  %s6417_s5 = inlined_call_operand.vmem [shape: f32[1,8], index: 5, kind: input, shape index: {}]   ;;  %s6418_s6 = inlined_call_operand.vmem [shape: f32[64,128], index: 6, kind: input, shape index: {}]   ;;  %s6419_s7 = inlined_call_operand.vmem [shape: f32[1,128], index: 7, kind: input, shape index: {}]   ;;  %s6420_s8 = inlined_call_operand.vmem [shape: f32[8,128], index: 8, kind: output, shape index: {}]  }
   0x1   :  { %4202 = vset.pattern.permute.xlu1 %v4363_v0  ;;  %v48_v1 = vld [vmem:[%s6412_s3] sm:$0xff]  ;;  %34 = vst.msk [vmem:[#allocation2] sm:$0xff] %vm33_vm0, %v6421_v2  ;;  %35 = vst.msk [vmem:[#allocation3] sm:$0xff] %vm33_vm0, %v6421_v2  ;;  %v4365_v5 = vmov 1   ;;  %v49_v6 = vld [vmem:[%s6412_s3 + $0x8] sm:$0xff]  ;;  %v4366_v10 = vmov 2   ;;  %v92_v19 = vlaneseq }
   0x2   :  { %v669_v3 = vld [vmem:[%s6413_s2] sm:$0xff]  ;;  %54 = vperm.xlu1 %4202, %v48_v1   ;;  %4203 = vset.pattern.permute.xlu0 %v4365_v5  ;;  %v45_v7 = vld [vmem:[%s6414_s1 + $0x8] sm:$0xff]  ;;  %v671_v11 = vld [vmem:[%s6413_s2 + $0x10] sm:$0xff]  ;;  %v4367_v13 = vmov 4   ;;  %v4368_v14 = vmov 3   ;;  %vm1960_vm2 = vcmask 1046528  }
   0x3   :  { %4022 = vmatprep.mubr.msk.f32.mxu0 %vm679_vm1, %v669_v3  ;;  %v44_v4 = vld [vmem:[%s6414_s1] sm:$0xff]  ;;  %4030 = vmatprep.mubr.msk.f32.mxu1 %vm679_vm1, %v669_v3  ;;  %v670_v9 = vld [vmem:[%s6413_s2 + $0x8] sm:$0xff]  ;;  %v672_v12 = vld [vmem:[%s6413_s2 + $0x18] sm:$0xff]  ;;  %v93_v20 = vshrl.u32 %v92_v19, 7  ;;  %vm2129_vm3 = vcmask 1045504   ;;  %vm2298_vm4 = vcmask 1044480  }
   0x4   :  { %189 = vperm.xlu0 %4203, %v44_v4   ;;  %v47_v15 = vld [vmem:[%s6414_s1 + $0x18] sm:$0xff]  ;;  %v46_v16 = vld [vmem:[%s6414_s1 + $0x10] sm:$0xff]  ;;  %v36_v22 = vld [vmem:[%s6415_s0] sm:$0x1f]  ;;  %s4370_s1 = smov 16   ;;  %vm2467_vm5 = vcmask 1043456  }
   0x5   :  { %v50_v17 = vld [vmem:[%s6412_s3 + $0x10] sm:$0xff]  ;;  %v51_v18 = vld [vmem:[%s6412_s3 + $0x18] sm:$0xff]  ;;  %v206_v21 = vsub.s32 1, %v93_v20  ;;  %v318_v23 = vsub.s32 2, %v93_v20  ;;  %v37_v24 = vld [vmem:[%s6415_s0 + $0x8] sm:$0x1f] }
   0x6   :  { %59 = vperm.xlu1 %4202, %v49_v6   ;;  %v38_v25 = vld [vmem:[%s6415_s0 + $0x10] sm:$0x1f]  ;;  %v39_v26 = vld [vmem:[%s6415_s0 + $0x18] sm:$0x1f]  ;;  %v40_v27 = vld [vmem:[%s6415_s0 + $0x20] sm:$0x1f] }
   0x7   :  { %v41_v28 = vld [vmem:[%s6415_s0 + $0x28] sm:$0x1f]  ;;  %v4487_v29 = vrot.slane %v36_v22, %v206_v21  ;;  %v4489_v30 = vrot.slane %v37_v24, %v206_v21  ;;  %v542_v31 = vsub.s32 4, %v93_v20  ;;  %v42_v32 = vld [vmem:[%s6415_s0 + $0x30] sm:$0x1f]  ;;  %v4497_v34 = vrot.slane %v38_v25, %v206_v21  ;;  %s4372_s3 = smov 32  }
   0x8   :  { %v673_v8 = vld [vmem:[#allocation2] sm:$0xff]  ;;  %4206 = vset.pattern.permute.xlu0 %v4366_v10  ;;  %v43_v33 = vld [vmem:[%s6415_s0 + $0x38] sm:$0x1f]  ;;  %v4499_v35 = vrot.slane %v39_v26, %v206_v21  ;;  %v4501_v36 = vrot.slane %v40_v27, %v206_v21  ;;  %v4503_v37 = vrot.slane %v41_v28, %v206_v21  ;;  %v4505_v38 = vrot.slane %v42_v32, %v206_v21  ;;  %s4377_s25 = smov 48  }
   0x9   :  { %4020 = vmatprep.subr.mxu0 %v673_v8  ;;  %305 = vperm.xlu0 %4206, %v45_v7   ;;  %6487 = vst [vmem:[#allocation6_spill] sm:$0xff] %v4487_v29  ;;  %6488 = vst [vmem:[#allocation7_spill] sm:$0xff] %v4489_v30  ;;  %v4507_v39 = vrot.slane %v43_v33, %v206_v21  ;;  %v4509_v40 = vrot.slane %v36_v22, %v318_v23  ;;  %v94_v46 = vsub.s32 0, %v93_v20  ;;  %vm2668_vm6 = vcmask 130048  }
   0xa   :  { %4021 = vmatpush3.msra.mxu0 %v673_v8  ;;  %4204 = vset.pattern.permute.xlu1 %v4365_v5  ;;  %6489 = vst [vmem:[#allocation8_spill] sm:$0xff] %v4497_v34  ;;  %6490 = vst [vmem:[#allocation9_spill] sm:$0xff] %v4499_v35  ;;  %v4511_v41 = vrot.slane %v37_v24, %v318_v23  ;;  %v4515_v43 = vrot.slane %v38_v25, %v318_v23  ;;  %v430_v55 = vsub.s32 3, %v93_v20  ;;  %vm2701_vm7 = vcmask 195584  }
   0xb   :  { %4023 = vmatmul.mubr.msk.f32.vlgmr.msra.gmra.mrb[0].mxu0 %vm679_vm1, %v670_v9  ;;  %193 = vperm.xlu1 %4204, %v45_v7   ;;  %6491 = vst [vmem:[#allocation10_spill] sm:$0xff] %v4501_v36  ;;  %6492 = vst [vmem:[#allocation11_spill] sm:$0xff] %v4503_v37  ;;  %v4517_v44 = vrot.slane %v39_v26, %v318_v23  ;;  %v4519_v45 = vrot.slane %v40_v27, %v318_v23  ;;  %vm2734_vm8 = vcmask 261120   ;;  %vm2772_vm9 = vcmask 326656  }
   0xc   :  { %4025 = vmatprep.mubr.msk.f32.mxu0 %vm679_vm1, %v671_v11  ;;  %6493 = vst [vmem:[#allocation12_spill] sm:$0xff] %v4505_v38  ;;  %6494 = vst [vmem:[#allocation13_spill] sm:$0xff] %v4507_v39  ;;  %v4521_v47 = vrot.slane %v41_v28, %v318_v23  ;;  %v4523_v48 = vrot.slane %v42_v32, %v318_v23  ;;  %v4525_v49 = vrot.slane %v43_v33, %v318_v23  ;;  %vm3133_vm10 = vcmask 60416  }
   0xd   :  { %4208 = vset.pattern.permute.xlu0 %v4367_v13  ;;  %6495 = vst [vmem:[#allocation14_spill] sm:$0xff] %v4509_v40  ;;  %6496 = vst [vmem:[#allocation15_spill] sm:$0xff] %v4511_v41  ;;  %v4527_v50 = vrot.slane %v36_v22, %v542_v31  ;;  %v4529_v52 = vrot.slane %v37_v24, %v542_v31  ;;  %v4531_v53 = vrot.slane %v38_v25, %v542_v31  ;;  %vm3190_vm11 = vcmask 64516  }
   0xe   :  { %525 = vperm.xlu0 %4208, %v44_v4   ;;  %6497 = vst [vmem:[#allocation16_spill] sm:$0xff] %v4515_v43  ;;  %6498 = vst [vmem:[#allocation17_spill] sm:$0xff] %v4517_v44  ;;  %v4533_v54 = vrot.slane %v39_v26, %v542_v31  ;;  %v4535_v56 = vrot.slane %v40_v27, %v542_v31  ;;  %v4537_v57 = vrot.slane %v41_v28, %v542_v31  ;;  %vm3591_vm12 = vcmask 1041409  }
   0xf   :  { %4026 = vmatmul.mubr.msk.f32.gmra.mrb[2].mxu0 %vm679_vm1, %v672_v12  ;;  %4205 = vset.pattern.permute.xlu1 %v4366_v10  ;;  %6499 = vst [vmem:[#allocation18_spill] sm:$0xff] %v4519_v45  ;;  %6500 = vst [vmem:[#allocation19_spill] sm:$0xff] %v4521_v47  ;;  %v4539_v58 = vrot.slane %v42_v32, %v542_v31  ;;  %v4541_v59 = vrot.slane %v43_v33, %v542_v31  ;;  %vm3593_vm13 = vcmask 1042434   ;;  %vm3595_vm14 = vcmask 1043459  }
  0x10   :  { %301 = vperm.xlu1 %4205, %v44_v4   ;;  %4038 = vmatprep.mubr.msk.f32.mxu0 %vm679_vm1, %v669_v3  ;;  %6501 = vst [vmem:[#allocation20_spill] sm:$0xff] %v4523_v48  ;;  %6502 = vst [vmem:[#allocation21_spill] sm:$0xff] %v4525_v49  ;;  %v4545_v61 = vrot.slane %v36_v22, %v94_v46  ;;  %v4547_v62 = vrot.slane %v37_v24, %v94_v46  ;;  %vm3597_vm15 = vcmask 1044484  }
  0x11   :  { %6503 = vst [vmem:[#allocation22_spill] sm:$0xff] %v4527_v50  ;;  %6504 = vst [vmem:[#allocation23_spill] sm:$0xff] %v4529_v52  ;;  %v4549_v63 = vrot.slane %v38_v25, %v94_v46  ;;  %v4553_v1 = vrot.slane %v40_v27, %v94_v46  ;;  %v4555_v3 = vrot.slane %v41_v28, %v94_v46 }
  0x12   :  { %4209 = vset.pattern.permute.xlu0 %v4363_v0  ;;  %6505 = vst [vmem:[#allocation24_spill] sm:$0xff] %v4531_v53  ;;  %6506 = vst [vmem:[#allocation25_spill] sm:$0xff] %v4533_v54  ;;  %v4561_v6 = vrot.slane %v36_v22, %v430_v55  ;;  %v4565_v8 = vrot.slane %v38_v25, %v430_v55  ;;  %v4567_v9 = vrot.slane %v39_v26, %v430_v55 }
  0x13   :  { %74 = vperm.xlu0 %4209, %v44_v4   ;;  %6507 = vst [vmem:[#allocation26_spill] sm:$0xff] %v4535_v56  ;;  %6508 = vst [vmem:[#allocation27_spill] sm:$0xff] %v4537_v57  ;;  %v4569_v11 = vrot.slane %v40_v27, %v430_v55  ;;  %v4571_v12 = vrot.slane %v41_v28, %v430_v55 }
  0x14   :  { %4207 = vset.pattern.permute.xlu1 %v4368_v14  ;;  %6509 = vst [vmem:[#allocation28_spill] sm:$0xff] %v4539_v58  ;;  %6510 = vst [vmem:[#allocation29_spill] sm:$0xff] %v4541_v59 }
  0x15   :  { %413 = vperm.xlu1 %4207, %v44_v4   ;;  %6512 = vst [vmem:[#allocation31_spill] sm:$0xff] %v4553_v1  ;;  %6513 = vst [vmem:[#allocation32_spill] sm:$0xff] %v4555_v3  ;;  %v4557_v4 = vrot.slane %v42_v32, %v94_v46 }
  0x17   :  { %79 = vperm.xlu0 %4209, %v45_v7   ;;  %6514 = vst [vmem:[#allocation33_spill] sm:$0xff] %v4557_v4 }
  0x19   :  { %417 = vperm.xlu1 %4207, %v45_v7  }
  0x1b   :  { %89 = vperm.xlu0 %4209, %v47_v15  }
  0x1d   :  { %4210 = vset.pattern.permute.xlu1 %v4367_v13 }
  0x1e   :  { %529 = vperm.xlu1 %4210, %v45_v7   ;;  %v4563_v7 = vrot.slane %v37_v24, %v430_v55 }
  0x1f   :  { %4212 = vset.pattern.permute.xlu0 %v4365_v5 }
  0x20   :  { %197 = vperm.xlu0 %4212, %v46_v16  }
  0x22   :  { %4211 = vset.pattern.permute.xlu1 %v4363_v0  ;;  %v4551_v0 = vrot.slane %v39_v26, %v94_v46 }
  0x23   :  { %84 = vperm.xlu1 %4211, %v46_v16  }
  0x24   :  { %4215 = vset.pattern.permute.xlu0 %v4366_v10 }
  0x25   :  { %313 = vperm.xlu0 %4215, %v47_v15  }
  0x27   :  { %64 = vperm.xlu1 %4211, %v50_v17  }
  0x29   :  { %4217 = vset.pattern.permute.xlu0 %v4367_v13 }
  0x2a   :  { %533 = vperm.xlu0 %4217, %v46_v16  }
  0x2b   :  { %69 = vperm.xlu1 %4211, %v51_v18  }
  0x2f   :  { %4213 = vset.pattern.permute.xlu1 %v4365_v5  ;;  %v4559_v5 = vrot.slane %v43_v33, %v94_v46 }
  0x30   :  { %201 = vperm.xlu1 %4213, %v47_v15  }
  0x31   :  { %6515 = vst [vmem:[#allocation34_spill] sm:$0xff] %v4559_v5 }
  0x34   :  { %4214 = vset.pattern.permute.xlu1 %v4366_v10 }
  0x35   :  { %309 = vperm.xlu1 %4214, %v46_v16  }
  0x39   :  { %4216 = vset.pattern.permute.xlu1 %v4368_v14  ;;  %v4575_v14 = vrot.slane %v43_v33, %v430_v55 }
  0x3a   :  { %421 = vperm.xlu1 %4216, %v46_v16  }
  0x3e   :  { %425 = vperm.xlu1 %4216, %v47_v15  }
  0x42   :  { %4218 = vset.pattern.permute.xlu1 %v4367_v13  ;;  %v4573_v13 = vrot.slane %v42_v32, %v430_v55 }
  0x43   :  { %537 = vperm.xlu1 %4218, %v47_v15  }
  0x81   :  { %v4513_v42 = vpop.permute.xlu1 %54 }
  0x83   :  { %v190_v51 = vpop.permute.xlu0 %189 }
  0x84   :  { %v236_v15 = vmul.f32 %v4487_v29, %v190_v51  ;;  %v240_v16 = vmul.f32 %v4489_v30, %v190_v51  ;;  %v244_v17 = vmul.f32 %v4497_v34, %v190_v51  ;;  %v248_v18 = vmul.f32 %v4499_v35, %v190_v51 }
  0x85   :  { %v4543_v60 = vpop.permute.xlu1 %59  ;;  %v252_v19 = vmul.f32 %v4501_v36, %v190_v51  ;;  %v256_v20 = vmul.f32 %v4503_v37, %v190_v51  ;;  %v260_v21 = vmul.f32 %v4505_v38, %v190_v51  ;;  %v264_v22 = vmul.f32 %v4507_v39, %v190_v51 }
  0x86   :  { %6511 = vst [vmem:[#allocation30_spill] sm:$0xff] %v4543_v60 }
  0x88   :  { %v306_v10 = vpop.permute.xlu0 %305 }
  0x89   :  { %v4586_v24 = vmul.f32 %v4509_v40, %v306_v10  ;;  %v4589_v25 = vmul.f32 %v4511_v41, %v306_v10  ;;  %v4592_v26 = vmul.f32 %v4515_v43, %v306_v10  ;;  %v4595_v27 = vmul.f32 %v4517_v44, %v306_v10 }
  0x8a   :  { %v194_v23 = vpop.permute.xlu1 %193  ;;  %v4598_v28 = vmul.f32 %v4519_v45, %v306_v10  ;;  %v4601_v31 = vmul.f32 %v4521_v47, %v306_v10  ;;  %v4604_v32 = vmul.f32 %v4523_v48, %v306_v10  ;;  %v4607_v33 = vmul.f32 %v4525_v49, %v306_v10 }
  0x8b   :  { %6516 = vst [vmem:[#allocation35_spill] sm:$0xff] %v4586_v24  ;;  %6517 = vst [vmem:[#allocation36_spill] sm:$0xff] %v4589_v25  ;;  %v4610_v46 = vmul.f32 %v4487_v29, %v194_v23  ;;  %v4613_v51 = vmul.f32 %v4489_v30, %v194_v23  ;;  %v4616_v55 = vmul.f32 %v4497_v34, %v194_v23 }
  0x8c   :  { %6518 = vst [vmem:[#allocation37_spill] sm:$0xff] %v4592_v26  ;;  %6519 = vst [vmem:[#allocation38_spill] sm:$0xff] %v4595_v27  ;;  %v4619_v2 = vmul.f32 %v4499_v35, %v194_v23  ;;  %v4628_v10 = vmul.f32 %v4505_v38, %v194_v23  ;;  %v4631_v29 = vmul.f32 %v4507_v39, %v194_v23 }
  0x8d   :  { %6520 = vst [vmem:[#allocation39_spill] sm:$0xff] %v4598_v28  ;;  %6521 = vst [vmem:[#allocation40_spill] sm:$0xff] %v4601_v31  ;;  %v526_v28 = vpop.permute.xlu0 %525  ;;  %v4622_v31 = vmul.f32 %v4501_v36, %v194_v23 }
  0x8e   :  { %6522 = vst [vmem:[#allocation41_spill] sm:$0xff] %v4604_v32  ;;  %6523 = vst [vmem:[#allocation42_spill] sm:$0xff] %v4607_v33  ;;  %v4625_v32 = vmul.f32 %v4503_v37, %v194_v23  ;;  %v4634_v30 = vmul.f32 %v4527_v50, %v526_v28  ;;  %v4637_v34 = vmul.f32 %v4529_v52, %v526_v28 }
  0x8f   :  { %6524 = vst [vmem:[#allocation43_spill] sm:$0xff] %v4610_v46  ;;  %6525 = vst [vmem:[#allocation44_spill] sm:$0xff] %v4613_v51  ;;  %v4640_v35 = vmul.f32 %v4531_v53, %v526_v28  ;;  %v4643_v36 = vmul.f32 %v4533_v54, %v526_v28  ;;  %v302_v37 = vpop.permute.xlu1 %301  ;;  %v4646_v33 = vmul.f32 %v4535_v56, %v526_v28 }
  0x90   :  { %6526 = vst [vmem:[#allocation45_spill] sm:$0xff] %v4616_v55  ;;  %6527 = vst [vmem:[#allocation46_spill] sm:$0xff] %v4619_v2  ;;  %v4649_v38 = vmul.f32 %v4537_v57, %v526_v28  ;;  %v4652_v23 = vmul.f32 %v4539_v58, %v526_v28  ;;  %v4655_v39 = vmul.f32 %v4541_v59, %v526_v28 }
  0x91   :  { %6528 = vst [vmem:[#allocation47_spill] sm:$0xff] %v4622_v31  ;;  %6529 = vst [vmem:[#allocation48_spill] sm:$0xff] %v4625_v32  ;;  %v348_v52 = vmul.f32 %v4509_v40, %v302_v37  ;;  %v352_v53 = vmul.f32 %v4511_v41, %v302_v37  ;;  %v356_v54 = vmul.f32 %v4515_v43, %v302_v37 }
  0x92   :  { %6530 = vst [vmem:[#allocation49_spill] sm:$0xff] %v4628_v10  ;;  %6531 = vst [vmem:[#allocation50_spill] sm:$0xff] %v4631_v29  ;;  %v360_v50 = vmul.f32 %v4517_v44, %v302_v37  ;;  %v364_v56 = vmul.f32 %v4519_v45, %v302_v37  ;;  %v368_v27 = vmul.f32 %v4521_v47, %v302_v37  ;;  %v75_v26 = vpop.permute.xlu0 %74 }
  0x93   :  { %v372_v57 = vmul.f32 %v4523_v48, %v302_v37  ;;  %v376_v58 = vmul.f32 %v4525_v49, %v302_v37  ;;  %v124_v28 = vmul.f32 %v4545_v61, %v75_v26  ;;  %v128_v59 = vmul.f32 %v4547_v62, %v75_v26 }
  0x94   :  { %v132_v40 = vmul.f32 %v4549_v63, %v75_v26  ;;  %v136_v41 = vmul.f32 %v4551_v0, %v75_v26  ;;  %v140_v43 = vmul.f32 %v4553_v1, %v75_v26  ;;  %v144_v44 = vmul.f32 %v4555_v3, %v75_v26  ;;  %v414_v48 = vpop.permute.xlu1 %413 }
  0x95   :  { %v148_v45 = vmul.f32 %v4557_v4, %v75_v26  ;;  %v152_v47 = vmul.f32 %v4559_v5, %v75_v26  ;;  %v156_v37 = vadd.f32 %v124_v28, %v4513_v42  ;;  %v160_v49 = vadd.f32 %v128_v59, %v4513_v42 }
  0x96   :  { %v164_v25 = vadd.f32 %v132_v40, %v4513_v42  ;;  %v168_v24 = vadd.f32 %v136_v41, %v4513_v42  ;;  %v172_v29 = vadd.f32 %v140_v43, %v4513_v42  ;;  %v176_v10 = vadd.f32 %v144_v44, %v4513_v42 }
  0x97   :  { %v180_v32 = vadd.f32 %v148_v45, %v4513_v42  ;;  %v184_v31 = vadd.f32 %v152_v47, %v4513_v42  ;;  %v268_v2 = vadd.f32 %v236_v15, %v156_v37  ;;  %v272_v55 = vadd.f32 %v240_v16, %v160_v49 }
  0x98   :  { %v276_v26 = vadd.f32 %v244_v17, %v164_v25  ;;  %v280_v51 = vadd.f32 %v248_v18, %v168_v24  ;;  %v284_v46 = vadd.f32 %v252_v19, %v172_v29  ;;  %v288_v28 = vadd.f32 %v256_v20, %v176_v10  ;;  %v4681_v5 = vpop.permute.xlu1 %417  ;;  %v80_v19 = vpop.permute.xlu0 %79 }
  0x99   :  { %v292_v60 = vadd.f32 %v260_v21, %v180_v32  ;;  %v296_v59 = vadd.f32 %v264_v22, %v184_v31  ;;  %v380_v40 = vadd.f32 %v348_v52, %v268_v2  ;;  %v384_v41 = vadd.f32 %v352_v53, %v272_v55  ;;  %v6534_v31 = vld [vmem:[#allocation33_spill] sm:$0xff]  ;;  %v6536_v55 = vld [vmem:[#allocation30_spill] sm:$0xff] }
  0x9a   :  { %v388_v4 = vadd.f32 %v356_v54, %v276_v26  ;;  %v392_v43 = vadd.f32 %v360_v50, %v280_v51  ;;  %v396_v3 = vadd.f32 %v364_v56, %v284_v46  ;;  %v400_v44 = vadd.f32 %v368_v27, %v288_v28 }
  0x9b   :  { %v404_v1 = vadd.f32 %v372_v57, %v292_v60  ;;  %v408_v45 = vadd.f32 %v376_v58, %v296_v59  ;;  %v460_v42 = vmul.f32 %v4561_v6, %v414_v48  ;;  %v464_v47 = vmul.f32 %v4563_v7, %v414_v48 }
  0x9c   :  { %v468_v49 = vmul.f32 %v4565_v8, %v414_v48  ;;  %v472_v29 = vmul.f32 %v4567_v9, %v414_v48  ;;  %v476_v15 = vmul.f32 %v4569_v11, %v414_v48  ;;  %v480_v16 = vmul.f32 %v4571_v12, %v414_v48 }
  0x9d   :  { %v484_v2 = vmul.f32 %v4573_v13, %v414_v48  ;;  %v488_v50 = vmul.f32 %v4575_v14, %v414_v48  ;;  %v492_v52 = vadd.f32 %v460_v42, %v380_v40  ;;  %v496_v53 = vadd.f32 %v464_v47, %v384_v41  ;;  %v4691_v57 = vpop.permute.xlu1 %529  ;;  %v6539_v47 = vld [vmem:[#allocation45_spill] sm:$0xff] }
  0x9e   :  { %v500_v54 = vadd.f32 %v468_v49, %v388_v4  ;;  %v504_v56 = vadd.f32 %v472_v29, %v392_v43  ;;  %v508_v58 = vadd.f32 %v476_v15, %v396_v3  ;;  %v512_v60 = vadd.f32 %v480_v16, %v400_v44  ;;  %v6537_v43 = vld [vmem:[#allocation43_spill] sm:$0xff]  ;;  %v6540_v29 = vld [vmem:[#allocation46_spill] sm:$0xff] }
  0x9f   :  { %v516_v17 = vadd.f32 %v484_v2, %v404_v1  ;;  %v520_v18 = vadd.f32 %v488_v50, %v408_v45  ;;  %v604_v20 = vadd.f32 %v4634_v30, %v492_v52  ;;  %v608_v21 = vadd.f32 %v4637_v34, %v496_v53  ;;  %v6533_v1 = vld [vmem:[#allocation32_spill] sm:$0xff]  ;;  %v6541_v16 = vld [vmem:[#allocation47_spill] sm:$0xff]  ;;  %v6543_v53 = vld [vmem:[#allocation49_spill] sm:$0xff] }
  0xa0   :  { %v612_v22 = vadd.f32 %v4640_v35, %v500_v54  ;;  %v616_v24 = vadd.f32 %v4643_v36, %v504_v56  ;;  %v620_v48 = vadd.f32 %v4646_v33, %v508_v58  ;;  %v624_v4 = vadd.f32 %v4649_v38, %v512_v60  ;;  %v6532_v38 = vld [vmem:[#allocation31_spill] sm:$0xff]  ;;  %v6535_v33 = vld [vmem:[#allocation34_spill] sm:$0xff]  ;;  %v6538_v45 = vld [vmem:[#allocation44_spill] sm:$0xff] }
  0xa1   :  { %v628_v25 = vadd.f32 %v4652_v23, %v516_v17  ;;  %v632_v3 = vadd.f32 %v4655_v39, %v520_v18  ;;  %637 = vst.msk [vmem:[#allocation4] sm:$0xff] %vm33_vm0, %v604_v20  ;;  %641 = vst.msk [vmem:[#allocation4 + $0x20] sm:$0xff] %vm33_vm0, %v608_v21  ;;  %v125_v30 = vmul.f32 %v4545_v61, %v80_v19  ;;  %v6542_v50 = vld [vmem:[#allocation48_spill] sm:$0xff]  ;;  %v6544_v56 = vld [vmem:[#allocation50_spill] sm:$0xff] }
  0xa2   :  { %645 = vst.msk [vmem:[#allocation4 + $0x40] sm:$0xff] %vm33_vm0, %v612_v22  ;;  %649 = vst.msk [vmem:[#allocation4 + $0x60] sm:$0xff] %vm33_vm0, %v616_v24  ;;  %v129_v34 = vmul.f32 %v4547_v62, %v80_v19  ;;  %v133_v35 = vmul.f32 %v4549_v63, %v80_v19  ;;  %v137_v36 = vmul.f32 %v4551_v0, %v80_v19  ;;  %v4717_v51 = vpop.permute.xlu1 %84  ;;  %v6545_v17 = vld [vmem:[#allocation35_spill] sm:$0xff]  ;;  %v6547_v21 = vld [vmem:[#allocation37_spill] sm:$0xff] }
  0xa3   :  { %653 = vst.msk [vmem:[#allocation4 + $0x80] sm:$0xff] %vm33_vm0, %v620_v48  ;;  %657 = vst.msk [vmem:[#allocation4 + $0xa0] sm:$0xff] %vm33_vm0, %v624_v4  ;;  %v141_v39 = vmul.f32 %v6532_v38, %v80_v19  ;;  %v145_v27 = vmul.f32 %v6533_v1, %v80_v19  ;;  %v149_v32 = vmul.f32 %v6534_v31, %v80_v19  ;;  %v6548_v24 = vld [vmem:[#allocation38_spill] sm:$0xff]  ;;  %v6549_v4 = vld [vmem:[#allocation39_spill] sm:$0xff] }
  0xa4   :  { %661 = vst.msk [vmem:[#allocation4 + $0xc0] sm:$0xff] %vm33_vm0, %v628_v25  ;;  %665 = vst.msk [vmem:[#allocation4 + $0xe0] sm:$0xff] %vm33_vm0, %v632_v3  ;;  %v153_v46 = vmul.f32 %v6535_v33, %v80_v19  ;;  %v157_v10 = vadd.f32 %v125_v30, %v6536_v55  ;;  %v161_v23 = vadd.f32 %v129_v34, %v6536_v55  ;;  %v6546_v19 = vld [vmem:[#allocation36_spill] sm:$0xff]  ;;  %v6551_v34 = vld [vmem:[#allocation41_spill] sm:$0xff] }
  0xa5   :  { %v165_v37 = vadd.f32 %v133_v35, %v6536_v55  ;;  %v169_v26 = vadd.f32 %v137_v36, %v6536_v55  ;;  %v173_v28 = vadd.f32 %v141_v39, %v6536_v55  ;;  %v177_v59 = vadd.f32 %v145_v27, %v6536_v55  ;;  %v6550_v3 = vld [vmem:[#allocation40_spill] sm:$0xff]  ;;  %v6552_v36 = vld [vmem:[#allocation42_spill] sm:$0xff] }
  0xa6   :  { %v181_v40 = vadd.f32 %v149_v32, %v6536_v55  ;;  %v185_v41 = vadd.f32 %v153_v46, %v6536_v55  ;;  %v269_v44 = vadd.f32 %v6537_v43, %v157_v10  ;;  %v273_v42 = vadd.f32 %v6538_v45, %v161_v23  ;;  %v4735_v60 = vpop.permute.xlu1 %64 }
  0xa7   :  { %v277_v49 = vadd.f32 %v6539_v47, %v165_v37  ;;  %v281_v15 = vadd.f32 %v6540_v29, %v169_v26  ;;  %v285_v2 = vadd.f32 %v6541_v16, %v173_v28  ;;  %v289_v52 = vadd.f32 %v6542_v50, %v177_v59 }
  0xa8   :  { %v293_v54 = vadd.f32 %v6543_v53, %v181_v40  ;;  %v297_v58 = vadd.f32 %v6544_v56, %v185_v41  ;;  %v381_v18 = vadd.f32 %v6545_v17, %v269_v44  ;;  %v385_v20 = vadd.f32 %v6546_v19, %v273_v42  ;;  %v6557_v53 = vld [vmem:[#allocation26_spill] sm:$0xff]  ;;  %v6558_v56 = vld [vmem:[#allocation27_spill] sm:$0xff]  ;;  %v6559_v17 = vld [vmem:[#allocation28_spill] sm:$0xff] }
  0xa9   :  { %v389_v22 = vadd.f32 %v6547_v21, %v277_v49  ;;  %v393_v48 = vadd.f32 %v6548_v24, %v281_v15  ;;  %v397_v25 = vadd.f32 %v6549_v4, %v285_v2  ;;  %v401_v30 = vadd.f32 %v6550_v3, %v289_v52  ;;  %v6553_v49 = vld [vmem:[#allocation22_spill] sm:$0xff]  ;;  %v6554_v15 = vld [vmem:[#allocation23_spill] sm:$0xff]  ;;  %v6555_v2 = vld [vmem:[#allocation24_spill] sm:$0xff] }
  0xaa   :  { %v405_v35 = vadd.f32 %v6551_v34, %v293_v54  ;;  %v409_v39 = vadd.f32 %v6552_v36, %v297_v58  ;;  %v461_v27 = vmul.f32 %v4561_v6, %v4681_v5  ;;  %v465_v32 = vmul.f32 %v4563_v7, %v4681_v5  ;;  %v4761_v28 = vpop.permute.xlu1 %69  ;;  %v6560_v19 = vld [vmem:[#allocation29_spill] sm:$0xff] }
  0xab   :  { %v469_v46 = vmul.f32 %v4565_v8, %v4681_v5  ;;  %v473_v55 = vmul.f32 %v4567_v9, %v4681_v5  ;;  %v477_v10 = vmul.f32 %v4569_v11, %v4681_v5  ;;  %v481_v23 = vmul.f32 %v4571_v12, %v4681_v5 }
  0xac   :  { %v485_v37 = vmul.f32 %v4573_v13, %v4681_v5  ;;  %v489_v26 = vmul.f32 %v4575_v14, %v4681_v5  ;;  %v493_v59 = vadd.f32 %v461_v27, %v381_v18  ;;  %v497_v40 = vadd.f32 %v465_v32, %v385_v20  ;;  %v6556_v5 = vld [vmem:[#allocation25_spill] sm:$0xff] }
  0xad   :  { %v501_v41 = vadd.f32 %v469_v46, %v389_v22  ;;  %v505_v43 = vadd.f32 %v473_v55, %v393_v48  ;;  %v509_v44 = vadd.f32 %v477_v10, %v397_v25  ;;  %v513_v45 = vadd.f32 %v481_v23, %v401_v30 }
  0xae   :  { %v517_v42 = vadd.f32 %v485_v37, %v405_v35  ;;  %v521_v47 = vadd.f32 %v489_v26, %v409_v39  ;;  %v573_v29 = vmul.f32 %v6553_v49, %v4691_v57  ;;  %v577_v16 = vmul.f32 %v6554_v15, %v4691_v57 }
  0xaf   :  { %v581_v50 = vmul.f32 %v6555_v2, %v4691_v57  ;;  %v585_v52 = vmul.f32 %v6556_v5, %v4691_v57  ;;  %v589_v54 = vmul.f32 %v6557_v53, %v4691_v57  ;;  %v593_v58 = vmul.f32 %v6558_v56, %v4691_v57  ;;  %v202_v34 = vpop.permute.xlu1 %201  ;;  %v90_v53 = vpop.permute.xlu0 %89 }
  0xb0   :  { %v597_v18 = vmul.f32 %v6559_v17, %v4691_v57  ;;  %v601_v20 = vmul.f32 %v6560_v19, %v4691_v57  ;;  %v605_v21 = vadd.f32 %v573_v29, %v493_v59  ;;  %v609_v22 = vadd.f32 %v577_v16, %v497_v40  ;;  %v6564_v16 = vld [vmem:[#allocation9_spill] sm:$0xff] }
  0xb1   :  { %v613_v24 = vadd.f32 %v581_v50, %v501_v41  ;;  %v617_v48 = vadd.f32 %v585_v52, %v505_v43  ;;  %v621_v4 = vadd.f32 %v589_v54, %v509_v44  ;;  %v625_v25 = vadd.f32 %v593_v58, %v513_v45  ;;  %v6561_v44 = vld [vmem:[#allocation6_spill] sm:$0xff]  ;;  %v6566_v58 = vld [vmem:[#allocation11_spill] sm:$0xff]  ;;  %v6576_v17 = vld [vmem:[#allocation21_spill] sm:$0xff] }
  0xb2   :  { %v629_v3 = vadd.f32 %v597_v18, %v517_v42  ;;  %v633_v30 = vadd.f32 %v601_v20, %v521_v47  ;;  %638 = vst.msk [vmem:[#allocation4 + $0x8] sm:$0xff] %vm33_vm0, %v605_v21  ;;  %642 = vst.msk [vmem:[#allocation4 + $0x28] sm:$0xff] %vm33_vm0, %v609_v22  ;;  %v126_v57 = vmul.f32 %v4545_v61, %v4717_v51  ;;  %v6563_v47 = vld [vmem:[#allocation8_spill] sm:$0xff]  ;;  %v6565_v52 = vld [vmem:[#allocation10_spill] sm:$0xff] }
  0xb3   :  { %646 = vst.msk [vmem:[#allocation4 + $0x48] sm:$0xff] %vm33_vm0, %v613_v24  ;;  %650 = vst.msk [vmem:[#allocation4 + $0x68] sm:$0xff] %vm33_vm0, %v617_v48  ;;  %v130_v35 = vmul.f32 %v4547_v62, %v4717_v51  ;;  %v134_v36 = vmul.f32 %v4549_v63, %v4717_v51  ;;  %v138_v39 = vmul.f32 %v4551_v0, %v4717_v51  ;;  %v6567_v20 = vld [vmem:[#allocation12_spill] sm:$0xff]  ;;  %v6568_v21 = vld [vmem:[#allocation13_spill] sm:$0xff] }
  0xb4   :  { %654 = vst.msk [vmem:[#allocation4 + $0x88] sm:$0xff] %vm33_vm0, %v621_v4  ;;  %658 = vst.msk [vmem:[#allocation4 + $0xa8] sm:$0xff] %vm33_vm0, %v625_v25  ;;  %v142_v27 = vmul.f32 %v6532_v38, %v4717_v51  ;;  %v146_v32 = vmul.f32 %v6533_v1, %v4717_v51  ;;  %v150_v46 = vmul.f32 %v6534_v31, %v4717_v51  ;;  %v310_v24 = vpop.permute.xlu1 %309  ;;  %v6569_v48 = vld [vmem:[#allocation14_spill] sm:$0xff]  ;;  %v6570_v25 = vld [vmem:[#allocation15_spill] sm:$0xff] }
  0xb5   :  { %662 = vst.msk [vmem:[#allocation4 + $0xc8] sm:$0xff] %vm33_vm0, %v629_v3  ;;  %666 = vst.msk [vmem:[#allocation4 + $0xe8] sm:$0xff] %vm33_vm0, %v633_v30  ;;  %v154_v55 = vmul.f32 %v6535_v33, %v4717_v51  ;;  %v158_v10 = vadd.f32 %v126_v57, %v4735_v60  ;;  %v162_v23 = vadd.f32 %v130_v35, %v4735_v60  ;;  %v6562_v51 = vld [vmem:[#allocation7_spill] sm:$0xff]  ;;  %v6571_v30 = vld [vmem:[#allocation16_spill] sm:$0xff] }
  0xb6   :  { %v166_v37 = vadd.f32 %v134_v36, %v4735_v60  ;;  %v170_v26 = vadd.f32 %v138_v39, %v4735_v60  ;;  %v174_v59 = vadd.f32 %v142_v27, %v4735_v60  ;;  %v178_v40 = vadd.f32 %v146_v32, %v4735_v60  ;;  %v6572_v35 = vld [vmem:[#allocation17_spill] sm:$0xff]  ;;  %v6573_v39 = vld [vmem:[#allocation18_spill] sm:$0xff]  ;;  %v6574_v32 = vld [vmem:[#allocation19_spill] sm:$0xff] }
  0xb7   :  { %v182_v41 = vadd.f32 %v150_v46, %v4735_v60  ;;  %v186_v43 = vadd.f32 %v154_v55, %v4735_v60  ;;  %v4812_v45 = vmul.f32 %v6561_v44, %v202_v34  ;;  %v4815_v42 = vmul.f32 %v6562_v51, %v202_v34  ;;  %v6575_v55 = vld [vmem:[#allocation20_spill] sm:$0xff] }
  0xb8   :  { %v4818_v29 = vmul.f32 %v6563_v47, %v202_v34  ;;  %v4821_v50 = vmul.f32 %v6564_v16, %v202_v34  ;;  %v4824_v54 = vmul.f32 %v6565_v52, %v202_v34  ;;  %v4827_v18 = vmul.f32 %v6566_v58, %v202_v34 }
  0xb9   :  { %v4830_v60 = vmul.f32 %v6567_v20, %v202_v34  ;;  %v4833_v22 = vmul.f32 %v6568_v21, %v202_v34  ;;  %v350_v4 = vmul.f32 %v6569_v48, %v310_v24  ;;  %v354_v3 = vmul.f32 %v6570_v25, %v310_v24 }
  0xba   :  { %v358_v57 = vmul.f32 %v6571_v30, %v310_v24  ;;  %v362_v36 = vmul.f32 %v6572_v35, %v310_v24  ;;  %v366_v27 = vmul.f32 %v6573_v39, %v310_v24  ;;  %v370_v46 = vmul.f32 %v6574_v32, %v310_v24 }
  0xbb   :  { %v374_v19 = vmul.f32 %v6575_v55, %v310_v24  ;;  %v378_v56 = vmul.f32 %v6576_v17, %v310_v24  ;;  %v127_v34 = vmul.f32 %v4545_v61, %v90_v53  ;;  %v131_v5 = vmul.f32 %v4547_v62, %v90_v53  ;;  %v422_v17 = vpop.permute.xlu1 %421 }
  0xbc   :  { %v135_v2 = vmul.f32 %v4549_v63, %v90_v53  ;;  %v139_v15 = vmul.f32 %v4551_v0, %v90_v53  ;;  %v143_v49 = vmul.f32 %v6532_v38, %v90_v53  ;;  %v147_v35 = vmul.f32 %v6533_v1, %v90_v53 }
  0xbd   :  { %v151_v39 = vmul.f32 %v6534_v31, %v90_v53  ;;  %v155_v32 = vmul.f32 %v6535_v33, %v90_v53  ;;  %v159_v55 = vadd.f32 %v127_v34, %v4761_v28  ;;  %v163_v24 = vadd.f32 %v131_v5, %v4761_v28 }
  0xbe   :  { %v167_v61 = vadd.f32 %v135_v2, %v4761_v28  ;;  %v171_v62 = vadd.f32 %v139_v15, %v4761_v28  ;;  %v175_v63 = vadd.f32 %v143_v49, %v4761_v28  ;;  %v179_v0 = vadd.f32 %v147_v35, %v4761_v28  ;;  %v198_v35 = vpop.permute.xlu0 %197 }
  0xbf   :  { %v183_v38 = vadd.f32 %v151_v39, %v4761_v28  ;;  %v187_v1 = vadd.f32 %v155_v32, %v4761_v28  ;;  %v4860_v31 = vmul.f32 %v4561_v6, %v422_v17  ;;  %v4863_v33 = vmul.f32 %v4563_v7, %v422_v17 }
  0xc0   :  { %v4866_v5 = vmul.f32 %v4565_v8, %v422_v17  ;;  %v4869_v15 = vmul.f32 %v4567_v9, %v422_v17  ;;  %v4872_v49 = vmul.f32 %v4569_v11, %v422_v17  ;;  %v4875_v2 = vmul.f32 %v4571_v12, %v422_v17 }
  0xc1   :  { %6577 = vst [vmem:[#allocation31_spill] sm:$0xff] %v4860_v31  ;;  %6578 = vst [vmem:[#allocation32_spill] sm:$0xff] %v4863_v33  ;;  %v4878_v28 = vmul.f32 %v4573_v13, %v422_v17  ;;  %v4881_v53 = vmul.f32 %v4575_v14, %v422_v17  ;;  %v238_v39 = vmul.f32 %v6561_v44, %v198_v35 }
  0xc2   :  { %6579 = vst [vmem:[#allocation33_spill] sm:$0xff] %v4866_v5  ;;  %6580 = vst [vmem:[#allocation34_spill] sm:$0xff] %v4869_v15  ;;  %v242_v32 = vmul.f32 %v6562_v51, %v198_v35  ;;  %v246_v34 = vmul.f32 %v6563_v47, %v198_v35  ;;  %v250_v15 = vmul.f32 %v6564_v16, %v198_v35 }
  0xc3   :  { %6581 = vst [vmem:[#allocation30_spill] sm:$0xff] %v4872_v49  ;;  %6582 = vst [vmem:[#allocation43_spill] sm:$0xff] %v4875_v2  ;;  %v254_v49 = vmul.f32 %v6565_v52, %v198_v35  ;;  %v258_v5 = vmul.f32 %v6566_v58, %v198_v35  ;;  %v262_v2 = vmul.f32 %v6567_v20, %v198_v35 }
  0xc4   :  { %6583 = vst [vmem:[#allocation44_spill] sm:$0xff] %v4878_v28  ;;  %6584 = vst [vmem:[#allocation45_spill] sm:$0xff] %v4881_v53  ;;  %v266_v28 = vmul.f32 %v6568_v21, %v198_v35  ;;  %v270_v33 = vadd.f32 %v238_v39, %v158_v10  ;;  %v274_v17 = vadd.f32 %v242_v32, %v162_v23  ;;  %v6593_v32 = vld [vmem:[#allocation22_spill] sm:$0xff] }
  0xc5   :  { %v278_v53 = vadd.f32 %v246_v34, %v166_v37  ;;  %v282_v31 = vadd.f32 %v250_v15, %v170_v26  ;;  %v286_v30 = vadd.f32 %v254_v49, %v174_v59  ;;  %v290_v44 = vadd.f32 %v258_v5, %v178_v40  ;;  %v426_v37 = vpop.permute.xlu1 %425 }
  0xc6   :  { %v294_v25 = vadd.f32 %v262_v2, %v182_v41  ;;  %v298_v51 = vadd.f32 %v266_v28, %v186_v43  ;;  %v4891_v48 = vadd.f32 %v350_v4, %v270_v33  ;;  %v4893_v47 = vadd.f32 %v354_v3, %v274_v17  ;;  %v6594_v17 = vld [vmem:[#allocation23_spill] sm:$0xff] }
  0xc7   :  { %v4895_v16 = vadd.f32 %v358_v57, %v278_v53  ;;  %v4897_v52 = vadd.f32 %v362_v36, %v282_v31  ;;  %v4899_v58 = vadd.f32 %v366_v27, %v286_v30  ;;  %v4901_v20 = vadd.f32 %v370_v46, %v290_v44  ;;  %v6587_v36 = vld [vmem:[#allocation16_spill] sm:$0xff]  ;;  %v6588_v27 = vld [vmem:[#allocation17_spill] sm:$0xff]  ;;  %v6589_v46 = vld [vmem:[#allocation18_spill] sm:$0xff] }
  0xc8   :  { %v4903_v10 = vadd.f32 %v374_v19, %v294_v25  ;;  %v4905_v23 = vadd.f32 %v378_v56, %v298_v51  ;;  %v463_v26 = vmul.f32 %v4561_v6, %v426_v37  ;;  %v467_v59 = vmul.f32 %v4563_v7, %v426_v37  ;;  %v314_v25 = vpop.permute.xlu0 %313  ;;  %v6595_v51 = vld [vmem:[#allocation24_spill] sm:$0xff] }
  0xc9   :  { %v471_v40 = vmul.f32 %v4565_v8, %v426_v37  ;;  %v475_v41 = vmul.f32 %v4567_v9, %v426_v37  ;;  %v479_v43 = vmul.f32 %v4569_v11, %v426_v37  ;;  %v483_v21 = vmul.f32 %v4571_v12, %v426_v37  ;;  %v538_v33 = vpop.permute.xlu1 %537 }
  0xca   :  { %v487_v4 = vmul.f32 %v4573_v13, %v426_v37  ;;  %v491_v19 = vmul.f32 %v4575_v14, %v426_v37  ;;  %v271_v56 = vadd.f32 %v4812_v45, %v159_v55  ;;  %v275_v3 = vadd.f32 %v4815_v42, %v163_v24  ;;  %v6585_v13 = vld [vmem:[#allocation14_spill] sm:$0xff]  ;;  %v6586_v14 = vld [vmem:[#allocation15_spill] sm:$0xff]  ;;  %v6591_v24 = vld [vmem:[#allocation20_spill] sm:$0xff] }
  0xcb   :  { %v279_v6 = vadd.f32 %v4818_v29, %v167_v61  ;;  %v283_v7 = vadd.f32 %v4821_v50, %v171_v62  ;;  %v287_v8 = vadd.f32 %v4824_v54, %v175_v63  ;;  %v291_v9 = vadd.f32 %v4827_v18, %v179_v0  ;;  %v6590_v55 = vld [vmem:[#allocation19_spill] sm:$0xff]  ;;  %v6592_v61 = vld [vmem:[#allocation21_spill] sm:$0xff] }
  0xcc   :  { %v295_v11 = vadd.f32 %v4830_v60, %v183_v38  ;;  %v299_v12 = vadd.f32 %v4833_v22, %v187_v1  ;;  %v351_v30 = vmul.f32 %v6585_v13, %v314_v25  ;;  %v355_v57 = vmul.f32 %v6586_v14, %v314_v25  ;;  %v6601_v14 = vld [vmem:[#allocation31_spill] sm:$0xff] }
  0xcd   :  { %v359_v45 = vmul.f32 %v6587_v36, %v314_v25  ;;  %v363_v42 = vmul.f32 %v6588_v27, %v314_v25  ;;  %v367_v29 = vmul.f32 %v6589_v46, %v314_v25  ;;  %v371_v50 = vmul.f32 %v6590_v55, %v314_v25  ;;  %v6602_v36 = vld [vmem:[#allocation32_spill] sm:$0xff]  ;;  %v6603_v27 = vld [vmem:[#allocation33_spill] sm:$0xff]  ;;  %v6604_v46 = vld [vmem:[#allocation34_spill] sm:$0xff] }
  0xce   :  { %v375_v54 = vmul.f32 %v6591_v24, %v314_v25  ;;  %v379_v18 = vmul.f32 %v6592_v61, %v314_v25  ;;  %v383_v62 = vadd.f32 %v351_v30, %v271_v56  ;;  %v387_v60 = vadd.f32 %v355_v57, %v275_v3  ;;  %v6596_v25 = vld [vmem:[#allocation25_spill] sm:$0xff]  ;;  %v6597_v3 = vld [vmem:[#allocation26_spill] sm:$0xff]  ;;  %v534_v30 = vpop.permute.xlu0 %533  ;;  %v6607_v24 = vld [vmem:[#allocation44_spill] sm:$0xff] }
  0xcf   :  { %v391_v63 = vadd.f32 %v359_v45, %v279_v6  ;;  %v395_v22 = vadd.f32 %v363_v42, %v283_v7  ;;  %v399_v0 = vadd.f32 %v367_v29, %v287_v8  ;;  %v403_v38 = vadd.f32 %v371_v50, %v291_v9  ;;  %v6598_v7 = vld [vmem:[#allocation27_spill] sm:$0xff]  ;;  %v6605_v55 = vld [vmem:[#allocation30_spill] sm:$0xff] }
  0xd0   :  { %v407_v1 = vadd.f32 %v375_v54, %v295_v11  ;;  %v411_v31 = vadd.f32 %v379_v18, %v299_v12  ;;  %v495_v5 = vadd.f32 %v463_v26, %v383_v62  ;;  %v499_v15 = vadd.f32 %v467_v59, %v387_v60  ;;  %v6599_v26 = vld [vmem:[#allocation28_spill] sm:$0xff]  ;;  %v6606_v50 = vld [vmem:[#allocation43_spill] sm:$0xff]  ;;  %v6608_v54 = vld [vmem:[#allocation45_spill] sm:$0xff] }
  0xd1   :  { %v503_v49 = vadd.f32 %v471_v40, %v391_v63  ;;  %v507_v2 = vadd.f32 %v475_v41, %v395_v22  ;;  %v511_v28 = vadd.f32 %v479_v43, %v399_v0  ;;  %v515_v53 = vadd.f32 %v483_v21, %v403_v38  ;;  %v6600_v40 = vld [vmem:[#allocation29_spill] sm:$0xff] }
  0xd2   :  { %v519_v35 = vadd.f32 %v487_v4, %v407_v1  ;;  %v523_v39 = vadd.f32 %v491_v19, %v411_v31  ;;  %v575_v34 = vmul.f32 %v6593_v32, %v538_v33  ;;  %v579_v44 = vmul.f32 %v6594_v17, %v538_v33 }
  0xd3   :  { %v583_v37 = vmul.f32 %v6595_v51, %v538_v33  ;;  %v587_v56 = vmul.f32 %v6596_v25, %v538_v33  ;;  %v591_v6 = vmul.f32 %v6597_v3, %v538_v33  ;;  %v595_v8 = vmul.f32 %v6598_v7, %v538_v33 }
  0xd4   :  { %v599_v59 = vmul.f32 %v6599_v26, %v538_v33  ;;  %v603_v41 = vmul.f32 %v6600_v40, %v538_v33  ;;  %v607_v43 = vadd.f32 %v575_v34, %v495_v5  ;;  %v611_v21 = vadd.f32 %v579_v44, %v499_v15  ;;  %v676_v15 = vld [vmem:[#allocation4 + $0x8] sm:$0xff] }
  0xd5   :  { %v615_v4 = vadd.f32 %v583_v37, %v503_v49  ;;  %v619_v19 = vadd.f32 %v587_v56, %v507_v2  ;;  %v623_v9 = vadd.f32 %v591_v6, %v511_v28  ;;  %v627_v11 = vadd.f32 %v595_v8, %v515_v53  ;;  %v675_v28 = vld [vmem:[#allocation4] sm:$0xff] }
  0xd6   :  { %v631_v12 = vadd.f32 %v599_v59, %v519_v35  ;;  %v635_v13 = vadd.f32 %v603_v41, %v523_v39  ;;  %640 = vst.msk [vmem:[#allocation4 + $0x18] sm:$0xff] %vm33_vm0, %v607_v43  ;;  %644 = vst.msk [vmem:[#allocation4 + $0x38] sm:$0xff] %vm33_vm0, %v611_v21  ;;  %v494_v57 = vadd.f32 %v6601_v14, %v4891_v48  ;;  %v674_v59 = vld [vmem:[#allocation3] sm:$0xff] }
  0xd7   :  { %648 = vst.msk [vmem:[#allocation4 + $0x58] sm:$0xff] %vm33_vm0, %v615_v4  ;;  %652 = vst.msk [vmem:[#allocation4 + $0x78] sm:$0xff] %vm33_vm0, %v619_v19  ;;  %v498_v45 = vadd.f32 %v6602_v36, %v4893_v47  ;;  %v502_v42 = vadd.f32 %v6603_v27, %v4895_v16  ;;  %v506_v29 = vadd.f32 %v6604_v46, %v4897_v52  ;;  %v4986_v14 = vld [vmem:[%s6413_s2 + $0x8] sm:$0xff]  ;;  %v5000_v36 = vld [vmem:[%s6413_s2 + $0x18] sm:$0xff] }
  0xd8   :  { %656 = vst.msk [vmem:[#allocation4 + $0x98] sm:$0xff] %vm33_vm0, %v623_v9  ;;  %660 = vst.msk [vmem:[#allocation4 + $0xb8] sm:$0xff] %vm33_vm0, %v627_v11  ;;  %v510_v48 = vadd.f32 %v6605_v55, %v4899_v58  ;;  %v514_v47 = vadd.f32 %v6606_v50, %v4901_v20  ;;  %v518_v16 = vadd.f32 %v6607_v24, %v4903_v10 }
  0xd9   :  { %664 = vst.msk [vmem:[#allocation4 + $0xd8] sm:$0xff] %vm33_vm0, %v631_v12  ;;  %668 = vst.msk [vmem:[#allocation4 + $0xf8] sm:$0xff] %vm33_vm0, %v635_v13  ;;  %v522_v52 = vadd.f32 %v6608_v54, %v4905_v23  ;;  %v574_v61 = vmul.f32 %v6593_v32, %v534_v30  ;;  %v578_v18 = vmul.f32 %v6594_v17, %v534_v30 }
  0xda   :  { %v582_v62 = vmul.f32 %v6595_v51, %v534_v30  ;;  %v586_v60 = vmul.f32 %v6596_v25, %v534_v30  ;;  %v590_v63 = vmul.f32 %v6597_v3, %v534_v30  ;;  %v594_v58 = vmul.f32 %v6598_v7, %v534_v30 }
  0xdb   :  { %v598_v20 = vmul.f32 %v6599_v26, %v534_v30  ;;  %v602_v22 = vmul.f32 %v6600_v40, %v534_v30  ;;  %v606_v10 = vadd.f32 %v574_v61, %v494_v57  ;;  %v610_v0 = vadd.f32 %v578_v18, %v498_v45  ;;  %v4993_v57 = vld [vmem:[%s6413_s2 + $0x10] sm:$0xff]  ;;  %v5007_v45 = vld [vmem:[%s6413_s2] sm:$0xff] }
  0xdc   :  { %v614_v38 = vadd.f32 %v582_v62, %v502_v42  ;;  %v618_v23 = vadd.f32 %v586_v60, %v506_v29  ;;  %v622_v1 = vadd.f32 %v590_v63, %v510_v48  ;;  %v626_v31 = vadd.f32 %v594_v58, %v514_v47 }
  0xdd   :  { %v630_v33 = vadd.f32 %v598_v20, %v518_v16  ;;  %v634_v5 = vadd.f32 %v602_v22, %v522_v52  ;;  %639 = vst.msk [vmem:[#allocation4 + $0x10] sm:$0xff] %vm33_vm0, %v606_v10  ;;  %643 = vst.msk [vmem:[#allocation4 + $0x30] sm:$0xff] %vm33_vm0, %v610_v0  ;;  %v678_v37 = vld [vmem:[#allocation4 + $0x18] sm:$0xff] }
  0xde   :  { %647 = vst.msk [vmem:[#allocation4 + $0x50] sm:$0xff] %vm33_vm0, %v614_v38  ;;  %651 = vst.msk [vmem:[#allocation4 + $0x70] sm:$0xff] %vm33_vm0, %v618_v23  ;;  %v4024_v49 = vpop.f32.mrb[0].mxu0 }
  0xdf   :  { %655 = vst.msk [vmem:[#allocation4 + $0x90] sm:$0xff] %vm33_vm0, %v622_v1  ;;  %659 = vst.msk [vmem:[#allocation4 + $0xb0] sm:$0xff] %vm33_vm0, %v626_v31  ;;  %v778_v2 = vadd.f32 %v4024_v49, %v676_v15  ;;  %v758_v53 = vpop.f32.mrb[1].mxu0 }
  0xe0   :  { %663 = vst.msk [vmem:[#allocation4 + $0xd0] sm:$0xff] %vm33_vm0, %v630_v33  ;;  %667 = vst.msk [vmem:[#allocation4 + $0xf0] sm:$0xff] %vm33_vm0, %v634_v5  ;;  %v777_v35 = vadd.f32 %v758_v53, %v675_v28 }
  0xe1   :  { %v3847_v39 = vmul.f32 -1.442695, %v778_v2 }
  0xe2   :  { %v3846_v32 = vmul.f32 -1.442695, %v777_v35  ;;  %v4027_v34 = vpop.f32.mrb[2].mxu0 }
  0xe3   :  { %4219 = vpow2.f32 %v3847_v39  ;;  %v768_v17 = vpop.f32.mrb[3].mxu0  ;;  %v780_v56 = vadd.f32 %v4027_v34, %v678_v37  ;;  %v809_v37 = vld [vmem:[#allocation4 + $0x28] sm:$0xff] }
  0xe4   :  { %4221 = vpow2.f32 %v3846_v32  ;;  %v677_v44 = vld [vmem:[#allocation4 + $0x10] sm:$0xff] }
  0xe5   :  { %v779_v51 = vadd.f32 %v768_v17, %v677_v44 }
  0xe7   :  { %v3848_v25 = vmul.f32 -1.442695, %v779_v51 }
  0xe9   :  { %4223 = vpow2.f32 %v3848_v25 }
  0xea   :  { %4225 = vtanh.f32 %v780_v56 }
  0xed   :  { %v4220_v3 = vpop.eup %4219 }
  0xee   :  { %v4222_v6 = vpop.eup %4221  ;;  %v791_v7 = vadd.f32 1.0, %v4220_v3  ;;  %v808_v3 = vld [vmem:[#allocation4 + $0x20] sm:$0xff] }
  0xef   :  { %v790_v8 = vadd.f32 1.0, %v4222_v6 }
  0xf0   :  { %4227 = vrcp.f32 %v791_v7 }
  0xf1   :  { %4229 = vrcp.f32 %v790_v8 }
  0xf3   :  { %v4224_v26 = vpop.eup %4223 }
  0xf4   :  { %v4226_v40 = vpop.eup %4225  ;;  %v792_v4 = vadd.f32 1.0, %v4224_v26 }
  0xf6   :  { %4231 = vrcp.f32 %v792_v4 }
  0xfa   :  { %v4228_v41 = vpop.eup %4227 }
  0xfb   :  { %v4230_v43 = vpop.eup %4229  ;;  %v800_v21 = vmul.f32 %v4228_v41, %v674_v59  ;;  %v810_v41 = vld [vmem:[#allocation4 + $0x30] sm:$0xff] }
  0xfc   :  { %v801_v19 = vmul.f32 %v4230_v43, %v4226_v40 }
  0xfe   :  { %v4979_v9 = vadd.f32 %v801_v19, %v800_v21  ;;  %v811_v21 = vld [vmem:[#allocation4 + $0x38] sm:$0xff] }
 0x100   :  { %4233 = vtanh.f32 %v4979_v9  ;;  %v4232_v11 = vpop.eup %4231 }
 0x10a   :  { %v4234_v12 = vpop.eup %4233 }
 0x10b   :  { %v804_v13 = vmul.f32 %v4234_v12, %v4232_v11 }
 0x10d   :  { %v805_v30 = vmax.f32 %v804_v13, 0.0  ;;  %4028 = vmatprep.subr.mxu1 %v804_v13 }
 0x10e   :  { %4029 = vmatpush3.msra.mxu1 %v804_v13 }
 0x10f   :  { %806 = vst.msk [vmem:[#allocation5] sm:$0xff] %vm33_vm0, %v805_v30  ;;  %4031 = vmatmul.mubr.msk.f32.vlgmr.msra.gmra.mrb[0].mxu1 %vm679_vm1, %v4986_v14 }
 0x110   :  { %4033 = vmatprep.mubr.msk.f32.mxu1 %vm679_vm1, %v4993_v57 }
 0x113   :  { %4034 = vmatmul.mubr.msk.f32.gmra.mrb[2].mxu1 %vm679_vm1, %v5000_v36 }
 0x114   :  { %4046 = vmatprep.mubr.msk.f32.mxu1 %vm679_vm1, %v5007_v45 }
 0x116   :  { %v1656_v27 = vld [vmem:[#allocation5] sm:$0xff] }
 0x117   :  { %1664 = vxpose.xlu1.b32.start.end [1/1] (short) (narrow) %v1656_v27, 40 }
 0x197   :  { %v5011_v42 = vpop.trf.xlu1 }
 0x198   :  { %v1961_v46 = vrot.slane %v5011_v42, 1  ;;  %v2130_v55 = vrot.slane %v5011_v42, 2  ;;  %v2299_v47 = vrot.slane %v5011_v42, 3  ;;  %v2468_v61 = vrot.slane %v5011_v42, 4 }
 0x19b   :  { %v5014_v29 = vpop.trf.xlu1 }
 0x19c   :  { %v1962_v48 = vrot.slane %v5014_v29, 1  ;;  %v2131_v50 = vrot.slane %v5014_v29, 2  ;;  %v2300_v16 = vrot.slane %v5014_v29, 3  ;;  %v2469_v63 = vrot.slane %v5014_v29, 4 }
 0x19e   :  { %v1963_v24 = vsel %vm1960_vm2, %v1961_v46, %v1962_v48  ;;  %v2132_v54 = vsel %vm2129_vm3, %v2130_v55, %v2131_v50  ;;  %v2301_v60 = vsel %vm2298_vm4, %v2299_v47, %v2300_v16  ;;  %v2470_v38 = vsel %vm2467_vm5, %v2468_v61, %v2469_v63 }
 0x19f   :  { %2033 = vrot.lane.b32.xlu0 %v1963_v24, %s4369_s28  ;;  %v5024_v52 = vpop.trf.xlu1  ;;  %2202 = vrot.lane.b32.xlu1 %v2132_v54, %s4370_s1 }
 0x1a0   :  { %v2133_v18 = vrot.slane %v5024_v52, 2  ;;  %v2302_v62 = vrot.slane %v5024_v52, 3  ;;  %v1964_v10 = vrot.slane %v5024_v52, 1  ;;  %v2471_v5 = vrot.slane %v5024_v52, 4 }
 0x1a2   :  { %v2134_v58 = vsel %vm2129_vm3, %v2131_v50, %v2133_v18  ;;  %v2303_v22 = vsel %vm2298_vm4, %v2300_v16, %v2302_v62  ;;  %v1965_v33 = vsel %vm1960_vm2, %v1962_v48, %v1964_v10  ;;  %v2472_v28 = vsel %vm2467_vm5, %v2469_v63, %v2471_v5 }
 0x1a3   :  { %2204 = vrot.lane.b32.xlu0 %v2134_v58, %s4370_s1  ;;  %v5034_v20 = vpop.trf.xlu1  ;;  %2371 = vrot.lane.b32.xlu1 %v2301_v60, %s4371_s29 }
 0x1a4   :  { %v1966_v0 = vrot.slane %v5034_v20, 1  ;;  %v2135_v49 = vrot.slane %v5034_v20, 2  ;;  %v2304_v35 = vrot.slane %v5034_v20, 3  ;;  %v2473_v44 = vrot.slane %v5034_v20, 4 }
 0x1a6   :  { %v1967_v1 = vsel %vm1960_vm2, %v1964_v10, %v1966_v0  ;;  %v2136_v32 = vsel %vm2129_vm3, %v2133_v18, %v2135_v49  ;;  %v2305_v17 = vsel %vm2298_vm4, %v2302_v62, %v2304_v35  ;;  %v2474_v51 = vsel %vm2467_vm5, %v2471_v5, %v2473_v44 }
 0x1a7   :  { %2373 = vrot.lane.b32.xlu0 %v2303_v22, %s4371_s29  ;;  %v5042_v23 = vpop.trf.xlu1  ;;  %2540 = vrot.lane.b32.xlu1 %v2470_v38, %s4372_s3 }
 0x1a8   :  { %v1968_v31 = vrot.slane %v5042_v23, 1  ;;  %v2137_v2 = vrot.slane %v5042_v23, 2  ;;  %v2306_v39 = vrot.slane %v5042_v23, 3  ;;  %v2475_v60 = vrot.slane %v5042_v23, 4 }
 0x1aa   :  { %v1969_v15 = vsel %vm1960_vm2, %v1966_v0, %v1968_v31  ;;  %v2138_v53 = vsel %vm2129_vm3, %v2135_v49, %v2137_v2  ;;  %v2307_v34 = vsel %vm2298_vm4, %v2304_v35, %v2306_v39  ;;  %v2476_v63 = vsel %vm2467_vm5, %v2473_v44, %v2475_v60 }
 0x1ab   :  { %2037 = vrot.lane.b32.xlu0 %v1967_v1, %s4369_s28  ;;  %2035 = vrot.lane.b32.xlu1 %v1965_v33, %s4369_s28 }
 0x1af   :  { %2039 = vrot.lane.b32.xlu0 %v1969_v15, %s4369_s28  ;;  %2542 = vrot.lane.b32.xlu1 %v2472_v28, %s4372_s3 }
 0x1b3   :  { %2208 = vrot.lane.b32.xlu0 %v2138_v53, %s4370_s1  ;;  %2206 = vrot.lane.b32.xlu1 %v2136_v32, %s4370_s1 }
 0x1b7   :  { %2377 = vrot.lane.b32.xlu0 %v2307_v34, %s4371_s29  ;;  %2375 = vrot.lane.b32.xlu1 %v2305_v17, %s4371_s29 }
 0x1bb   :  { %2544 = vrot.lane.b32.xlu1 %v2474_v51, %s4372_s3 }
 0x1bf   :  { %2546 = vrot.lane.b32.xlu1 %v2476_v63, %s4372_s3 }
 0x1e2   :  { %v4032_v25 = vpop.f32.mrb[0].mxu1 }
 0x1e3   :  { %v898_v56 = vadd.f32 %v4032_v25, %v809_v37  ;;  %v878_v6 = vpop.f32.mrb[1].mxu1 }
 0x1e4   :  { %v897_v7 = vadd.f32 %v878_v6, %v808_v3 }
 0x1e5   :  { %v3854_v8 = vmul.f32 -1.442695, %v898_v56 }
 0x1e6   :  { %v3853_v26 = vmul.f32 -1.442695, %v897_v7  ;;  %v4035_v59 = vpop.f32.mrb[2].mxu1 }
 0x1e7   :  { %4235 = vpow2.f32 %v3854_v8  ;;  %v888_v40 = vpop.f32.mrb[3].mxu1  ;;  %v900_v19 = vadd.f32 %v4035_v59, %v811_v21 }
 0x1e8   :  { %4237 = vpow2.f32 %v3853_v26  ;;  %v899_v43 = vadd.f32 %v888_v40, %v810_v41 }
 0x1ea   :  { %v3855_v4 = vmul.f32 -1.442695, %v899_v43 }
 0x1ec   :  { %4239 = vpow2.f32 %v3855_v4 }
 0x1ed   :  { %4241 = vtanh.f32 %v900_v19 }
 0x1f1   :  { %v4236_v11 = vpop.eup %4235 }
 0x1f2   :  { %v4238_v12 = vpop.eup %4237  ;;  %v911_v13 = vadd.f32 1.0, %v4236_v11 }
 0x1f3   :  { %v910_v30 = vadd.f32 1.0, %v4238_v12 }
 0x1f4   :  { %4243 = vrcp.f32 %v911_v13 }
 0x1f5   :  { %4245 = vrcp.f32 %v910_v30 }
 0x1f6   :  { %v4240_v27 = vpop.eup %4239 }
 0x1f7   :  { %v4242_v46 = vpop.eup %4241  ;;  %v912_v47 = vadd.f32 1.0, %v4240_v27 }
 0x1f9   :  { %4247 = vrcp.f32 %v912_v47 }
 0x1fe   :  { %v4244_v55 = vpop.eup %4243 }
 0x1ff   :  { %v4246_v48 = vpop.eup %4245  ;;  %v920_v50 = vmul.f32 %v4244_v55, %v4979_v9 }
 0x200   :  { %v921_v24 = vmul.f32 %v4246_v48, %v4242_v46 }
 0x202   :  { %v5071_v16 = vadd.f32 %v921_v24, %v920_v50 }
 0x203   :  { %v4248_v54 = vpop.eup %4247 }
 0x204   :  { %4249 = vtanh.f32 %v5071_v16 }
 0x20e   :  { %v4250_v61 = vpop.eup %4249 }
 0x20f   :  { %v924_v18 = vmul.f32 %v4250_v61, %v4248_v54  ;;  %v930_v54 = vld [vmem:[#allocation4 + $0x48] sm:$0xff] }
 0x211   :  { %v925_v62 = vmax.f32 %v924_v18, 0.0  ;;  %4036 = vmatprep.subr.mxu0 %v924_v18  ;;  %v5086_v58 = vpop.permute.xlu0 %2033 }
 0x212   :  { %4037 = vmatpush3.msra.mxu0 %v924_v18 }
 0x213   :  { %927 = vst.msk [vmem:[#allocation5 + $0x8] sm:$0xff] %vm33_vm0, %v925_v62  ;;  %4039 = vmatmul.mubr.msk.f32.vlgmr.msra.gmra.mrb[4].mxu0 %vm679_vm1, %v4986_v14  ;;  %v929_v62 = vld [vmem:[#allocation4 + $0x40] sm:$0xff] }
 0x214   :  { %4041 = vmatprep.mubr.msk.f32.mxu0 %vm679_vm1, %v4993_v57 }
 0x215   :  { %v5088_v22 = vpop.permute.xlu0 %2204 }
 0x217   :  { %4042 = vmatmul.mubr.msk.f32.gmra.mrb[6].mxu0 %vm679_vm1, %v5000_v36 }
 0x218   :  { %4054 = vmatprep.mubr.msk.f32.mxu0 %vm679_vm1, %v5007_v45 }
 0x219   :  { %v5090_v10 = vpop.permute.xlu0 %2373 }
 0x21a   :  { %v1657_v9 = vld [vmem:[#allocation5 + $0x8] sm:$0xff] }
 0x21b   :  { %1696 = vxpose.xlu0.b32.start.end [1/1] (short) (narrow) %v1657_v9, 40 }
 0x21d   :  { %v5092_v0 = vpop.permute.xlu0 %2037 }
 0x221   :  { %v5094_v38 = vpop.permute.xlu0 %2039 }
 0x225   :  { %v5096_v1 = vpop.permute.xlu0 %2208 }
 0x229   :  { %v5098_v31 = vpop.permute.xlu0 %2377 }
 0x29b   :  { %v5100_v33 = vpop.trf.xlu0 }
 0x29c   :  { %v2139_v23 = vrot.slane %v5100_v33, 2  ;;  %v1970_v15 = vrot.slane %v5100_v33, 1  ;;  %v2308_v2 = vrot.slane %v5100_v33, 3  ;;  %v2477_v17 = vrot.slane %v5100_v33, 4 }
 0x29f   :  { %v5103_v5 = vpop.trf.xlu0 }
 0x2a0   :  { %v2140_v49 = vrot.slane %v5103_v5, 2  ;;  %v2309_v28 = vrot.slane %v5103_v5, 3  ;;  %v1971_v53 = vrot.slane %v5103_v5, 1  ;;  %v2478_v44 = vrot.slane %v5103_v5, 4 }
 0x2a2   :  { %v2141_v35 = vsel %vm2129_vm3, %v2139_v23, %v2140_v49  ;;  %v1972_v32 = vsel %vm1960_vm2, %v1970_v15, %v1971_v53  ;;  %v2310_v34 = vsel %vm2298_vm4, %v2308_v2, %v2309_v28  ;;  %v2479_v3 = vsel %vm2467_vm5, %v2477_v17, %v2478_v44  ;;  %v931_v2 = vld [vmem:[#allocation4 + $0x50] sm:$0xff] }
 0x2a3   :  { %2210 = vrot.lane.b32.xlu1 %v2141_v35, %s4370_s1  ;;  %v5112_v39 = vpop.trf.xlu0  ;;  %2041 = vrot.lane.b32.xlu0 %v1972_v32, %s4369_s28 }
 0x2a4   :  { %v1973_v51 = vrot.slane %v5112_v39, 1  ;;  %v2142_v56 = vrot.slane %v5112_v39, 2  ;;  %v2480_v6 = vrot.slane %v5112_v39, 4  ;;  %v2311_v8 = vrot.slane %v5112_v39, 3 }
 0x2a6   :  { %v1974_v37 = vsel %vm1960_vm2, %v1971_v53, %v1973_v51  ;;  %v2143_v7 = vsel %vm2129_vm3, %v2140_v49, %v2142_v56  ;;  %v2481_v26 = vsel %vm2467_vm5, %v2478_v44, %v2480_v6  ;;  %v2312_v41 = vsel %vm2298_vm4, %v2309_v28, %v2311_v8  ;;  %v932_v53 = vld [vmem:[#allocation4 + $0x58] sm:$0xff] }
 0x2a7   :  { %2379 = vrot.lane.b32.xlu1 %v2310_v34, %s4371_s29  ;;  %v5122_v25 = vpop.trf.xlu0  ;;  %2043 = vrot.lane.b32.xlu0 %v1974_v37, %s4369_s28 }
 0x2a8   :  { %v2144_v59 = vrot.slane %v5122_v25, 2  ;;  %v1975_v43 = vrot.slane %v5122_v25, 1  ;;  %v2313_v11 = vrot.slane %v5122_v25, 3  ;;  %v2482_v27 = vrot.slane %v5122_v25, 4 }
 0x2aa   :  { %v2145_v21 = vsel %vm2129_vm3, %v2142_v56, %v2144_v59  ;;  %v1976_v19 = vsel %vm1960_vm2, %v1973_v51, %v1975_v43  ;;  %v2314_v30 = vsel %vm2298_vm4, %v2311_v8, %v2313_v11  ;;  %v2483_v55 = vsel %vm2467_vm5, %v2480_v6, %v2482_v27 }
 0x2ab   :  { %2548 = vrot.lane.b32.xlu1 %v2479_v3, %s4372_s3  ;;  %2212 = vrot.lane.b32.xlu0 %v2143_v7, %s4370_s1  ;;  %v1716_v40 = vpop.trf.xlu0 }
 0x2ac   :  { %v2146_v4 = vrot.slane %v1716_v40, 2  ;;  %v2315_v13 = vrot.slane %v1716_v40, 3  ;;  %v1977_v48 = vrot.slane %v1716_v40, 1  ;;  %v2484_v47 = vrot.slane %v1716_v40, 4 }
 0x2ae   :  { %v2147_v12 = vsel %vm2129_vm3, %v2144_v59, %v2146_v4  ;;  %v2316_v46 = vsel %vm2298_vm4, %v2313_v11, %v2315_v13  ;;  %v1978_v50 = vsel %vm1960_vm2, %v1975_v43, %v1977_v48  ;;  %v2485_v24 = vsel %vm2467_vm5, %v2482_v27, %v2484_v47  ;;  %v5169_v4 = vpop.permute.xlu1 %2202 }
 0x2af   :  { %2550 = vrot.lane.b32.xlu1 %v2481_v26, %s4372_s3  ;;  %2381 = vrot.lane.b32.xlu0 %v2312_v41, %s4371_s29 }
 0x2b3   :  { %2214 = vrot.lane.b32.xlu1 %v2145_v21, %s4370_s1  ;;  %2045 = vrot.lane.b32.xlu0 %v1976_v19, %s4369_s28  ;;  %v5171_v19 = vpop.permute.xlu1 %2371 }
 0x2b7   :  { %2216 = vrot.lane.b32.xlu1 %v2147_v12, %s4370_s1  ;;  %2383 = vrot.lane.b32.xlu0 %v2314_v30, %s4371_s29  ;;  %v5173_v11 = vpop.permute.xlu1 %2540 }
 0x2bb   :  { %2385 = vrot.lane.b32.xlu1 %v2316_v46, %s4371_s29  ;;  %2552 = vrot.lane.b32.xlu0 %v2483_v55, %s4372_s3  ;;  %v5175_v12 = vpop.permute.xlu1 %2035 }
 0x2bf   :  { %2047 = vrot.lane.b32.xlu0 %v1978_v50, %s4369_s28  ;;  %v5177_v13 = vpop.permute.xlu1 %2542 }
 0x2c3   :  { %2554 = vrot.lane.b32.xlu0 %v2485_v24, %s4372_s3  ;;  %v5179_v30 = vpop.permute.xlu1 %2206 }
 0x2c7   :  { %v5181_v27 = vpop.permute.xlu1 %2375 }
 0x2cb   :  { %v5183_v46 = vpop.permute.xlu1 %2544 }
 0x2cf   :  { %v5185_v55 = vpop.permute.xlu1 %2546 }
 0x2e6   :  { %v4040_v61 = vpop.f32.mrb[4].mxu0 }
 0x2e7   :  { %v1019_v18 = vadd.f32 %v4040_v61, %v930_v54  ;;  %v999_v9 = vpop.f32.mrb[5].mxu0 }
 0x2e8   :  { %v1018_v60 = vadd.f32 %v999_v9, %v929_v62 }
 0x2e9   :  { %v3861_v63 = vmul.f32 -1.442695, %v1019_v18 }
 0x2ea   :  { %v3860_v23 = vmul.f32 -1.442695, %v1018_v60  ;;  %v4043_v15 = vpop.f32.mrb[6].mxu0 }
 0x2eb   :  { %4251 = vpow2.f32 %v3861_v63  ;;  %v1009_v49 = vpop.f32.mrb[7].mxu0  ;;  %v1021_v32 = vadd.f32 %v4043_v15, %v932_v53 }
 0x2ec   :  { %4253 = vpow2.f32 %v3860_v23  ;;  %v1020_v28 = vadd.f32 %v1009_v49, %v931_v2 }
 0x2ee   :  { %v3862_v35 = vmul.f32 -1.442695, %v1020_v28 }
 0x2f0   :  { %4255 = vpow2.f32 %v3862_v35 }
 0x2f1   :  { %4257 = vtanh.f32 %v1021_v32 }
 0x2f5   :  { %v4252_v34 = vpop.eup %4251 }
 0x2f6   :  { %v4254_v17 = vpop.eup %4253  ;;  %v1032_v44 = vadd.f32 1.0, %v4252_v34 }
 0x2f7   :  { %v1031_v51 = vadd.f32 1.0, %v4254_v17 }
 0x2f8   :  { %4259 = vrcp.f32 %v1032_v44 }
 0x2f9   :  { %4261 = vrcp.f32 %v1031_v51 }
 0x2fa   :  { %v4256_v37 = vpop.eup %4255 }
 0x2fb   :  { %v4258_v56 = vpop.eup %4257  ;;  %v1033_v8 = vadd.f32 1.0, %v4256_v37 }
 0x2fd   :  { %4263 = vrcp.f32 %v1033_v8 }
 0x302   :  { %v4260_v3 = vpop.eup %4259 }
 0x303   :  { %v4262_v6 = vpop.eup %4261  ;;  %v1041_v7 = vmul.f32 %v4260_v3, %v5071_v16 }
 0x304   :  { %v1042_v26 = vmul.f32 %v4262_v6, %v4258_v56 }
 0x306   :  { %v5157_v59 = vadd.f32 %v1042_v26, %v1041_v7 }
 0x307   :  { %v4264_v40 = vpop.eup %4263 }
 0x308   :  { %4265 = vtanh.f32 %v5157_v59 }
 0x312   :  { %v4266_v41 = vpop.eup %4265 }
 0x313   :  { %v1045_v43 = vmul.f32 %v4266_v41, %v4264_v40 }
 0x315   :  { %v1046_v21 = vmax.f32 %v1045_v43, 0.0  ;;  %4044 = vmatprep.subr.mxu1 %v1045_v43  ;;  %v5187_v48 = vpop.permute.xlu1 %2210  ;;  %v5195_v54 = vpop.permute.xlu0 %2041 }
 0x316   :  { %4045 = vmatpush3.msra.mxu1 %v1045_v43 }
 0x317   :  { %1048 = vst.msk [vmem:[#allocation5 + $0x10] sm:$0xff] %vm33_vm0, %v1046_v21  ;;  %4047 = vmatmul.mubr.msk.f32.vlgmr.msra.gmra.mrb[4].mxu1 %vm679_vm1, %v4986_v14 }
 0x318   :  { %4049 = vmatprep.mubr.msk.f32.mxu1 %vm679_vm1, %v4993_v57 }
 0x319   :  { %v5189_v50 = vpop.permute.xlu1 %2379  ;;  %v2044_v18 = vpop.permute.xlu0 %2043 }
 0x31a   :  { %v2641_v62 = vsel %vm679_vm1, %v5103_v5, %v2044_v18 }
 0x31b   :  { %4050 = vmatmul.mubr.msk.f32.gmra.mrb[6].mxu1 %vm679_vm1, %v5000_v36 }
 0x31c   :  { %4062 = vmatprep.mubr.msk.f32.mxu1 %vm679_vm1, %v5007_v45 }
 0x31d   :  { %v5191_v47 = vpop.permute.xlu1 %2548  ;;  %v2213_v9 = vpop.permute.xlu0 %2212 }
 0x31e   :  { %v1658_v16 = vld [vmem:[#allocation5 + $0x10] sm:$0xff]  ;;  %v2674_v63 = vsel %vm2668_vm6, %v2641_v62, %v2213_v9 }
 0x31f   :  { %1728 = vxpose.xlu1.b32.start.end [1/1] (short) (narrow) %v1658_v16, 40 }
 0x321   :  { %v5193_v24 = vpop.permute.xlu1 %2550  ;;  %v2382_v23 = vpop.permute.xlu0 %2381 }
 0x322   :  { %v5203_v15 = vsel %vm2701_vm7, %v2674_v63, %v2382_v23 }
 0x325   :  { %v2215_v61 = vpop.permute.xlu1 %2214  ;;  %v2046_v2 = vpop.permute.xlu0 %2045 }
 0x326   :  { %v2642_v28 = vsel %vm679_vm1, %v5112_v39, %v2046_v2 }
 0x327   :  { %v2675_v53 = vsel %vm2668_vm6, %v2642_v28, %v2215_v61 }
 0x329   :  { %v5199_v60 = vpop.permute.xlu1 %2216  ;;  %v2384_v5 = vpop.permute.xlu0 %2383 }
 0x32a   :  { %v5213_v32 = vsel %vm2701_vm7, %v2675_v53, %v2384_v5 }
 0x32d   :  { %v5205_v49 = vpop.permute.xlu1 %2385 }
 0x39f   :  { %v5210_v35 = vpop.trf.xlu1 }
 0x3a0   :  { %v1979_v34 = vrot.slane %v5210_v35, 1  ;;  %v2317_v44 = vrot.slane %v5210_v35, 3  ;;  %v2148_v51 = vrot.slane %v5210_v35, 2  ;;  %v2486_v37 = vrot.slane %v5210_v35, 4 }
 0x3a3   :  { %v5216_v17 = vpop.trf.xlu1 }
 0x3a4   :  { %v1980_v39 = vrot.slane %v5216_v17, 1  ;;  %v2318_v56 = vrot.slane %v5216_v17, 3  ;;  %v2149_v3 = vrot.slane %v5216_v17, 2  ;;  %v2487_v6 = vrot.slane %v5216_v17, 4 }
 0x3a6   :  { %v1981_v7 = vsel %vm1960_vm2, %v1979_v34, %v1980_v39  ;;  %v2150_v8 = vsel %vm2129_vm3, %v2148_v51, %v2149_v3  ;;  %v2319_v40 = vsel %vm2298_vm4, %v2317_v44, %v2318_v56  ;;  %v2488_v43 = vsel %vm2467_vm5, %v2486_v37, %v2487_v6 }
 0x3a7   :  { %2049 = vrot.lane.b32.xlu1 %v1981_v7, %s4369_s28  ;;  %v5228_v26 = vpop.trf.xlu1  ;;  %2218 = vrot.lane.b32.xlu0 %v2150_v8, %s4370_s1 }
 0x3a8   :  { %v1982_v41 = vrot.slane %v5228_v26, 1  ;;  %v2151_v21 = vrot.slane %v5228_v26, 2  ;;  %v2320_v61 = vrot.slane %v5228_v26, 3  ;;  %v2489_v62 = vrot.slane %v5228_v26, 4 }
 0x3aa   :  { %v1983_v16 = vsel %vm1960_vm2, %v1980_v39, %v1982_v41  ;;  %v2152_v18 = vsel %vm2129_vm3, %v2149_v3, %v2151_v21  ;;  %v2321_v63 = vsel %vm2298_vm4, %v2318_v56, %v2320_v61  ;;  %v2490_v2 = vsel %vm2467_vm5, %v2487_v6, %v2489_v62 }
 0x3ab   :  { %2387 = vrot.lane.b32.xlu1 %v2319_v40, %s4371_s29  ;;  %2556 = vrot.lane.b32.xlu0 %v2488_v43, %s4372_s3  ;;  %v5241_v9 = vpop.trf.xlu1 }
 0x3ac   :  { %v1984_v23 = vrot.slane %v5241_v9, 1  ;;  %v2153_v28 = vrot.slane %v5241_v9, 2  ;;  %v2322_v5 = vrot.slane %v5241_v9, 3  ;;  %v2491_v44 = vrot.slane %v5241_v9, 4 }
 0x3ae   :  { %v1985_v53 = vsel %vm1960_vm2, %v1982_v41, %v1984_v23  ;;  %v2154_v34 = vsel %vm2129_vm3, %v2151_v21, %v2153_v28  ;;  %v2323_v37 = vsel %vm2298_vm4, %v2320_v61, %v2322_v5  ;;  %v2492_v3 = vsel %vm2467_vm5, %v2489_v62, %v2491_v44  ;;  %v1051_v21 = vld [vmem:[#allocation4 + $0x68] sm:$0xff] }
 0x3af   :  { %2051 = vrot.lane.b32.xlu1 %v1983_v16, %s4369_s28  ;;  %2220 = vrot.lane.b32.xlu0 %v2152_v18, %s4370_s1  ;;  %v1748_v51 = vpop.trf.xlu1  ;;  %v1050_v18 = vld [vmem:[#allocation4 + $0x60] sm:$0xff] }
 0x3b0   :  { %v1986_v39 = vrot.slane %v1748_v51, 1  ;;  %v2155_v56 = vrot.slane %v1748_v51, 2  ;;  %v2324_v6 = vrot.slane %v1748_v51, 3  ;;  %v2493_v7 = vrot.slane %v1748_v51, 4  ;;  %v1053_v51 = vld [vmem:[#allocation4 + $0x78] sm:$0xff] }
 0x3b2   :  { %v1987_v8 = vsel %vm1960_vm2, %v1984_v23, %v1986_v39  ;;  %v2156_v40 = vsel %vm2129_vm3, %v2153_v28, %v2155_v56  ;;  %v2325_v41 = vsel %vm2298_vm4, %v2322_v5, %v2324_v6  ;;  %v2494_v43 = vsel %vm2467_vm5, %v2491_v44, %v2493_v7 }
 0x3b3   :  { %2389 = vrot.lane.b32.xlu1 %v2321_v63, %s4371_s29  ;;  %2558 = vrot.lane.b32.xlu0 %v2490_v2, %s4372_s3 }
 0x3b7   :  { %2053 = vrot.lane.b32.xlu1 %v1985_v53, %s4369_s28  ;;  %2222 = vrot.lane.b32.xlu0 %v2154_v34, %s4370_s1  ;;  %v1052_v34 = vld [vmem:[#allocation4 + $0x70] sm:$0xff] }
 0x3bb   :  { %2391 = vrot.lane.b32.xlu1 %v2323_v37, %s4371_s29  ;;  %2560 = vrot.lane.b32.xlu0 %v2492_v3, %s4372_s3 }
 0x3bf   :  { %2055 = vrot.lane.b32.xlu1 %v1987_v8, %s4369_s28  ;;  %2224 = vrot.lane.b32.xlu0 %v2156_v40, %s4370_s1 }
 0x3c3   :  { %2393 = vrot.lane.b32.xlu1 %v2325_v41, %s4371_s29  ;;  %2562 = vrot.lane.b32.xlu0 %v2494_v43, %s4372_s3 }
 0x3ea   :  { %v4048_v16 = vpop.f32.mrb[4].mxu1 }
 0x3eb   :  { %v1140_v61 = vadd.f32 %v4048_v16, %v1051_v21  ;;  %v1120_v62 = vpop.f32.mrb[5].mxu1 }
 0x3ec   :  { %v1139_v63 = vadd.f32 %v1120_v62, %v1050_v18 }
 0x3ed   :  { %v3868_v23 = vmul.f32 -1.442695, %v1140_v61 }
 0x3ee   :  { %v3867_v2 = vmul.f32 -1.442695, %v1139_v63  ;;  %v4051_v28 = vpop.f32.mrb[6].mxu1 }
 0x3ef   :  { %4267 = vpow2.f32 %v3868_v23  ;;  %v1130_v53 = vpop.f32.mrb[7].mxu1  ;;  %v1142_v37 = vadd.f32 %v4051_v28, %v1053_v51 }
 0x3f0   :  { %4269 = vpow2.f32 %v3867_v2  ;;  %v1141_v5 = vadd.f32 %v1130_v53, %v1052_v34 }
 0x3f2   :  { %v3869_v44 = vmul.f32 -1.442695, %v1141_v5 }
 0x3f4   :  { %4271 = vpow2.f32 %v3869_v44 }
 0x3f5   :  { %4273 = vtanh.f32 %v1142_v37 }
 0x3f9   :  { %v4268_v39 = vpop.eup %4267 }
 0x3fa   :  { %v4270_v56 = vpop.eup %4269  ;;  %v1153_v3 = vadd.f32 1.0, %v4268_v39 }
 0x3fb   :  { %v1152_v6 = vadd.f32 1.0, %v4270_v56 }
 0x3fc   :  { %4275 = vrcp.f32 %v1153_v3 }
 0x3fd   :  { %4277 = vrcp.f32 %v1152_v6 }
 0x3fe   :  { %v4272_v7 = vpop.eup %4271 }
 0x3ff   :  { %v4274_v8 = vpop.eup %4273  ;;  %v1154_v21 = vadd.f32 1.0, %v4272_v7 }
 0x401   :  { %4279 = vrcp.f32 %v1154_v21 }
 0x406   :  { %v4276_v40 = vpop.eup %4275 }
 0x407   :  { %v4278_v41 = vpop.eup %4277  ;;  %v1162_v43 = vmul.f32 %v4276_v40, %v5157_v59 }
 0x408   :  { %v1163_v16 = vmul.f32 %v4278_v41, %v4274_v8 }
 0x40a   :  { %v5270_v61 = vadd.f32 %v1163_v16, %v1162_v43 }
 0x40b   :  { %v4280_v18 = vpop.eup %4279 }
 0x40c   :  { %4281 = vtanh.f32 %v5270_v61 }
 0x416   :  { %v4282_v62 = vpop.eup %4281 }
 0x417   :  { %v1166_v63 = vmul.f32 %v4282_v62, %v4280_v18 }
 0x419   :  { %v1167_v23 = vmax.f32 %v1166_v63, 0.0  ;;  %4052 = vmatprep.subr.mxu0 %v1166_v63  ;;  %v5282_v2 = vpop.permute.xlu1 %2049 }
 0x41a   :  { %4053 = vmatpush3.msra.mxu0 %v1166_v63 }
 0x41b   :  { %1169 = vst.msk [vmem:[#allocation5 + $0x18] sm:$0xff] %vm33_vm0, %v1167_v23  ;;  %4055 = vmatmul.mubr.msk.f32.vlgmr.msra.gmra.mrb[8].mxu0 %vm679_vm1, %v4986_v14 }
 0x41c   :  { %4057 = vmatprep.mubr.msk.f32.mxu0 %vm679_vm1, %v4993_v57 }
 0x41d   :  { %v5284_v28 = vpop.permute.xlu1 %2387 }
 0x41f   :  { %4058 = vmatmul.mubr.msk.f32.gmra.mrb[10].mxu0 %vm679_vm1, %v5000_v36 }
 0x420   :  { %4070 = vmatprep.mubr.msk.f32.mxu0 %vm679_vm1, %v5007_v45 }
 0x421   :  { %v5286_v53 = vpop.permute.xlu1 %2051 }
 0x422   :  { %v1659_v59 = vld [vmem:[#allocation5 + $0x18] sm:$0xff] }
 0x423   :  { %1760 = vxpose.xlu1.b32.start.end [1/1] (short) (narrow) %v1659_v59, 40 }
 0x425   :  { %v5288_v34 = vpop.permute.xlu1 %2389 }
 0x426   :  { %6609 = vst [vmem:[#allocation46_spill] sm:$0xff] %v5288_v34 }
 0x429   :  { %v5290_v5 = vpop.permute.xlu1 %2053 }
 0x42d   :  { %v5292_v51 = vpop.permute.xlu1 %2391 }
 0x42e   :  { %6610 = vst [vmem:[#allocation47_spill] sm:$0xff] %v5292_v51 }
 0x431   :  { %v5294_v44 = vpop.permute.xlu1 %2055 }
 0x435   :  { %v5296_v37 = vpop.permute.xlu1 %2393 }
 0x436   :  { %6611 = vst [vmem:[#allocation48_spill] sm:$0xff] %v5296_v37 }
 0x4a3   :  { %v5298_v39 = vpop.trf.xlu1 }
 0x4a4   :  { %6612 = vst [vmem:[#allocation49_spill] sm:$0xff] %v5298_v39  ;;  %v2157_v56 = vrot.slane %v5298_v39, 2  ;;  %v2495_v6 = vrot.slane %v5298_v39, 4  ;;  %v1988_v7 = vrot.slane %v5298_v39, 1  ;;  %v2326_v8 = vrot.slane %v5298_v39, 3 }
 0x4a7   :  { %v5301_v3 = vpop.trf.xlu1 }
 0x4a8   :  { %6613 = vst [vmem:[#allocation50_spill] sm:$0xff] %v5301_v3  ;;  %v2158_v40 = vrot.slane %v5301_v3, 2  ;;  %v2496_v41 = vrot.slane %v5301_v3, 4  ;;  %v1989_v43 = vrot.slane %v5301_v3, 1  ;;  %v2327_v21 = vrot.slane %v5301_v3, 3 }
 0x4aa   :  { %v2159_v16 = vsel %vm2129_vm3, %v2157_v56, %v2158_v40  ;;  %v1990_v18 = vsel %vm1960_vm2, %v1988_v7, %v1989_v43  ;;  %v2497_v63 = vsel %vm2467_vm5, %v2495_v6, %v2496_v41  ;;  %v2328_v59 = vsel %vm2298_vm4, %v2326_v8, %v2327_v21 }
 0x4ab   :  { %2226 = vrot.lane.b32.xlu0 %v2159_v16, %s4370_s1  ;;  %v5313_v62 = vpop.trf.xlu1  ;;  %2057 = vrot.lane.b32.xlu1 %v1990_v18, %s4369_s28 }
 0x4ac   :  { %6614 = vst [vmem:[#allocation35_spill] sm:$0xff] %v5313_v62  ;;  %v2160_v23 = vrot.slane %v5313_v62, 2  ;;  %v1991_v37 = vrot.slane %v5313_v62, 1  ;;  %v2498_v7 = vrot.slane %v5313_v62, 4  ;;  %v2329_v18 = vrot.slane %v5313_v62, 3 }
 0x4ae   :  { %v2161_v56 = vsel %vm2129_vm3, %v2158_v40, %v2160_v23  ;;  %v1992_v16 = vsel %vm1960_vm2, %v1989_v43, %v1991_v37  ;;  %v2499_v6 = vsel %vm2467_vm5, %v2496_v41, %v2498_v7 }
 0x4af   :  { %2564 = vrot.lane.b32.xlu0 %v2497_v63, %s4372_s3  ;;  %2395 = vrot.lane.b32.xlu1 %v2328_v59, %s4371_s29  ;;  %v5326_v3 = vpop.trf.xlu1  ;;  %v2330_v63 = vsel %vm2298_vm4, %v2327_v21, %v2329_v18 }
 0x4b0   :  { %6615 = vst [vmem:[#allocation36_spill] sm:$0xff] %v5326_v3  ;;  %v2162_v8 = vrot.slane %v5326_v3, 2  ;;  %v1993_v40 = vrot.slane %v5326_v3, 1  ;;  %v2500_v59 = vrot.slane %v5326_v3, 4 }
 0x4b2   :  { %v2163_v43 = vsel %vm2129_vm3, %v2160_v23, %v2162_v8  ;;  %v2501_v41 = vsel %vm2467_vm5, %v2498_v7, %v2500_v59 }
 0x4b3   :  { %2228 = vrot.lane.b32.xlu0 %v2161_v56, %s4370_s1  ;;  %2059 = vrot.lane.b32.xlu1 %v1992_v16, %s4369_s28  ;;  %v1994_v56 = vsel %vm1960_vm2, %v1991_v37, %v1993_v40  ;;  %v2331_v16 = vrot.slane %v5326_v3, 3  ;;  %v1780_v62 = vpop.trf.xlu1 }
 0x4b4   :  { %v2164_v21 = vrot.slane %v1780_v62, 2  ;;  %v1995_v51 = vrot.slane %v1780_v62, 1  ;;  %v2502_v37 = vrot.slane %v1780_v62, 4  ;;  %v2333_v3 = vrot.slane %v1780_v62, 3 }
 0x4b6   :  { %v2165_v23 = vsel %vm2129_vm3, %v2162_v8, %v2164_v21  ;;  %v2503_v7 = vsel %vm2467_vm5, %v2500_v59, %v2502_v37  ;;  %v1171_v8 = vld [vmem:[#allocation4 + $0x80] sm:$0xff]  ;;  %v1174_v37 = vld [vmem:[#allocation4 + $0x98] sm:$0xff] }
 0x4b7   :  { %2566 = vrot.lane.b32.xlu0 %v2499_v6, %s4372_s3  ;;  %2397 = vrot.lane.b32.xlu1 %v2330_v63, %s4371_s29  ;;  %v2332_v6 = vsel %vm2298_vm4, %v2329_v18, %v2331_v16  ;;  %v1996_v63 = vsel %vm1960_vm2, %v1993_v40, %v1995_v51  ;;  %v1172_v18 = vld [vmem:[#allocation4 + $0x88] sm:$0xff] }
 0x4bb   :  { %2230 = vrot.lane.b32.xlu0 %v2163_v43, %s4370_s1  ;;  %2061 = vrot.lane.b32.xlu1 %v1994_v56, %s4369_s28  ;;  %v2334_v43 = vsel %vm2298_vm4, %v2331_v16, %v2333_v3 }
 0x4bf   :  { %2568 = vrot.lane.b32.xlu0 %v2501_v41, %s4372_s3  ;;  %2399 = vrot.lane.b32.xlu1 %v2332_v6, %s4371_s29 }
 0x4c3   :  { %2232 = vrot.lane.b32.xlu0 %v2165_v23, %s4370_s1  ;;  %2063 = vrot.lane.b32.xlu1 %v1996_v63, %s4369_s28  ;;  %v1173_v63 = vld [vmem:[#allocation4 + $0x90] sm:$0xff] }
 0x4c7   :  { %2570 = vrot.lane.b32.xlu0 %v2503_v7, %s4372_s3  ;;  %2401 = vrot.lane.b32.xlu1 %v2334_v43, %s4371_s29 }
 0x4ee   :  { %v4056_v56 = vpop.f32.mrb[8].mxu0 }
 0x4ef   :  { %v1261_v41 = vadd.f32 %v4056_v56, %v1172_v18  ;;  %v1241_v21 = vpop.f32.mrb[9].mxu0 }
 0x4f0   :  { %v1260_v6 = vadd.f32 %v1241_v21, %v1171_v8 }
 0x4f1   :  { %v3875_v51 = vmul.f32 -1.442695, %v1261_v41 }
 0x4f2   :  { %v3874_v62 = vmul.f32 -1.442695, %v1260_v6  ;;  %v4059_v40 = vpop.f32.mrb[10].mxu0 }
 0x4f3   :  { %4283 = vpow2.f32 %v3875_v51  ;;  %v1251_v23 = vpop.f32.mrb[11].mxu0  ;;  %v1263_v16 = vadd.f32 %v4059_v40, %v1174_v37 }
 0x4f4   :  { %4285 = vpow2.f32 %v3874_v62  ;;  %v1262_v59 = vadd.f32 %v1251_v23, %v1173_v63 }
 0x4f6   :  { %v3876_v3 = vmul.f32 -1.442695, %v1262_v59 }
 0x4f8   :  { %4287 = vpow2.f32 %v3876_v3 }
 0x4f9   :  { %4289 = vtanh.f32 %v1263_v16 }
 0x4fd   :  { %v4284_v7 = vpop.eup %4283 }
 0x4fe   :  { %v4286_v34 = vpop.eup %4285  ;;  %v1274_v43 = vadd.f32 1.0, %v4284_v7 }
 0x4ff   :  { %v1273_v39 = vadd.f32 1.0, %v4286_v34 }
 0x500   :  { %4291 = vrcp.f32 %v1274_v43 }
 0x501   :  { %4293 = vrcp.f32 %v1273_v39  ;;  %v5367_v39 = vpop.permute.xlu0 %2552 }
 0x502   :  { %v4288_v18 = vpop.eup %4287 }
 0x503   :  { %v4290_v56 = vpop.eup %4289  ;;  %v1275_v6 = vadd.f32 1.0, %v4288_v18 }
 0x505   :  { %4295 = vrcp.f32 %v1275_v6  ;;  %v5369_v59 = vpop.permute.xlu0 %2047 }
 0x509   :  { %v5371_v37 = vpop.permute.xlu0 %2554 }
 0x50a   :  { %v4292_v41 = vpop.eup %4291  ;;  %6616 = vst [vmem:[#allocation37_spill] sm:$0xff] %v5371_v37 }
 0x50b   :  { %v4294_v8 = vpop.eup %4293  ;;  %v1283_v21 = vmul.f32 %v4292_v41, %v5270_v61 }
 0x50c   :  { %v1284_v51 = vmul.f32 %v4294_v8, %v4290_v56 }
 0x50d   :  { %v5373_v3 = vpop.permute.xlu0 %2218 }
 0x50e   :  { %v5355_v62 = vadd.f32 %v1284_v51, %v1283_v21 }
 0x50f   :  { %v4296_v40 = vpop.eup %4295 }
 0x510   :  { %4297 = vtanh.f32 %v5355_v62 }
 0x51a   :  { %v4298_v23 = vpop.eup %4297 }
 0x51b   :  { %v1287_v63 = vmul.f32 %v4298_v23, %v4296_v40 }
 0x51d   :  { %v1288_v34 = vmax.f32 %v1287_v63, 0.0  ;;  %4060 = vmatprep.subr.mxu1 %v1287_v63 }
 0x51e   :  { %4061 = vmatpush3.msra.mxu1 %v1287_v63 }
 0x51f   :  { %1290 = vst.msk [vmem:[#allocation5 + $0x20] sm:$0xff] %vm33_vm0, %v1288_v34  ;;  %4063 = vmatmul.mubr.msk.f32.vlgmr.msra.gmra.mrb[8].mxu1 %vm679_vm1, %v4986_v14  ;;  %v5375_v14 = vpop.permute.xlu0 %2556 }
 0x520   :  { %4065 = vmatprep.mubr.msk.f32.mxu1 %vm679_vm1, %v4993_v57  ;;  %6617 = vst [vmem:[#allocation38_spill] sm:$0xff] %v5375_v14 }
 0x523   :  { %4066 = vmatmul.mubr.msk.f32.gmra.mrb[10].mxu1 %vm679_vm1, %v5000_v36  ;;  %v5377_v16 = vpop.permute.xlu0 %2220 }
 0x524   :  { %4078 = vmatprep.mubr.msk.f32.mxu1 %vm679_vm1, %v5007_v45 }
 0x526   :  { %v1660_v61 = vld [vmem:[#allocation5 + $0x20] sm:$0xff] }
 0x527   :  { %1792 = vxpose.xlu0.b32.start.end [1/1] (short) (narrow) %v1660_v61, 40  ;;  %v5379_v57 = vpop.permute.xlu0 %2558 }
 0x528   :  { %6618 = vst [vmem:[#allocation39_spill] sm:$0xff] %v5379_v57 }
 0x52b   :  { %v5381_v36 = vpop.permute.xlu0 %2222 }
 0x52c   :  { %6619 = vst [vmem:[#allocation40_spill] sm:$0xff] %v5381_v36 }
 0x52f   :  { %v5383_v7 = vpop.permute.xlu0 %2560 }
 0x530   :  { %6620 = vst [vmem:[#allocation41_spill] sm:$0xff] %v5383_v7 }
 0x533   :  { %v5385_v45 = vpop.permute.xlu0 %2224 }
 0x534   :  { %6621 = vst [vmem:[#allocation42_spill] sm:$0xff] %v5385_v45 }
 0x537   :  { %v5387_v43 = vpop.permute.xlu0 %2562 }
 0x538   :  { %6622 = vst [vmem:[#allocation6_spill] sm:$0xff] %v5387_v43 }
 0x53b   :  { %v5389_v18 = vpop.permute.xlu0 %2226 }
 0x53c   :  { %6623 = vst [vmem:[#allocation7_spill] sm:$0xff] %v5389_v18 }
 0x53f   :  { %v5391_v56 = vpop.permute.xlu0 %2564 }
 0x540   :  { %6624 = vst [vmem:[#allocation8_spill] sm:$0xff] %v5391_v56 }
 0x543   :  { %v5393_v41 = vpop.permute.xlu0 %2228 }
 0x544   :  { %6625 = vst [vmem:[#allocation9_spill] sm:$0xff] %v5393_v41 }
 0x547   :  { %v5395_v8 = vpop.permute.xlu0 %2566 }
 0x548   :  { %6626 = vst [vmem:[#allocation10_spill] sm:$0xff] %v5395_v8 }
 0x54b   :  { %v5397_v21 = vpop.permute.xlu0 %2230 }
 0x54c   :  { %6627 = vst [vmem:[#allocation11_spill] sm:$0xff] %v5397_v21 }
 0x54f   :  { %v5399_v6 = vpop.permute.xlu0 %2568 }
 0x550   :  { %6628 = vst [vmem:[#allocation12_spill] sm:$0xff] %v5399_v6 }
 0x553   :  { %v5401_v51 = vpop.permute.xlu0 %2232 }
 0x554   :  { %6629 = vst [vmem:[#allocation13_spill] sm:$0xff] %v5401_v51 }
 0x557   :  { %v5403_v40 = vpop.permute.xlu0 %2570 }
 0x558   :  { %6630 = vst [vmem:[#allocation14_spill] sm:$0xff] %v5403_v40 }
 0x5a7   :  { %v5405_v23 = vpop.trf.xlu0 }
 0x5a8   :  { %6631 = vst [vmem:[#allocation15_spill] sm:$0xff] %v5405_v23  ;;  %v1997_v63 = vrot.slane %v5405_v23, 1  ;;  %v2166_v34 = vrot.slane %v5405_v23, 2  ;;  %v2335_v56 = vrot.slane %v5405_v23, 3  ;;  %v2504_v8 = vrot.slane %v5405_v23, 4 }
 0x5ab   :  { %v5409_v61 = vpop.trf.xlu0 }
 0x5ac   :  { %6632 = vst [vmem:[#allocation16_spill] sm:$0xff] %v5409_v61  ;;  %v1998_v43 = vrot.slane %v5409_v61, 1  ;;  %v2336_v6 = vrot.slane %v5409_v61, 3  ;;  %v2167_v51 = vrot.slane %v5409_v61, 2  ;;  %v2505_v40 = vrot.slane %v5409_v61, 4 }
 0x5ae   :  { %v1999_v21 = vsel %vm1960_vm2, %v1997_v63, %v1998_v43  ;;  %v2168_v41 = vsel %vm2129_vm3, %v2166_v34, %v2167_v51  ;;  %v2337_v23 = vsel %vm2298_vm4, %v2335_v56, %v2336_v6  ;;  %v2506_v18 = vsel %vm2467_vm5, %v2504_v8, %v2505_v40 }
 0x5af   :  { %2065 = vrot.lane.b32.xlu1 %v1999_v21, %s4369_s28  ;;  %v5420_v7 = vpop.trf.xlu0  ;;  %2234 = vrot.lane.b32.xlu0 %v2168_v41, %s4370_s1 }
 0x5b0   :  { %v2000_v57 = vrot.slane %v5420_v7, 1  ;;  %v2169_v45 = vrot.slane %v5420_v7, 2  ;;  %v2338_v34 = vrot.slane %v5420_v7, 3 }
 0x5b2   :  { %v2001_v21 = vsel %vm1960_vm2, %v1998_v43, %v2000_v57  ;;  %v2170_v41 = vsel %vm2129_vm3, %v2167_v51, %v2169_v45  ;;  %v2339_v8 = vsel %vm2298_vm4, %v2336_v6, %v2338_v34 }
 0x5b3   :  { %2403 = vrot.lane.b32.xlu1 %v2337_v23, %s4371_s29  ;;  %2572 = vrot.lane.b32.xlu0 %v2506_v18, %s4372_s3  ;;  %v5429_v63 = vpop.trf.xlu0  ;;  %v2507_v23 = vrot.slane %v5420_v7, 4 }
 0x5b4   :  { %6633 = vst [vmem:[#allocation17_spill] sm:$0xff] %v5429_v63  ;;  %v2002_v56 = vrot.slane %v5429_v63, 1  ;;  %v2171_v61 = vrot.slane %v5429_v63, 2 }
 0x5b5   :  { %v2508_v43 = vsel %vm2467_vm5, %v2505_v40, %v2507_v23 }
 0x5b6   :  { %v2003_v18 = vsel %vm1960_vm2, %v2000_v57, %v2002_v56  ;;  %v2172_v51 = vsel %vm2129_vm3, %v2169_v45, %v2171_v61 }
 0x5b7   :  { %2067 = vrot.lane.b32.xlu1 %v2001_v21, %s4369_s28  ;;  %2236 = vrot.lane.b32.xlu0 %v2170_v41, %s4370_s1  ;;  %v2340_v21 = vrot.slane %v5429_v63, 3  ;;  %v2509_v41 = vrot.slane %v5429_v63, 4  ;;  %v1812_v14 = vpop.trf.xlu0 }
 0x5b8   :  { %v2004_v57 = vrot.slane %v1812_v14, 1  ;;  %v2173_v6 = vrot.slane %v1812_v14, 2  ;;  %v2342_v45 = vrot.slane %v1812_v14, 3  ;;  %v2511_v40 = vrot.slane %v1812_v14, 4 }
 0x5b9   :  { %v2341_v37 = vsel %vm2298_vm4, %v2338_v34, %v2340_v21 }
 0x5ba   :  { %v2174_v63 = vsel %vm2129_vm3, %v2171_v61, %v2173_v6  ;;  %v2512_v34 = vsel %vm2467_vm5, %v2509_v41, %v2511_v40  ;;  %v1295_v40 = vld [vmem:[#allocation4 + $0xb8] sm:$0xff] }
 0x5bb   :  { %2405 = vrot.lane.b32.xlu1 %v2339_v8, %s4371_s29  ;;  %2069 = vrot.lane.b32.xlu0 %v2003_v18, %s4369_s28  ;;  %v2510_v8 = vsel %vm2467_vm5, %v2507_v23, %v2509_v41  ;;  %v2005_v18 = vsel %vm1960_vm2, %v2002_v56, %v2004_v57  ;;  %v1292_v56 = vld [vmem:[#allocation4 + $0xa0] sm:$0xff]  ;;  %v1294_v41 = vld [vmem:[#allocation4 + $0xb0] sm:$0xff] }
 0x5bf   :  { %2574 = vrot.lane.b32.xlu1 %v2508_v43, %s4372_s3  ;;  %2238 = vrot.lane.b32.xlu0 %v2172_v51, %s4370_s1  ;;  %v2343_v43 = vsel %vm2298_vm4, %v2340_v21, %v2342_v45  ;;  %v5461_v51 = vpop.permute.xlu1 %2057 }
 0x5c0   :  { %6634 = vst [vmem:[#allocation18_spill] sm:$0xff] %v5461_v51 }
 0x5c3   :  { %2407 = vrot.lane.b32.xlu1 %v2341_v37, %s4371_s29  ;;  %2576 = vrot.lane.b32.xlu0 %v2510_v8, %s4372_s3  ;;  %v1293_v37 = vld [vmem:[#allocation4 + $0xa8] sm:$0xff]  ;;  %v5463_v21 = vpop.permute.xlu1 %2395 }
 0x5c7   :  { %2071 = vrot.lane.b32.xlu1 %v2005_v18, %s4369_s28  ;;  %2240 = vrot.lane.b32.xlu0 %v2174_v63, %s4370_s1 }
 0x5cb   :  { %2409 = vrot.lane.b32.xlu1 %v2343_v43, %s4371_s29  ;;  %2578 = vrot.lane.b32.xlu0 %v2512_v34, %s4372_s3  ;;  %v5465_v34 = vpop.permute.xlu1 %2059 }
 0x5f2   :  { %v4064_v23 = vpop.f32.mrb[8].mxu1 }
 0x5f3   :  { %v1382_v14 = vadd.f32 %v4064_v23, %v1293_v37  ;;  %v1362_v57 = vpop.f32.mrb[9].mxu1 }
 0x5f4   :  { %v1381_v61 = vadd.f32 %v1362_v57, %v1292_v56 }
 0x5f5   :  { %v3882_v6 = vmul.f32 -1.442695, %v1382_v14  ;;  %v5467_v14 = vpop.permute.xlu1 %2397 }
 0x5f6   :  { %v3881_v8 = vmul.f32 -1.442695, %v1381_v61  ;;  %v4067_v18 = vpop.f32.mrb[10].mxu1 }
 0x5f7   :  { %4299 = vpow2.f32 %v3882_v6  ;;  %v1372_v63 = vpop.f32.mrb[11].mxu1  ;;  %v1384_v36 = vadd.f32 %v4067_v18, %v1295_v40 }
 0x5f8   :  { %4301 = vpow2.f32 %v3881_v8  ;;  %v1383_v45 = vadd.f32 %v1372_v63, %v1294_v41 }
 0x5f9   :  { %v5469_v57 = vpop.permute.xlu1 %2061 }
 0x5fa   :  { %v3883_v43 = vmul.f32 -1.442695, %v1383_v45 }
 0x5fc   :  { %4303 = vpow2.f32 %v3883_v43  ;;  %v2767_v43 = vld [vmem:[%s6416_s4] sm:$0xff] }
 0x5fd   :  { %4305 = vtanh.f32 %v1384_v36  ;;  %v5472_v40 = vpop.permute.xlu1 %2399 }
 0x601   :  { %v4300_v51 = vpop.eup %4299  ;;  %v5477_v36 = vpop.permute.xlu1 %2063 }
 0x602   :  { %v4302_v37 = vpop.eup %4301  ;;  %v1395_v23 = vadd.f32 1.0, %v4300_v51 }
 0x603   :  { %v1394_v56 = vadd.f32 1.0, %v4302_v37  ;;  %v2768_v37 = vld [vmem:[%s6416_s4 + $0x8] sm:$0xff] }
 0x604   :  { %4307 = vrcp.f32 %v1395_v23 }
 0x605   :  { %4309 = vrcp.f32 %v1394_v56  ;;  %v5485_v23 = vpop.permute.xlu1 %2401 }
 0x606   :  { %v4304_v61 = vpop.eup %4303  ;;  %6636 = vst [vmem:[#allocation20_spill] sm:$0xff] %v5485_v23 }
 0x607   :  { %v4306_v6 = vpop.eup %4305  ;;  %v1396_v45 = vadd.f32 1.0, %v4304_v61  ;;  %v2636_v61 = vsel %vm679_vm1, %v5011_v42, %v5086_v58  ;;  %v2637_v58 = vsel %vm679_vm1, %v5014_v29, %v5175_v12  ;;  %v4356_v29 = vld [vmem:[%s6413_s2 + $0x10] sm:$0xff] }
 0x609   :  { %4311 = vrcp.f32 %v1396_v45  ;;  %v2669_v45 = vsel %vm2668_vm6, %v2636_v61, %v5169_v4  ;;  %v2638_v4 = vsel %vm679_vm1, %v5024_v52, %v5092_v0  ;;  %v2670_v52 = vsel %vm2668_vm6, %v2637_v58, %v5088_v22  ;;  %v2771_v0 = vld [vmem:[%s6416_s4 + $0x20] sm:$0xff] }
 0x60a   :  { %v2671_v61 = vsel %vm2668_vm6, %v2638_v4, %v5179_v30  ;;  %v2640_v22 = vsel %vm679_vm1, %v5100_v33, %v5195_v54  ;;  %v6639_v4 = vld [vmem:[#allocation18_spill] sm:$0xff] }
 0x60b   :  { %v2673_v33 = vsel %vm2668_vm6, %v2640_v22, %v5187_v48 }
 0x60c   :  { %v2706_v48 = vsel %vm2701_vm7, %v2673_v33, %v5189_v50  ;;  %v6648_v33 = vld [vmem:[#allocation35_spill] sm:$0xff] }
 0x60d   :  { %v2739_v58 = vsel %vm2734_vm8, %v2706_v48, %v5191_v47  ;;  %v2646_v47 = vsel %vm679_vm1, %v5228_v26, %v5290_v5  ;;  %v6637_v5 = vld [vmem:[#allocation40_spill] sm:$0xff] }
 0x60e   :  { %v4308_v8 = vpop.eup %4307 }
 0x60f   :  { %v4310_v63 = vpop.eup %4309  ;;  %v1404_v41 = vmul.f32 %v4308_v8, %v5355_v62  ;;  %v2770_v8 = vld [vmem:[%s6416_s4 + $0x18] sm:$0xff] }
 0x610   :  { %v1405_v18 = vmul.f32 %v4310_v63, %v4306_v6  ;;  %v2769_v6 = vld [vmem:[%s6416_s4 + $0x10] sm:$0xff] }
 0x612   :  { %v5474_v51 = vadd.f32 %v1405_v18, %v1404_v41  ;;  %v5496_v41 = vpack.c.bf16 %v2768_v37, %v2767_v43  ;;  %v4355_v43 = vld [vmem:[%s6413_s2 + $0x8] sm:$0xff]  ;;  %v2702_v37 = vsel %vm2701_vm7, %v2669_v45, %v5171_v19  ;;  %v2639_v19 = vsel %vm679_vm1, %v5034_v20, %v5094_v38 }
 0x613   :  { %v4312_v62 = vpop.eup %4311  ;;  %v2703_v20 = vsel %vm2701_vm7, %v2670_v52, %v5090_v10  ;;  %v2672_v30 = vsel %vm2668_vm6, %v2639_v19, %v5096_v1 }
 0x614   :  { %6635 = vst [vmem:[#allocation19_spill] sm:$0xff] %v5474_v51  ;;  %4313 = vtanh.f32 %v5474_v51  ;;  %v5500_v51 = vpack.c.bf16 %v2770_v8, %v2769_v6  ;;  %v4357_v6 = vld [vmem:[%s6413_s2 + $0x18] sm:$0xff]  ;;  %v2704_v8 = vsel %vm2701_vm7, %v2671_v61, %v5181_v27  ;;  %v2736_v54 = vsel %vm2734_vm8, %v2703_v20, %v5177_v13  ;;  %v6646_v20 = vld [vmem:[#allocation50_spill] sm:$0xff] }
 0x615   :  { %v2705_v10 = vsel %vm2701_vm7, %v2672_v30, %v5098_v31  ;;  %v2737_v45 = vsel %vm2734_vm8, %v2704_v8, %v5183_v46  ;;  %v2643_v13 = vsel %vm679_vm1, %v5122_v25, %v5369_v59  ;;  %v2649_v30 = vsel %vm679_vm1, %v6646_v20, %v5465_v34  ;;  %v6647_v8 = vld [vmem:[#allocation39_spill] sm:$0xff] }
 0x616   :  { %v2738_v46 = vsel %vm2734_vm8, %v2705_v10, %v5185_v55  ;;  %v2676_v25 = vsel %vm2668_vm6, %v2643_v13, %v5199_v60  ;;  %v2645_v55 = vsel %vm679_vm1, %v5216_v17, %v5286_v53  ;;  %v2741_v60 = vsel %vm2734_vm8, %v5213_v32, %v5367_v39  ;;  %v6649_v10 = vld [vmem:[#allocation41_spill] sm:$0xff] }
 0x617   :  { %v2678_v26 = vsel %vm2668_vm6, %v2645_v55, %v5377_v16  ;;  %v2647_v32 = vsel %vm679_vm1, %v5241_v9, %v5294_v44  ;;  %v6640_v16 = vld [vmem:[#allocation49_spill] sm:$0xff]  ;;  %v6643_v9 = vld [vmem:[#allocation47_spill] sm:$0xff] }
 0x61e   :  { %v4314_v56 = vpop.eup %4313 }
 0x61f   :  { %v1408_v63 = vmul.f32 %v4314_v56, %v4312_v62  ;;  %v2735_v56 = vsel %vm2734_vm8, %v2702_v37, %v5173_v11  ;;  %v2648_v37 = vsel %vm679_vm1, %v6640_v16, %v6639_v4 }
 0x621   :  { %v1409_v18 = vmax.f32 %v1408_v63, 0.0  ;;  %4068 = vmatprep.subr.mxu0 %v1408_v63  ;;  %v5502_v23 = vpop.permute.xlu1 %2065  ;;  %v5504_v42 = vpop.permute.xlu0 %2234 }
 0x622   :  { %4069 = vmatpush3.msra.mxu0 %v1408_v63 }
 0x623   :  { %1411 = vst.msk [vmem:[#allocation5 + $0x28] sm:$0xff] %vm33_vm0, %v1409_v18  ;;  %4071 = vmatmul.mubr.msk.f32.vlgmr.msra.gmra.mrb[12].mxu0 %vm679_vm1, %v4355_v43  ;;  %4162 = vmatprep.subr.bf16.mxu0 %v5496_v41  ;;  %v2644_v18 = vsel %vm679_vm1, %v5210_v35, %v5282_v2  ;;  %v2740_v2 = vsel %vm2734_vm8, %v5203_v15, %v5193_v24 }
 0x624   :  { %4164 = vmatpush3.bf16.msra.mxu0 %v5496_v41  ;;  %4073 = vmatprep.mubr.msk.f32.mxu0 %vm679_vm1, %v4356_v29  ;;  %v2677_v35 = vsel %vm2668_vm6, %v2644_v18, %v5373_v3  ;;  %v6638_v3 = vld [vmem:[#allocation37_spill] sm:$0xff]  ;;  %v6641_v29 = vld [vmem:[#allocation38_spill] sm:$0xff] }
 0x625   :  { %4166 = vmatprep.subr.bf16.mxu0 %v5500_v51  ;;  %v5526_v12 = vpop.permute.xlu1 %2403  ;;  %v5528_v62 = vpop.permute.xlu0 %2572  ;;  %v2710_v53 = vsel %vm2701_vm7, %v2677_v35, %v5284_v28  ;;  %v6656_v35 = vld [vmem:[#allocation8_spill] sm:$0xff] }
 0x626   :  { %v2743_v52 = vsel %vm2734_vm8, %v2710_v53, %v6641_v29  ;;  %v6659_v53 = vld [vmem:[#allocation10_spill] sm:$0xff] }
 0x627   :  { %4074 = vmatmul.mubr.msk.f32.gmra.mrb[14].mxu0 %vm679_vm1, %v4357_v6  ;;  %v6645_v6 = vld [vmem:[#allocation7_spill] sm:$0xff] }
 0x628   :  { %4168 = vmatpush3.bf16.msra.mxu0 %v5500_v51  ;;  %4094 = vmatprep.mubr.msk.f32.mxu0 %vm2772_vm9, %v2735_v56  ;;  %v6644_v56 = vld [vmem:[#allocation42_spill] sm:$0xff]  ;;  %v2681_v22 = vsel %vm2668_vm6, %v2648_v37, %v6645_v6 }
 0x629   :  { %4092 = vmatprep.subr.mxu0 %v2771_v0  ;;  %v5553_v38 = vpop.permute.xlu1 %2067  ;;  %v5555_v11 = vpop.permute.xlu0 %2236  ;;  %v2680_v61 = vsel %vm2668_vm6, %v2647_v32, %v6644_v56  ;;  %v2714_v13 = vsel %vm2701_vm7, %v2681_v22, %v5463_v21 }
 0x62a   :  { %v1661_v63 = vld [vmem:[#allocation5 + $0x28] sm:$0xff] }
 0x62b   :  { %1824 = vxpose.xlu0.b32.start.end [1/1] (short) (narrow) %v1661_v63, 40 }
 0x62c   :  { %4093 = vmatpush3.msra.mxu0 %v2771_v0  ;;  %v6642_v0 = vld [vmem:[#allocation46_spill] sm:$0xff] }
 0x62d   :  { %4095 = vmatmul.mubr.msk.f32.vlgmr.msra.gmra.mrb[16].mxu0 %vm2772_vm9, %v2736_v54  ;;  %v5570_v1 = vpop.permute.xlu1 %2405  ;;  %v2070_v27 = vpop.permute.xlu0 %2069  ;;  %v2711_v19 = vsel %vm2701_vm7, %v2678_v26, %v6642_v0  ;;  %v2650_v54 = vsel %vm679_vm1, %v6648_v33, %v5469_v57  ;;  %v6653_v57 = vld [vmem:[#allocation11_spill] sm:$0xff] }
 0x62e   :  { %4097 = vmatprep.mubr.msk.f32.mxu0 %vm2772_vm9, %v2737_v45  ;;  %v2654_v31 = vsel %vm679_vm1, %v5420_v7, %v2070_v27  ;;  %v2709_v7 = vsel %vm2701_vm7, %v2676_v25, %v5205_v49  ;;  %v2679_v49 = vsel %vm2668_vm6, %v2646_v47, %v6637_v5  ;;  %v2744_v63 = vsel %vm2734_vm8, %v2711_v19, %v6647_v8  ;;  %v6650_v27 = vld [vmem:[#allocation48_spill] sm:$0xff]  ;;  %v6662_v5 = vld [vmem:[#allocation14_spill] sm:$0xff] }
 0x62f   :  { %v2742_v28 = vsel %vm2734_vm8, %v2709_v7, %v6638_v3  ;;  %v2712_v44 = vsel %vm2701_vm7, %v2679_v49, %v6643_v9  ;;  %v2713_v48 = vsel %vm2701_vm7, %v2680_v61, %v6650_v27  ;;  %v2747_v47 = vsel %vm2734_vm8, %v2714_v13, %v6656_v35  ;;  %v6658_v7 = vld [vmem:[#allocation13_spill] sm:$0xff] }
 0x630   :  { %v2745_v45 = vsel %vm2734_vm8, %v2712_v44, %v6649_v10 }
 0x631   :  { %4098 = vmatmul.mubr.msk.f32.gmra.mrb[18].mxu0 %vm2772_vm9, %v2738_v46  ;;  %v5588_v50 = vpop.permute.xlu1 %2574  ;;  %v2239_v43 = vpop.permute.xlu0 %2238  ;;  %v6652_v46 = vld [vmem:[#allocation15_spill] sm:$0xff] }
 0x632   :  { %4100 = vmatprep.mubr.msk.f32.mxu0 %vm2772_vm9, %v2739_v58  ;;  %v2687_v59 = vsel %vm2668_vm6, %v2654_v31, %v2239_v43  ;;  %v6651_v31 = vld [vmem:[#allocation9_spill] sm:$0xff]  ;;  %v2652_v18 = vsel %vm679_vm1, %v6652_v46, %v5502_v23  ;;  %v2683_v58 = vsel %vm2668_vm6, %v2650_v54, %v6653_v57  ;;  %v6654_v43 = vld [vmem:[#allocation36_spill] sm:$0xff] }
 0x633   :  { %v2682_v34 = vsel %vm2668_vm6, %v2649_v30, %v6651_v31  ;;  %v2651_v25 = vsel %vm679_vm1, %v6654_v43, %v5477_v36  ;;  %v2685_v23 = vsel %vm2668_vm6, %v2652_v18, %v5504_v42  ;;  %v2716_v36 = vsel %vm2701_vm7, %v2683_v58, %v5472_v40  ;;  %v6661_v40 = vld [vmem:[#allocation12_spill] sm:$0xff] }
 0x634   :  { %v2715_v21 = vsel %vm2701_vm7, %v2682_v34, %v5467_v14  ;;  %v2718_v14 = vsel %vm2701_vm7, %v2685_v23, %v5526_v12 }
 0x635   :  { %4101 = vmatmul.mubr.msk.f32.gmra.mrb[20].mxu0 %vm2772_vm9, %v2740_v2  ;;  %v2408_v17 = vpop.permute.xlu1 %2407  ;;  %v2577_v15 = vpop.permute.xlu0 %2576  ;;  %v6657_v2 = vld [vmem:[#allocation16_spill] sm:$0xff]  ;;  %v2748_v42 = vsel %vm2734_vm8, %v2715_v21, %v6659_v53  ;;  %v2751_v32 = vsel %vm2734_vm8, %v2718_v14, %v5528_v62 }
 0x636   :  { %4103 = vmatprep.mubr.msk.f32.mxu0 %vm2772_vm9, %v2741_v60  ;;  %v2720_v24 = vsel %vm2701_vm7, %v2687_v59, %v2408_v17  ;;  %v6655_v59 = vld [vmem:[#allocation6_spill] sm:$0xff]  ;;  %v2653_v60 = vsel %vm679_vm1, %v6657_v2, %v5553_v38  ;;  %v2684_v17 = vsel %vm2668_vm6, %v2651_v25, %v6658_v7  ;;  %v1414_v2 = vld [vmem:[#allocation4 + $0xc8] sm:$0xff] }
 0x637   :  { %v5623_v39 = vsel %vm2734_vm8, %v2720_v24, %v2577_v15  ;;  %v2746_v55 = vsel %vm2734_vm8, %v2713_v48, %v6655_v59  ;;  %v2686_v26 = vsel %vm2668_vm6, %v2653_v60, %v5555_v11  ;;  %v6660_v24 = vld [vmem:[#allocation20_spill] sm:$0xff]  ;;  %v2749_v15 = vsel %vm2734_vm8, %v2716_v36, %v6661_v40  ;;  %v1413_v7 = vld [vmem:[#allocation4 + $0xc0] sm:$0xff] }
 0x638   :  { %v2717_v38 = vsel %vm2701_vm7, %v2684_v17, %v6660_v24  ;;  %v2719_v12 = vsel %vm2701_vm7, %v2686_v26, %v5570_v1  ;;  %v1415_v24 = vld [vmem:[#allocation4 + $0xd0] sm:$0xff] }
 0x639   :  { %4104 = vmatmul.mubr.msk.f32.gmra.mrb[22].mxu0 %vm2772_vm9, %v2742_v28  ;;  %v2750_v49 = vsel %vm2734_vm8, %v2717_v38, %v6662_v5  ;;  %v2752_v11 = vsel %vm2734_vm8, %v2719_v12, %v5588_v50  ;;  %v5708_v3 = vpop.permute.xlu0 %2240  ;;  %v1416_v12 = vld [vmem:[#allocation4 + $0xd8] sm:$0xff] }
 0x63a   :  { %4106 = vmatprep.mubr.msk.f32.mxu0 %vm2772_vm9, %v2743_v52 }
 0x63d   :  { %4107 = vmatmul.mubr.msk.f32.gmra.mrb[24].mxu0 %vm2772_vm9, %v2744_v63  ;;  %v5710_v28 = vpop.permute.xlu0 %2578 }
 0x63e   :  { %4109 = vmatprep.mubr.msk.f32.mxu0 %vm2772_vm9, %v2745_v45 }
 0x641   :  { %4110 = vmatmul.mubr.msk.f32.gmra.mrb[26].mxu0 %vm2772_vm9, %v2746_v55 }
 0x642   :  { %4112 = vmatprep.mubr.msk.f32.mxu0 %vm2772_vm9, %v2747_v47 }
 0x645   :  { %4113 = vmatmul.mubr.msk.f32.gmra.mrb[28].mxu0 %vm2772_vm9, %v2748_v42 }
 0x646   :  { %4115 = vmatprep.mubr.msk.f32.mxu0 %vm2772_vm9, %v2749_v15 }
 0x649   :  { %4116 = vmatmul.mubr.msk.f32.gmra.mrb[30].mxu0 %vm2772_vm9, %v2750_v49 }
 0x64a   :  { %4118 = vmatprep.mubr.msk.f32.mxu0 %vm2772_vm9, %v2751_v32  ;;  %v5771_v32 = vld [vmem:[%s6417_s5] ss:$0 sm:$0xff] }
 0x64d   :  { %4119 = vmatmul.mubr.msk.f32.gmra.mrb[32].mxu0 %vm2772_vm9, %v2752_v11 }
 0x6ab   :  { %v5712_v62 = vpop.trf.xlu0 }
 0x6ac   :  { %v2006_v1 = vrot.slane %v5712_v62, 1  ;;  %v2175_v4 = vrot.slane %v5712_v62, 2  ;;  %v2344_v37 = vrot.slane %v5712_v62, 3  ;;  %v2513_v50 = vrot.slane %v5712_v62, 4 }
 0x6af   :  { %v5716_v16 = vpop.trf.xlu0 }
 0x6b0   :  { %v2007_v29 = vrot.slane %v5716_v16, 1  ;;  %v2176_v52 = vrot.slane %v5716_v16, 2  ;;  %v2345_v0 = vrot.slane %v5716_v16, 3  ;;  %v2514_v19 = vrot.slane %v5716_v16, 4 }
 0x6b2   :  { %v2008_v9 = vsel %vm1960_vm2, %v2006_v1, %v2007_v29  ;;  %v2177_v44 = vsel %vm2129_vm3, %v2175_v4, %v2176_v52  ;;  %v2346_v61 = vsel %vm2298_vm4, %v2344_v37, %v2345_v0  ;;  %v2515_v6 = vsel %vm2467_vm5, %v2513_v50, %v2514_v19 }
 0x6b3   :  { %2073 = vrot.lane.b32.xlu1 %v2008_v9, %s4369_s28  ;;  %2242 = vrot.lane.b32.xlu0 %v2177_v44, %s4370_s1  ;;  %v5728_v56 = vpop.trf.xlu0 }
 0x6b4   :  { %v2009_v22 = vrot.slane %v5728_v56, 1  ;;  %v2178_v20 = vrot.slane %v5728_v56, 2  ;;  %v2347_v63 = vrot.slane %v5728_v56, 3  ;;  %v2516_v33 = vrot.slane %v5728_v56, 4 }
 0x6b6   :  { %v2010_v30 = vsel %vm1960_vm2, %v2007_v29, %v2009_v22  ;;  %v2179_v8 = vsel %vm2129_vm3, %v2176_v52, %v2178_v20  ;;  %v2348_v10 = vsel %vm2298_vm4, %v2345_v0, %v2347_v63  ;;  %v2517_v45 = vsel %vm2467_vm5, %v2514_v19, %v2516_v33 }
 0x6b7   :  { %2411 = vrot.lane.b32.xlu1 %v2346_v61, %s4371_s29  ;;  %2580 = vrot.lane.b32.xlu0 %v2515_v6, %s4372_s3  ;;  %v5740_v54 = vpop.trf.xlu0 }
 0x6b8   :  { %v2011_v27 = vrot.slane %v5740_v54, 1  ;;  %v2180_v48 = vrot.slane %v5740_v54, 2  ;;  %v2349_v34 = vrot.slane %v5740_v54, 3  ;;  %v2518_v46 = vrot.slane %v5740_v54, 4 }
 0x6ba   :  { %v2012_v13 = vsel %vm1960_vm2, %v2009_v22, %v2011_v27  ;;  %v2181_v31 = vsel %vm2129_vm3, %v2178_v20, %v2180_v48  ;;  %v2350_v43 = vsel %vm2298_vm4, %v2347_v63, %v2349_v34  ;;  %v2519_v25 = vsel %vm2467_vm5, %v2516_v33, %v2518_v46 }
 0x6bb   :  { %2075 = vrot.lane.b32.xlu1 %v2010_v30, %s4369_s28  ;;  %2244 = vrot.lane.b32.xlu0 %v2179_v8, %s4370_s1  ;;  %v1844_v18 = vpop.trf.xlu0 }
 0x6bc   :  { %v2013_v57 = vrot.slane %v1844_v18, 1  ;;  %v2182_v58 = vrot.slane %v1844_v18, 2  ;;  %v2351_v59 = vrot.slane %v1844_v18, 3  ;;  %v2520_v55 = vrot.slane %v1844_v18, 4 }
 0x6be   :  { %v2014_v21 = vsel %vm1960_vm2, %v2011_v27, %v2013_v57  ;;  %v2183_v23 = vsel %vm2129_vm3, %v2180_v48, %v2182_v58  ;;  %v2352_v35 = vsel %vm2298_vm4, %v2349_v34, %v2351_v59  ;;  %v2521_v47 = vsel %vm2467_vm5, %v2518_v46, %v2520_v55 }
 0x6bf   :  { %2413 = vrot.lane.b32.xlu1 %v2348_v10, %s4371_s29  ;;  %2582 = vrot.lane.b32.xlu0 %v2517_v45, %s4372_s3 }
 0x6c3   :  { %2077 = vrot.lane.b32.xlu1 %v2012_v13, %s4369_s28  ;;  %2246 = vrot.lane.b32.xlu0 %v2181_v31, %s4370_s1 }
 0x6c7   :  { %2415 = vrot.lane.b32.xlu1 %v2350_v43, %s4371_s29  ;;  %2584 = vrot.lane.b32.xlu0 %v2519_v25, %s4372_s3 }
 0x6cb   :  { %2079 = vrot.lane.b32.xlu1 %v2014_v21, %s4369_s28  ;;  %2248 = vrot.lane.b32.xlu0 %v2183_v23, %s4370_s1 }
 0x6cf   :  { %2417 = vrot.lane.b32.xlu1 %v2352_v35, %s4371_s29  ;;  %2586 = vrot.lane.b32.xlu0 %v2521_v47, %s4372_s3 }
 0x6f6   :  { %v4072_v60 = vpop.f32.mrb[12].mxu0 }
 0x6f7   :  { %v1503_v36 = vadd.f32 %v4072_v60, %v1414_v2  ;;  %v1483_v17 = vpop.f32.mrb[13].mxu0 }
 0x6f8   :  { %v1502_v14 = vadd.f32 %v1483_v17, %v1413_v7 }
 0x6f9   :  { %v3889_v53 = vmul.f32 -1.442695, %v1503_v36 }
 0x6fa   :  { %v3888_v42 = vmul.f32 -1.442695, %v1502_v14  ;;  %v4075_v26 = vpop.f32.mrb[14].mxu0 }
 0x6fb   :  { %4315 = vpow2.f32 %v3889_v53  ;;  %v1493_v38 = vpop.f32.mrb[15].mxu0  ;;  %v1505_v49 = vadd.f32 %v4075_v26, %v1416_v12 }
 0x6fc   :  { %4317 = vpow2.f32 %v3888_v42  ;;  %v1504_v40 = vadd.f32 %v1493_v38, %v1415_v24 }
 0x6fe   :  { %v3890_v15 = vmul.f32 -1.442695, %v1504_v40 }
 0x700   :  { %4319 = vpow2.f32 %v3890_v15  ;;  %v4096_v5 = vpop.f32.mrb[16].mxu0 }
 0x701   :  { %v3102_v11 = vadd.f32 %v4096_v5, %v5771_v32  ;;  %v2935_v1 = vpop.f32.mrb[17].mxu0  ;;  %4321 = vtanh.f32 %v1505_v49 }
 0x702   :  { %v3101_v4 = vadd.f32 %v5771_v32, %v2935_v1 }
 0x703   :  { %v3247_v37 = vsel %vm3133_vm10, %v3102_v11, -inf  ;;  %v3303_v50 = vsel %vm3190_vm11, %v3102_v11, -inf }
 0x704   :  { %v3248_v29 = vrot.slane %v3247_v37, 4  ;;  %v3304_v52 = vrot.slane %v3303_v50, 4  ;;  %v3134_v0 = vsel %vm3133_vm10, %v3101_v4, -inf  ;;  %v3191_v19 = vsel %vm3190_vm11, %v3101_v4, -inf  ;;  %v4099_v9 = vpop.f32.mrb[18].mxu0 }
 0x705   :  { %v4316_v44 = vpop.eup %4315  ;;  %v3135_v61 = vrot.slane %v3134_v0, 4  ;;  %v3192_v6 = vrot.slane %v3191_v19, 4  ;;  %v3104_v22 = vadd.f32 %v4099_v9, %v5771_v32  ;;  %v2945_v20 = vpop.f32.mrb[19].mxu0 }
 0x706   :  { %v4318_v30 = vpop.eup %4317  ;;  %v1516_v8 = vadd.f32 1.0, %v4316_v44  ;;  %v3249_v63 = vmax.f32 %v3247_v37, %v3248_v29  ;;  %v3305_v33 = vmax.f32 %v3303_v50, %v3304_v52  ;;  %v3103_v10 = vadd.f32 %v5771_v32, %v2945_v20 }
 0x707   :  { %v1515_v45 = vadd.f32 1.0, %v4318_v30  ;;  %v3136_v27 = vmax.f32 %v3134_v0, %v3135_v61  ;;  %v3193_v48 = vmax.f32 %v3191_v19, %v3192_v6  ;;  %v3471_v13 = vsel %vm3133_vm10, %v3104_v22, -inf }
 0x708   :  { %4323 = vrcp.f32 %v1516_v8  ;;  %v3250_v31 = vrot.slane %v3249_v63, 2  ;;  %v3306_v34 = vrot.slane %v3305_v33, 2  ;;  %v3472_v46 = vrot.slane %v3471_v13, 4  ;;  %v4102_v18 = vpop.f32.mrb[20].mxu0 }
 0x709   :  { %4325 = vrcp.f32 %v1515_v45  ;;  %v3137_v57 = vrot.slane %v3136_v27, 2  ;;  %v3194_v58 = vrot.slane %v3193_v48, 2  ;;  %v3527_v43 = vsel %vm3190_vm11, %v3104_v22, -inf  ;;  %v2955_v25 = vpop.f32.mrb[21].mxu0 }
 0x70a   :  { %v4320_v59 = vpop.eup %4319  ;;  %v3251_v55 = vmax.f32 %v3249_v63, %v3250_v31  ;;  %v3307_v21 = vmax.f32 %v3305_v33, %v3306_v34  ;;  %v3473_v23 = vmax.f32 %v3471_v13, %v3472_v46  ;;  %v3528_v35 = vrot.slane %v3527_v43, 4 }
 0x70b   :  { %v1517_v47 = vadd.f32 1.0, %v4320_v59  ;;  %v3138_v2 = vmax.f32 %v3136_v27, %v3137_v57  ;;  %v3195_v60 = vmax.f32 %v3193_v48, %v3194_v58  ;;  %v3359_v36 = vsel %vm3133_vm10, %v3103_v10, -inf  ;;  %v4322_v11 = vpop.eup %4321  ;;  %v6663_v27 = vld [vmem:[#allocation19_spill] sm:$0xff] }
 0x70c   :  { %v3252_v7 = vrot.slane %v3251_v55, 1  ;;  %v3308_v17 = vrot.slane %v3307_v21, 1  ;;  %v3474_v14 = vrot.slane %v3473_v23, 2  ;;  %v3529_v53 = vmax.f32 %v3527_v43, %v3528_v35  ;;  %v4105_v42 = vpop.f32.mrb[22].mxu0 }
 0x70d   :  { %4327 = vrcp.f32 %v1517_v47  ;;  %v3139_v26 = vrot.slane %v3138_v2, 1  ;;  %v3196_v24 = vrot.slane %v3195_v60, 1  ;;  %v3360_v38 = vrot.slane %v3359_v36, 4  ;;  %v2965_v40 = vpop.f32.mrb[23].mxu0 }
 0x70e   :  { %v5784_v15 = vmax.f32 %v3251_v55, %v3252_v7  ;;  %v5786_v12 = vmax.f32 %v3307_v21, %v3308_v17  ;;  %v3475_v5 = vmax.f32 %v3473_v23, %v3474_v14  ;;  %v3530_v49 = vrot.slane %v3529_v53, 2 }
 0x70f   :  { %v5788_v1 = vmax.f32 %v3138_v2, %v3139_v26  ;;  %v5790_v4 = vmax.f32 %v3195_v60, %v3196_v24  ;;  %v3361_v37 = vmax.f32 %v3359_v36, %v3360_v38  ;;  %v3415_v50 = vsel %vm3190_vm11, %v3103_v10, -inf }
 0x710   :  { %v3476_v29 = vrot.slane %v3475_v5, 1  ;;  %v3531_v52 = vmax.f32 %v3529_v53, %v3530_v49  ;;  %v3416_v0 = vrot.slane %v3415_v50, 4  ;;  %v3106_v19 = vadd.f32 %v4102_v18, %v5771_v32  ;;  %v5794_v9 = vpop.f32.mrb[24].mxu0 }
 0x711   :  { %v3362_v44 = vrot.slane %v3361_v37, 2  ;;  %v3105_v61 = vadd.f32 %v5771_v32, %v2955_v25  ;;  %v3108_v6 = vadd.f32 %v4105_v42, %v5771_v32  ;;  %v3107_v22 = vadd.f32 %v5771_v32, %v2965_v40  ;;  %v5799_v20 = vpop.f32.mrb[25].mxu0 }
 0x712   :  { %v4324_v30 = vpop.eup %4323  ;;  %v5801_v8 = vmax.f32 %v3475_v5, %v3476_v29  ;;  %v3532_v63 = vrot.slane %v3531_v52, 1  ;;  %v3417_v33 = vmax.f32 %v3415_v50, %v3416_v0  ;;  %v3254_v10 = vsel %vm3133_vm10, %v3106_v19, -inf }
 0x713   :  { %v4326_v45 = vpop.eup %4325  ;;  %v1525_v48 = vmul.f32 %v4324_v30, %v6663_v27  ;;  %v3363_v13 = vmax.f32 %v3361_v37, %v3362_v44  ;;  %v3255_v31 = vrot.slane %v3254_v10, 4  ;;  %v3310_v34 = vsel %vm3190_vm11, %v3106_v19, -inf }
 0x714   :  { %v1526_v46 = vmul.f32 %v4326_v45, %v4322_v11  ;;  %v5806_v18 = vmax.f32 %v3531_v52, %v3532_v63  ;;  %v3418_v57 = vrot.slane %v3417_v33, 2  ;;  %v3311_v58 = vrot.slane %v3310_v34, 4  ;;  %v5808_v43 = vpop.f32.mrb[26].mxu0 }
 0x715   :  { %v3364_v25 = vrot.slane %v3363_v13, 1  ;;  %v3256_v59 = vmax.f32 %v3254_v10, %v3255_v31  ;;  %v3141_v55 = vsel %vm3133_vm10, %v3105_v61, -inf  ;;  %v3198_v21 = vsel %vm3190_vm11, %v3105_v61, -inf  ;;  %v5812_v23 = vpop.f32.mrb[27].mxu0 }
 0x716   :  { %v5814_v35 = vadd.f32 %v1526_v46, %v1525_v48  ;;  %v3419_v47 = vmax.f32 %v3417_v33, %v3418_v57  ;;  %v3312_v2 = vmax.f32 %v3310_v34, %v3311_v58  ;;  %v3142_v60 = vrot.slane %v3141_v55, 4 }
 0x717   :  { %v5816_v36 = vpop.eup %4327  ;;  %v5818_v7 = vmax.f32 %v3363_v13, %v3364_v25  ;;  %v3257_v17 = vrot.slane %v3256_v59, 2  ;;  %v3199_v14 = vrot.slane %v3198_v21, 4  ;;  %v3478_v53 = vsel %vm3133_vm10, %v3108_v6, -inf }
 0x718   :  { %v3420_v42 = vrot.slane %v3419_v47, 1  ;;  %v3313_v26 = vrot.slane %v3312_v2, 2  ;;  %v3143_v24 = vmax.f32 %v3141_v55, %v3142_v60  ;;  %v3479_v38 = vrot.slane %v3478_v53, 4  ;;  %v5821_v40 = vpop.f32.mrb[28].mxu0 }
 0x719   :  { %v3258_v5 = vmax.f32 %v3256_v59, %v3257_v17  ;;  %v3200_v49 = vmax.f32 %v3198_v21, %v3199_v14  ;;  %v3534_v11 = vsel %vm3190_vm11, %v3108_v6, -inf  ;;  %v3366_v37 = vsel %vm3133_vm10, %v3107_v22, -inf  ;;  %v5825_v50 = vpop.f32.mrb[29].mxu0 }
 0x71a   :  { %v5827_v29 = vmax.f32 %v3419_v47, %v3420_v42  ;;  %v3314_v52 = vmax.f32 %v3312_v2, %v3313_v26  ;;  %v3144_v0 = vrot.slane %v3143_v24, 2  ;;  %v3480_v19 = vmax.f32 %v3478_v53, %v3479_v38 }
 0x71b   :  { %v3259_v44 = vrot.slane %v3258_v5, 1  ;;  %v3201_v61 = vrot.slane %v3200_v49, 2  ;;  %v3535_v30 = vrot.slane %v3534_v11, 4  ;;  %v3367_v63 = vrot.slane %v3366_v37, 4 }
 0x71c   :  { %v3315_v33 = vrot.slane %v3314_v52, 1  ;;  %v3145_v10 = vmax.f32 %v3143_v24, %v3144_v0  ;;  %v3481_v45 = vrot.slane %v3480_v19, 2  ;;  %v3422_v27 = vsel %vm3190_vm11, %v3107_v22, -inf  ;;  %v5830_v48 = vpop.f32.mrb[30].mxu0 }
 0x71d   :  { %v3260_v6 = vmax.f32 %v3258_v5, %v3259_v44  ;;  %v3202_v13 = vmax.f32 %v3200_v49, %v3201_v61  ;;  %v3536_v31 = vmax.f32 %v3534_v11, %v3535_v30  ;;  %v3368_v34 = vmax.f32 %v3366_v37, %v3367_v63  ;;  %v5832_v46 = vpop.f32.mrb[31].mxu0 }
 0x71e   :  { %v3316_v57 = vmax.f32 %v3314_v52, %v3315_v33  ;;  %v3146_v58 = vrot.slane %v3145_v10, 1  ;;  %v3482_v25 = vmax.f32 %v3480_v19, %v3481_v45  ;;  %v3423_v59 = vrot.slane %v3422_v27, 4 }
 0x71f   :  { %v5836_v55 = vsel %vm3591_vm12, %v3260_v6, %v5784_v15  ;;  %v3203_v21 = vrot.slane %v3202_v13, 1  ;;  %v3537_v47 = vrot.slane %v3536_v31, 2  ;;  %v3369_v2 = vrot.slane %v3368_v34, 2 }
 0x720   :  { %v5840_v22 = vsel %vm3591_vm12, %v3316_v57, %v5786_v12  ;;  %v3147_v60 = vmax.f32 %v3145_v10, %v3146_v58  ;;  %v3483_v17 = vrot.slane %v3482_v25, 1  ;;  %v3424_v14 = vmax.f32 %v3422_v27, %v3423_v59  ;;  %v5842_v53 = vpop.f32.mrb[32].mxu0 }
 0x721   :  { %v3204_v42 = vmax.f32 %v3202_v13, %v3203_v21  ;;  %v3538_v26 = vmax.f32 %v3536_v31, %v3537_v47  ;;  %v3370_v24 = vmax.f32 %v3368_v34, %v3369_v2  ;;  %v3110_v38 = vadd.f32 %v5794_v9, %v5771_v32  ;;  %v5846_v15 = vpop.f32.mrb[33].mxu0  ;;  %v5880_v2 = vpop.permute.xlu1 %2071 }
 0x722   :  { %v5850_v5 = vsel %vm3591_vm12, %v3147_v60, %v5788_v1  ;;  %v3484_v49 = vmax.f32 %v3482_v25, %v3483_v17  ;;  %v3425_v12 = vrot.slane %v3424_v14, 2  ;;  %v3109_v11 = vadd.f32 %v5771_v32, %v5799_v20 }
 0x723   :  { %v5856_v37 = vsel %vm3591_vm12, %v3204_v42, %v5790_v4  ;;  %v3539_v52 = vrot.slane %v3538_v26, 1  ;;  %v3371_v0 = vrot.slane %v3370_v24, 1  ;;  %v3261_v19 = vsel %vm3133_vm10, %v3110_v38, -inf }
 0x724   :  { %v5861_v9 = vsel %vm3591_vm12, %v3484_v49, %v5801_v8  ;;  %v3426_v44 = vmax.f32 %v3424_v14, %v3425_v12  ;;  %v3262_v1 = vrot.slane %v3261_v19, 4  ;;  %v3317_v61 = vsel %vm3190_vm11, %v3110_v38, -inf }
 0x725   :  { %v3540_v30 = vmax.f32 %v3538_v26, %v3539_v52  ;;  %v3372_v63 = vmax.f32 %v3370_v24, %v3371_v0  ;;  %v3318_v33 = vrot.slane %v3317_v61, 4  ;;  %v3148_v20 = vsel %vm3133_vm10, %v3109_v11, -inf }
 0x726   :  { %v3427_v4 = vrot.slane %v3426_v44, 1  ;;  %v3263_v10 = vmax.f32 %v3261_v19, %v3262_v1  ;;  %v3149_v45 = vrot.slane %v3148_v20, 4  ;;  %v3205_v27 = vsel %vm3190_vm11, %v3109_v11, -inf }
 0x727   :  { %v5868_v6 = vsel %vm3591_vm12, %v3540_v30, %v5806_v18  ;;  %v5872_v8 = vsel %vm3591_vm12, %v3372_v63, %v5818_v7  ;;  %v3319_v13 = vmax.f32 %v3317_v61, %v3318_v33  ;;  %v3206_v31 = vrot.slane %v3205_v27, 4 }
 0x728   :  { %v3428_v34 = vmax.f32 %v3426_v44, %v3427_v4  ;;  %v3264_v57 = vrot.slane %v3263_v10, 2  ;;  %v3150_v58 = vmax.f32 %v3148_v20, %v3149_v45  ;;  %v3112_v25 = vadd.f32 %v5808_v43, %v5771_v32  ;;  %v5890_v20 = vpop.permute.xlu1 %2409 }
 0x729   :  { %v3320_v59 = vrot.slane %v3319_v13, 2  ;;  %v3207_v21 = vmax.f32 %v3205_v27, %v3206_v31  ;;  %v3111_v47 = vadd.f32 %v5771_v32, %v5812_v23  ;;  %v3114_v18 = vadd.f32 %v5821_v40, %v5771_v32 }
 0x72a   :  { %v5884_v7 = vsel %vm3591_vm12, %v3428_v34, %v5827_v29  ;;  %v3265_v60 = vmax.f32 %v3263_v10, %v3264_v57  ;;  %v3151_v17 = vrot.slane %v3150_v58, 2  ;;  %v3485_v14 = vsel %vm3133_vm10, %v3112_v25, -inf }
 0x72b   :  { %v3321_v42 = vmax.f32 %v3319_v13, %v3320_v59  ;;  %v3208_v43 = vrot.slane %v3207_v21, 2  ;;  %v3486_v26 = vrot.slane %v3485_v14, 4  ;;  %v3541_v24 = vsel %vm3190_vm11, %v3112_v25, -inf }
 0x72c   :  { %v3266_v38 = vrot.slane %v3265_v60, 1  ;;  %v3152_v23 = vmax.f32 %v3150_v58, %v3151_v17  ;;  %v3542_v49 = vrot.slane %v3541_v24, 4  ;;  %v3373_v40 = vsel %vm3133_vm10, %v3111_v47, -inf }
 0x72d   :  { %v3322_v12 = vrot.slane %v3321_v42, 1  ;;  %v3209_v11 = vmax.f32 %v3207_v21, %v3208_v43  ;;  %v3487_v52 = vmax.f32 %v3485_v14, %v3486_v26  ;;  %v3374_v0 = vrot.slane %v3373_v40, 4  ;;  %v5912_v43 = vpop.permute.xlu1 %2073 }
 0x72e   :  { %v3267_v29 = vmax.f32 %v3265_v60, %v3266_v38  ;;  %v3153_v19 = vrot.slane %v3152_v23, 1  ;;  %v3543_v44 = vmax.f32 %v3541_v24, %v3542_v49  ;;  %v3429_v1 = vsel %vm3190_vm11, %v3111_v47, -inf }
 0x72f   :  { %v3323_v61 = vmax.f32 %v3321_v42, %v3322_v12  ;;  %v3210_v30 = vrot.slane %v3209_v11, 1  ;;  %v3488_v63 = vrot.slane %v3487_v52, 2  ;;  %v3375_v33 = vmax.f32 %v3373_v40, %v3374_v0 }
 0x730   :  { %v5894_v4 = vsel %vm3593_vm13, %v3267_v29, %v5836_v55  ;;  %v3154_v10 = vmax.f32 %v3152_v23, %v3153_v19  ;;  %v3544_v45 = vrot.slane %v3543_v44, 2  ;;  %v3430_v27 = vrot.slane %v3429_v1, 4 }
 0x731   :  { %v5898_v13 = vsel %vm3593_vm13, %v3323_v61, %v5840_v22  ;;  %v3211_v31 = vmax.f32 %v3209_v11, %v3210_v30  ;;  %v3489_v34 = vmax.f32 %v3487_v52, %v3488_v63  ;;  %v3376_v57 = vrot.slane %v3375_v33, 2 }
 0x732   :  { %v5902_v58 = vsel %vm3593_vm13, %v3154_v10, %v5850_v5  ;;  %v3545_v25 = vmax.f32 %v3543_v44, %v3544_v45  ;;  %v3431_v59 = vmax.f32 %v3429_v1, %v3430_v27  ;;  %v3268_v21 = vsel %vm3133_vm10, %v3114_v18, -inf }
 0x733   :  { %v5907_v55 = vsel %vm3593_vm13, %v3211_v31, %v5856_v37  ;;  %v3490_v47 = vrot.slane %v3489_v34, 1  ;;  %v3377_v60 = vmax.f32 %v3375_v33, %v3376_v57  ;;  %v3269_v17 = vrot.slane %v3268_v21, 4 }
 0x734   :  { %v3546_v22 = vrot.slane %v3545_v25, 1  ;;  %v3432_v14 = vrot.slane %v3431_v59, 2  ;;  %v3324_v42 = vsel %vm3190_vm11, %v3114_v18, -inf  ;;  %v3113_v5 = vadd.f32 %v5771_v32, %v5825_v50  ;;  %v5920_v50 = vpop.permute.xlu0 %2242 }
 0x735   :  { %v3491_v26 = vmax.f32 %v3489_v34, %v3490_v47  ;;  %v3378_v24 = vrot.slane %v3377_v60, 1  ;;  %v3270_v38 = vmax.f32 %v3268_v21, %v3269_v17  ;;  %v3325_v23 = vrot.slane %v3324_v42, 4 }
 0x736   :  { %v3547_v49 = vmax.f32 %v3545_v25, %v3546_v22  ;;  %v3433_v37 = vmax.f32 %v3431_v59, %v3432_v14  ;;  %v3155_v40 = vsel %vm3133_vm10, %v3113_v5, -inf  ;;  %v3212_v12 = vsel %vm3190_vm11, %v3113_v5, -inf }
 0x737   :  { %v5918_v11 = vsel %vm3593_vm13, %v3491_v26, %v5861_v9  ;;  %v3379_v18 = vmax.f32 %v3377_v60, %v3378_v24  ;;  %v3271_v52 = vrot.slane %v3270_v38, 2  ;;  %v3326_v0 = vmax.f32 %v3324_v42, %v3325_v23 }
 0x738   :  { %v5924_v29 = vsel %vm3593_vm13, %v3547_v49, %v5868_v6  ;;  %v3434_v19 = vrot.slane %v3433_v37, 1  ;;  %v3156_v44 = vrot.slane %v3155_v40, 4  ;;  %v3213_v1 = vrot.slane %v3212_v12, 4  ;;  %v5934_v6 = vpop.permute.xlu1 %2411  ;;  %v5943_v22 = vpop.permute.xlu0 %2580 }
 0x739   :  { %v5928_v61 = vsel %vm3593_vm13, %v3379_v18, %v5872_v8  ;;  %v3272_v30 = vmax.f32 %v3270_v38, %v3271_v52  ;;  %v3327_v63 = vrot.slane %v3326_v0, 2  ;;  %v3116_v9 = vadd.f32 %v5830_v48, %v5771_v32 }
 0x73a   :  { %v3435_v33 = vmax.f32 %v3433_v37, %v3434_v19  ;;  %v3157_v10 = vmax.f32 %v3155_v40, %v3156_v44  ;;  %v3214_v45 = vmax.f32 %v3212_v12, %v3213_v1  ;;  %v3115_v27 = vadd.f32 %v5771_v32, %v5832_v46 }
 0x73b   :  { %v3273_v31 = vrot.slane %v3272_v30, 1  ;;  %v3328_v34 = vmax.f32 %v3326_v0, %v3327_v63  ;;  %v3492_v57 = vsel %vm3133_vm10, %v3116_v9, -inf  ;;  %v3548_v8 = vsel %vm3190_vm11, %v3116_v9, -inf }
 0x73c   :  { %v5940_v25 = vsel %vm3593_vm13, %v3435_v33, %v5884_v7  ;;  %v3158_v59 = vrot.slane %v3157_v10, 2  ;;  %v3215_v48 = vrot.slane %v3214_v45, 2  ;;  %v3493_v21 = vrot.slane %v3492_v57, 4  ;;  %v5950_v18 = vpop.permute.xlu1 %2075 }
 0x73d   :  { %v3274_v47 = vmax.f32 %v3272_v30, %v3273_v31  ;;  %v3329_v60 = vrot.slane %v3328_v34, 1  ;;  %v3549_v17 = vrot.slane %v3548_v8, 4  ;;  %v3380_v46 = vsel %vm3133_vm10, %v3115_v27, -inf }
 0x73e   :  { %v3159_v14 = vmax.f32 %v3157_v10, %v3158_v59  ;;  %v3216_v42 = vmax.f32 %v3214_v45, %v3215_v48  ;;  %v3494_v5 = vmax.f32 %v3492_v57, %v3493_v21  ;;  %v3381_v26 = vrot.slane %v3380_v46, 4 }
 0x73f   :  { %v3330_v24 = vmax.f32 %v3328_v34, %v3329_v60  ;;  %v5947_v38 = vsel %vm3595_vm14, %v3274_v47, %v5894_v4  ;;  %v3550_v7 = vmax.f32 %v3548_v8, %v3549_v17  ;;  %v3436_v23 = vsel %vm3190_vm11, %v3115_v27, -inf  ;;  %v5958_v27 = vpop.permute.xlu0 %2244 }
 0x740   :  { %v3160_v49 = vrot.slane %v3159_v14, 1  ;;  %v3217_v37 = vrot.slane %v3216_v42, 1  ;;  %v3495_v40 = vrot.slane %v3494_v5, 2  ;;  %v3382_v12 = vmax.f32 %v3380_v46, %v3381_v26  ;;  %v5971_v17 = vpop.permute.xlu1 %2413 }
 0x741   :  { %v3652_v52 = vsel %vm3595_vm14, %v3330_v24, %v5898_v13  ;;  %v3551_v0 = vrot.slane %v3550_v7, 2  ;;  %v3437_v19 = vrot.slane %v3436_v23, 4  ;;  %v3118_v44 = vadd.f32 %v5842_v53, %v5771_v32 }
 0x742   :  { %v3161_v1 = vmax.f32 %v3159_v14, %v3160_v49  ;;  %v3218_v4 = vmax.f32 %v3216_v42, %v3217_v37  ;;  %v3496_v30 = vmax.f32 %v3494_v5, %v3495_v40  ;;  %v3383_v63 = vrot.slane %v3382_v12, 2 }
 0x743   :  { %v3552_v9 = vmax.f32 %v3550_v7, %v3551_v0  ;;  %v3438_v33 = vmax.f32 %v3436_v23, %v3437_v19  ;;  %v3275_v10 = vsel %vm3133_vm10, %v3118_v44, -inf  ;;  %v3331_v45 = vsel %vm3190_vm11, %v3118_v44, -inf  ;;  %v5983_v37 = vpop.permute.xlu0 %2582 }
 0x744   :  { %v5962_v13 = vsel %vm3595_vm14, %v3161_v1, %v5902_v58  ;;  %v5966_v31 = vsel %vm3595_vm14, %v3218_v4, %v5907_v55  ;;  %v3497_v53 = vrot.slane %v3496_v30, 1  ;;  %v3384_v34 = vmax.f32 %v3382_v12, %v3383_v63 }
 0x745   :  { %v3553_v57 = vrot.slane %v3552_v9, 1  ;;  %v3439_v8 = vrot.slane %v3438_v33, 2  ;;  %v3276_v59 = vrot.slane %v3275_v10, 4  ;;  %v3332_v48 = vrot.slane %v3331_v45, 4 }
 0x746   :  { %v3498_v21 = vmax.f32 %v3496_v30, %v3497_v53  ;;  %v3385_v47 = vrot.slane %v3384_v34, 1  ;;  %v3117_v60 = vadd.f32 %v5771_v32, %v5846_v15  ;;  %4329 = vtanh.f32 %v5814_v35  ;;  %v2078_v30 = vpop.permute.xlu1 %2077 }
 0x747   :  { %v3554_v58 = vmax.f32 %v3552_v9, %v3553_v57  ;;  %v3440_v46 = vmax.f32 %v3438_v33, %v3439_v8  ;;  %v3277_v14 = vmax.f32 %v3275_v10, %v3276_v59  ;;  %v3333_v55 = vmax.f32 %v3331_v45, %v3332_v48  ;;  %v2247_v53 = vpop.permute.xlu0 %2246 }
 0x748   :  { %v5975_v42 = vsel %vm3595_vm14, %v3498_v21, %v5918_v11  ;;  %v3386_v5 = vmax.f32 %v3384_v34, %v3385_v47  ;;  %v3162_v26 = vsel %vm3133_vm10, %v3117_v60, -inf  ;;  %v3219_v24 = vsel %vm3190_vm11, %v3117_v60, -inf }
 0x749   :  { %v5981_v15 = vsel %vm3595_vm14, %v3554_v58, %v5924_v29  ;;  %v3441_v7 = vrot.slane %v3440_v46, 1  ;;  %v3278_v23 = vrot.slane %v3277_v14, 2  ;;  %v3334_v49 = vrot.slane %v3333_v55, 2 }
 0x74a   :  { %v5987_v40 = vsel %vm3595_vm14, %v3386_v5, %v5928_v61  ;;  %v3163_v11 = vrot.slane %v3162_v26, 4  ;;  %v3220_v12 = vrot.slane %v3219_v24, 4  ;;  %vm3599_vm12 = vcmask 1045509  }
 0x74b   :  { %v3442_v0 = vmax.f32 %v3440_v46, %v3441_v7  ;;  %v3279_v19 = vmax.f32 %v3277_v14, %v3278_v23  ;;  %v3335_v44 = vmax.f32 %v3333_v55, %v3334_v49  ;;  %v6664_v55 = vld [vmem:[#allocation17_spill] sm:$0xff]  ;;  %v4360_v23 = vld [vmem:[%s6413_s2 + $0x18] sm:$0xff] }
 0x74c   :  { %v3164_v1 = vmax.f32 %v3162_v26, %v3163_v11  ;;  %v3221_v4 = vmax.f32 %v3219_v24, %v3220_v12  ;;  %v2655_v5 = vsel %vm679_vm1, %v6664_v55, %v5880_v2 }
 0x74d   :  { %v5991_v29 = vsel %vm3595_vm14, %v3442_v0, %v5940_v25  ;;  %v3280_v63 = vrot.slane %v3279_v19, 1  ;;  %v3336_v9 = vrot.slane %v3335_v44, 1  ;;  %v2416_v25 = vpop.permute.xlu1 %2415  ;;  %v2688_v24 = vsel %vm2668_vm6, %v2655_v5, %v5708_v3 }
 0x74e   :  { %v3165_v33 = vrot.slane %v3164_v1, 2  ;;  %v3222_v10 = vrot.slane %v3221_v4, 2  ;;  %v2658_v3 = vsel %vm679_vm1, %v5728_v56, %v2078_v30 }
 0x74f   :  { %v3281_v45 = vmax.f32 %v3279_v19, %v3280_v63  ;;  %v3337_v61 = vmax.f32 %v3335_v44, %v3336_v9 }
 0x750   :  { %v4330_v34 = vpop.eup %4329  ;;  %v3166_v57 = vmax.f32 %v3164_v1, %v3165_v33  ;;  %v3223_v8 = vmax.f32 %v3221_v4, %v3222_v10 }
 0x751   :  { %v1529_v59 = vmul.f32 %v4330_v34, %v5816_v36  ;;  %v5995_v48 = vsel %vm3597_vm15, %v3337_v61, %v3652_v52  ;;  %v5999_v60 = vsel %vm3597_vm15, %v3281_v45, %v5947_v38  ;;  %v4358_v36 = vld [vmem:[%s6413_s2 + $0x8] sm:$0xff]  ;;  %v2585_v38 = vpop.permute.xlu0 %2584  ;;  %v4359_v52 = vld [vmem:[%s6413_s2 + $0x10] sm:$0xff]  ;;  %v2080_v7 = vpop.permute.xlu1 %2079 }
 0x752   :  { %v3167_v21 = vrot.slane %v3166_v57, 1  ;;  %v3224_v47 = vrot.slane %v3223_v8, 1 }
 0x753   :  { %v1530_v58 = vmax.f32 %v1529_v59, 0.0  ;;  %4076 = vmatprep.subr.mxu1 %v1529_v59 }
 0x754   :  { %v3168_v46 = vmax.f32 %v3166_v57, %v3167_v21  ;;  %v3225_v14 = vmax.f32 %v3223_v8, %v3224_v47  ;;  %4077 = vmatpush3.msra.mxu1 %v1529_v59 }
 0x755   :  { %1532 = vst.msk [vmem:[#allocation5 + $0x30] sm:$0xff] %vm33_vm0, %v1530_v58  ;;  %4079 = vmatmul.mubr.msk.f32.vlgmr.msra.gmra.mrb[12].mxu1 %vm679_vm1, %v4358_v36  ;;  %4181 = vmatprep.subr.bf16.mxu1 %v5496_v41 }
 0x756   :  { %4184 = vmatpush3.bf16.msra.mxu1 %v5496_v41  ;;  %4081 = vmatprep.mubr.msk.f32.mxu1 %vm679_vm1, %v4359_v52  ;;  %v6017_v2 = vsel %vm3597_vm15, %v3225_v14, %v5966_v31  ;;  %v6021_v26 = vsel %vm3597_vm15, %v3168_v46, %v5962_v13  ;;  %v2656_v41 = vsel %vm679_vm1, %v5712_v62, %v5912_v43  ;;  %v4361_v31 = vld [vmem:[%s6416_s4 + $0x20] sm:$0xff] }
 0x757   :  { %4182 = vmatprep.subr.bf16.mxu1 %v5500_v51  ;;  %v2657_v13 = vsel %vm679_vm1, %v5716_v16, %v5950_v18  ;;  %v2721_v62 = vsel %vm2701_vm7, %v2688_v24, %v5890_v20  ;;  %v2689_v43 = vsel %vm2668_vm6, %v2656_v41, %v5920_v50  ;;  %v2249_v16 = vpop.permute.xlu0 %2248  ;;  %v2691_v20 = vsel %vm2668_vm6, %v2658_v3, %v2247_v53 }
 0x758   :  { %v2659_v50 = vsel %vm679_vm1, %v5740_v54, %v2080_v7  ;;  %v2754_v49 = vsel %vm2734_vm8, %v2721_v62, %v5710_v28  ;;  %v2724_v11 = vsel %vm2701_vm7, %v2691_v20, %v2416_v25 }
 0x759   :  { %4082 = vmatmul.mubr.msk.f32.gmra.mrb[14].mxu1 %vm679_vm1, %v4360_v23  ;;  %v2692_v12 = vsel %vm2668_vm6, %v2659_v50, %v2249_v16  ;;  %v2757_v54 = vsel %vm2734_vm8, %v2724_v11, %v2585_v38 }
 0x75a   :  { %4185 = vmatpush3.bf16.msra.mxu1 %v5500_v51  ;;  %4121 = vmatprep.mubr.msk.f32.mxu1 %vm2772_vm9, %v5623_v39  ;;  %v2722_v51 = vsel %vm2701_vm7, %v2689_v43, %v5934_v6  ;;  %v2690_v39 = vsel %vm2668_vm6, %v2657_v13, %v5958_v27  ;;  %v2418_v6 = vpop.permute.xlu1 %2417 }
 0x75b   :  { %4183 = vmatprep.subr.mxu1 %v4361_v31  ;;  %v2723_v56 = vsel %vm2701_vm7, %v2690_v39, %v5971_v17  ;;  %v2755_v27 = vsel %vm2734_vm8, %v2722_v51, %v5943_v22  ;;  %v2725_v28 = vsel %vm2701_vm7, %v2692_v12, %v2418_v6  ;;  %v2587_v0 = vpop.permute.xlu0 %2586 }
 0x75c   :  { %v1662_v18 = vld [vmem:[#allocation5 + $0x30] sm:$0xff]  ;;  %v2756_v17 = vsel %vm2734_vm8, %v2723_v56, %v5983_v37  ;;  %v2758_v22 = vsel %vm2734_vm8, %v2725_v28, %v2587_v0  ;;  %v1535_v56 = vld [vmem:[#allocation4 + $0xe8] sm:$0xff] }
 0x75d   :  { %1856 = vxpose.xlu0.b32.start.end [1/1] (short) (narrow) %v1662_v18, 40 }
 0x75e   :  { %4186 = vmatpush3.msra.mxu1 %v4361_v31 }
 0x75f   :  { %4122 = vmatmul.mubr.msk.f32.vlgmr.msra.gmra.mrb[16].mxu1 %vm2772_vm9, %v2754_v49  ;;  %v1534_v49 = vld [vmem:[#allocation4 + $0xe0] sm:$0xff] }
 0x760   :  { %4124 = vmatprep.mubr.msk.f32.mxu1 %vm2772_vm9, %v2755_v27 }
 0x763   :  { %4125 = vmatmul.mubr.msk.f32.gmra.mrb[18].mxu1 %vm2772_vm9, %v2756_v17 }
 0x764   :  { %4127 = vmatprep.mubr.msk.f32.mxu1 %vm2772_vm9, %v2757_v54  ;;  %v1536_v54 = vld [vmem:[#allocation4 + $0xf0] sm:$0xff] }
 0x767   :  { %4128 = vmatmul.mubr.msk.f32.gmra.mrb[20].mxu1 %vm2772_vm9, %v2758_v22 }
 0x7dd   :  { %v6073_v19 = vpop.trf.xlu0 }
 0x7de   :  { %v2015_v37 = vrot.slane %v6073_v19, 1  ;;  %v2184_v44 = vrot.slane %v6073_v19, 2  ;;  %v2353_v4 = vrot.slane %v6073_v19, 3  ;;  %v2522_v30 = vrot.slane %v6073_v19, 4 }
 0x7e1   :  { %v6077_v1 = vpop.trf.xlu0 }
 0x7e2   :  { %v2016_v63 = vrot.slane %v6077_v1, 1  ;;  %v2185_v9 = vrot.slane %v6077_v1, 2  ;;  %v2354_v33 = vrot.slane %v6077_v1, 3  ;;  %v2523_v10 = vrot.slane %v6077_v1, 4 }
 0x7e4   :  { %v2017_v45 = vsel %vm1960_vm2, %v2015_v37, %v2016_v63  ;;  %v2186_v61 = vsel %vm2129_vm3, %v2184_v44, %v2185_v9  ;;  %v2355_v34 = vsel %vm2298_vm4, %v2353_v4, %v2354_v33  ;;  %v2524_v57 = vsel %vm2467_vm5, %v2522_v30, %v2523_v10  ;;  %v1537_v37 = vld [vmem:[#allocation4 + $0xf8] sm:$0xff] }
 0x7e5   :  { %2081 = vrot.lane.b32.xlu1 %v2017_v45, %s4369_s28  ;;  %2250 = vrot.lane.b32.xlu0 %v2186_v61, %s4370_s1  ;;  %v6089_v53 = vpop.trf.xlu0 }
 0x7e6   :  { %v2018_v8 = vrot.slane %v6089_v53, 1  ;;  %v2187_v59 = vrot.slane %v6089_v53, 2  ;;  %v2356_v25 = vrot.slane %v6089_v53, 3  ;;  %v2525_v58 = vrot.slane %v6089_v53, 4 }
 0x7e8   :  { %v2019_v21 = vsel %vm1960_vm2, %v2016_v63, %v2018_v8  ;;  %v2188_v47 = vsel %vm2129_vm3, %v2185_v9, %v2187_v59  ;;  %v2357_v14 = vsel %vm2298_vm4, %v2354_v33, %v2356_v25  ;;  %v2526_v55 = vsel %vm2467_vm5, %v2523_v10, %v2525_v58 }
 0x7e9   :  { %2419 = vrot.lane.b32.xlu1 %v2355_v34, %s4371_s29  ;;  %2588 = vrot.lane.b32.xlu0 %v2524_v57, %s4372_s3  ;;  %v6101_v46 = vpop.trf.xlu0 }
 0x7ea   :  { %v2020_v5 = vrot.slane %v6101_v46, 1  ;;  %v2189_v36 = vrot.slane %v6101_v46, 2  ;;  %v2358_v24 = vrot.slane %v6101_v46, 3  ;;  %v2527_v41 = vrot.slane %v6101_v46, 4 }
 0x7ec   :  { %v2021_v38 = vsel %vm1960_vm2, %v2018_v8, %v2020_v5  ;;  %v2190_v52 = vsel %vm2129_vm3, %v2187_v59, %v2189_v36  ;;  %v2359_v3 = vsel %vm2298_vm4, %v2356_v25, %v2358_v24  ;;  %v2528_v62 = vsel %vm2467_vm5, %v2525_v58, %v2527_v41 }
 0x7ed   :  { %2083 = vrot.lane.b32.xlu1 %v2019_v21, %s4369_s28  ;;  %2252 = vrot.lane.b32.xlu0 %v2188_v47, %s4370_s1  ;;  %v1876_v7 = vpop.trf.xlu0 }
 0x7ee   :  { %v2022_v23 = vrot.slane %v1876_v7, 1  ;;  %v2191_v13 = vrot.slane %v1876_v7, 2  ;;  %v2360_v43 = vrot.slane %v1876_v7, 3  ;;  %v2529_v31 = vrot.slane %v1876_v7, 4 }
 0x7f0   :  { %v2023_v16 = vsel %vm1960_vm2, %v2020_v5, %v2022_v23  ;;  %v2192_v51 = vsel %vm2129_vm3, %v2189_v36, %v2191_v13  ;;  %v2361_v39 = vsel %vm2298_vm4, %v2358_v24, %v2360_v43  ;;  %v2530_v18 = vsel %vm2467_vm5, %v2527_v41, %v2529_v31 }
 0x7f1   :  { %2421 = vrot.lane.b32.xlu1 %v2357_v14, %s4371_s29  ;;  %2590 = vrot.lane.b32.xlu0 %v2526_v55, %s4372_s3 }
 0x7f5   :  { %2085 = vrot.lane.b32.xlu1 %v2021_v38, %s4369_s28  ;;  %2254 = vrot.lane.b32.xlu0 %v2190_v52, %s4370_s1 }
 0x7f9   :  { %2423 = vrot.lane.b32.xlu1 %v2359_v3, %s4371_s29  ;;  %2592 = vrot.lane.b32.xlu0 %v2528_v62, %s4372_s3 }
 0x7fd   :  { %2087 = vrot.lane.b32.xlu1 %v2023_v16, %s4369_s28  ;;  %2256 = vrot.lane.b32.xlu0 %v2192_v51, %s4370_s1 }
 0x801   :  { %2425 = vrot.lane.b32.xlu1 %v2361_v39, %s4371_s29  ;;  %2594 = vrot.lane.b32.xlu0 %v2530_v18, %s4372_s3 }
 0x828   :  { %v4080_v20 = vpop.f32.mrb[12].mxu1 }
 0x829   :  { %v1624_v50 = vadd.f32 %v4080_v20, %v1535_v56  ;;  %v1604_v11 = vpop.f32.mrb[13].mxu1 }
 0x82a   :  { %v1623_v6 = vadd.f32 %v1604_v11, %v1534_v49 }
 0x82b   :  { %v3896_v27 = vmul.f32 -1.442695, %v1624_v50 }
 0x82c   :  { %v3895_v17 = vmul.f32 -1.442695, %v1623_v6  ;;  %v4083_v12 = vpop.f32.mrb[14].mxu1 }
 0x82d   :  { %4331 = vpow2.f32 %v3896_v27  ;;  %v1614_v28 = vpop.f32.mrb[15].mxu1  ;;  %v1626_v4 = vadd.f32 %v4083_v12, %v1537_v37 }
 0x82e   :  { %4333 = vpow2.f32 %v3895_v17  ;;  %v1625_v0 = vadd.f32 %v1614_v28, %v1536_v54 }
 0x830   :  { %v3897_v22 = vmul.f32 -1.442695, %v1625_v0 }
 0x832   :  { %4335 = vpow2.f32 %v3897_v22  ;;  %v4123_v44 = vpop.f32.mrb[16].mxu1 }
 0x833   :  { %v3120_v30 = vadd.f32 %v4123_v44, %v5771_v32  ;;  %v3025_v63 = vpop.f32.mrb[17].mxu1  ;;  %4337 = vtanh.f32 %v1626_v4 }
 0x834   :  { %v3119_v9 = vadd.f32 %v5771_v32, %v3025_v63 }
 0x835   :  { %v3499_v33 = vsel %vm3133_vm10, %v3120_v30, -inf  ;;  %v3555_v10 = vsel %vm3190_vm11, %v3120_v30, -inf }
 0x836   :  { %v3500_v45 = vrot.slane %v3499_v33, 4  ;;  %v3556_v61 = vrot.slane %v3555_v10, 4  ;;  %v3387_v34 = vsel %vm3133_vm10, %v3119_v9, -inf  ;;  %v3443_v57 = vsel %vm3190_vm11, %v3119_v9, -inf  ;;  %v4126_v8 = vpop.f32.mrb[18].mxu1 }
 0x837   :  { %v4332_v59 = vpop.eup %4331  ;;  %v3388_v21 = vrot.slane %v3387_v34, 4  ;;  %v3444_v47 = vrot.slane %v3443_v57, 4  ;;  %v3122_v25 = vadd.f32 %v4126_v8, %v5771_v32  ;;  %v3035_v58 = vpop.f32.mrb[19].mxu1  ;;  %v6144_v8 = vld [vmem:[%s6417_s5] ss:$0 sm:$0xff] }
 0x838   :  { %v4334_v14 = vpop.eup %4333  ;;  %v1637_v55 = vadd.f32 1.0, %v4332_v59  ;;  %v3501_v5 = vmax.f32 %v3499_v33, %v3500_v45  ;;  %v3557_v36 = vmax.f32 %v3555_v10, %v3556_v61  ;;  %v3121_v38 = vadd.f32 %v5771_v32, %v3035_v58 }
 0x839   :  { %v1636_v52 = vadd.f32 1.0, %v4334_v14  ;;  %v3389_v24 = vmax.f32 %v3387_v34, %v3388_v21  ;;  %v3445_v41 = vmax.f32 %v3443_v57, %v3444_v47  ;;  %v3282_v7 = vsel %vm3133_vm10, %v3122_v25, -inf }
 0x83a   :  { %4339 = vrcp.f32 %v1637_v55  ;;  %v3502_v23 = vrot.slane %v3501_v5, 2  ;;  %v3558_v13 = vrot.slane %v3557_v36, 2  ;;  %v3283_v3 = vrot.slane %v3282_v7, 4  ;;  %v4129_v62 = vpop.f32.mrb[20].mxu1 }
 0x83b   :  { %4341 = vrcp.f32 %v1636_v52  ;;  %v3390_v43 = vrot.slane %v3389_v24, 2  ;;  %v3446_v31 = vrot.slane %v3445_v41, 2  ;;  %v3338_v16 = vsel %vm3190_vm11, %v3122_v25, -inf  ;;  %v3045_v51 = vpop.f32.mrb[21].mxu1 }
 0x83c   :  { %v4336_v39 = vpop.eup %4335  ;;  %v3503_v18 = vmax.f32 %v3501_v5, %v3502_v23  ;;  %v3559_v56 = vmax.f32 %v3557_v36, %v3558_v13  ;;  %v3284_v32 = vmax.f32 %v3282_v7, %v3283_v3  ;;  %v3339_v20 = vrot.slane %v3338_v16, 4 }
 0x83d   :  { %v1638_v50 = vadd.f32 1.0, %v4336_v39  ;;  %v3391_v49 = vmax.f32 %v3389_v24, %v3390_v43  ;;  %v3447_v11 = vmax.f32 %v3445_v41, %v3446_v31  ;;  %v3169_v6 = vsel %vm3133_vm10, %v3121_v38, -inf  ;;  %v4338_v63 = vpop.eup %4337 }
 0x83e   :  { %v3504_v27 = vrot.slane %v3503_v18, 1  ;;  %v3560_v17 = vrot.slane %v3559_v56, 1  ;;  %v3285_v12 = vrot.slane %v3284_v32, 2  ;;  %v3340_v54 = vmax.f32 %v3338_v16, %v3339_v20 }
 0x83f   :  { %4343 = vrcp.f32 %v1638_v50  ;;  %v3392_v28 = vrot.slane %v3391_v49, 1  ;;  %v3448_v0 = vrot.slane %v3447_v11, 1  ;;  %v3170_v22 = vrot.slane %v3169_v6, 4 }
 0x840   :  { %v3505_v37 = vmax.f32 %v3503_v18, %v3504_v27  ;;  %v3561_v44 = vmax.f32 %v3559_v56, %v3560_v17  ;;  %v3286_v4 = vmax.f32 %v3284_v32, %v3285_v12  ;;  %v3341_v30 = vrot.slane %v3340_v54, 2 }
 0x841   :  { %v3393_v9 = vmax.f32 %v3391_v49, %v3392_v28  ;;  %v3449_v33 = vmax.f32 %v3447_v11, %v3448_v0  ;;  %v3171_v10 = vmax.f32 %v3169_v6, %v3170_v22  ;;  %v3226_v45 = vsel %vm3190_vm11, %v3121_v38, -inf }
 0x842   :  { %v3287_v61 = vrot.slane %v3286_v4, 1  ;;  %v3342_v34 = vmax.f32 %v3340_v54, %v3341_v30  ;;  %v3227_v57 = vrot.slane %v3226_v45, 4  ;;  %v3124_v59 = vadd.f32 %v6144_v8, %v4129_v62 }
 0x843   :  { %v3172_v21 = vrot.slane %v3171_v10, 2  ;;  %v3123_v47 = vadd.f32 %v6144_v8, %v3045_v51  ;;  %v3689_v25 = vsel %vm3597_vm15, %v3449_v33, %v5991_v29  ;;  %v3671_v58 = vsel %vm3597_vm15, %v3393_v9, %v5987_v40 }
 0x844   :  { %v4340_v14 = vpop.eup %4339  ;;  %v3288_v55 = vmax.f32 %v3286_v4, %v3287_v61  ;;  %v3343_v5 = vrot.slane %v3342_v34, 1  ;;  %v3228_v36 = vmax.f32 %v3226_v45, %v3227_v57  ;;  %v3506_v38 = vsel %vm3133_vm10, %v3124_v59, -inf }
 0x845   :  { %v4342_v52 = vpop.eup %4341  ;;  %v1646_v24 = vmul.f32 %v4340_v14, %v5814_v35  ;;  %v3173_v41 = vmax.f32 %v3171_v10, %v3172_v21  ;;  %v3507_v7 = vrot.slane %v3506_v38, 4  ;;  %v3562_v23 = vsel %vm3190_vm11, %v3124_v59, -inf }
 0x846   :  { %v1647_v13 = vmul.f32 %v4342_v52, %v4338_v63  ;;  %v3344_v3 = vmax.f32 %v3342_v34, %v3343_v5  ;;  %v3229_v62 = vrot.slane %v3228_v36, 2  ;;  %v3563_v29 = vrot.slane %v3562_v23, 4 }
 0x847   :  { %v3174_v43 = vrot.slane %v3173_v41, 1  ;;  %v3508_v31 = vmax.f32 %v3506_v38, %v3507_v7  ;;  %v3394_v40 = vsel %vm3133_vm10, %v3123_v47, -inf  ;;  %v3450_v16 = vsel %vm3190_vm11, %v3123_v47, -inf }
 0x848   :  { %v1648_v51 = vadd.f32 %v1647_v13, %v1646_v24  ;;  %v3230_v39 = vmax.f32 %v3228_v36, %v3229_v62  ;;  %v3564_v18 = vmax.f32 %v3562_v23, %v3563_v29  ;;  %v3395_v56 = vrot.slane %v3394_v40, 4 }
 0x849   :  { %v4344_v32 = vpop.eup %4343  ;;  %v3175_v35 = vmax.f32 %v3173_v41, %v3174_v43  ;;  %v3509_v20 = vrot.slane %v3508_v31, 2  ;;  %v3451_v50 = vrot.slane %v3450_v16, 4  ;;  %v6159_v49 = vsel %vm3599_vm12, %v3344_v3, %v5995_v48 }
 0x84a   :  { %4345 = vtanh.f32 %v1648_v51  ;;  %1655 = vst.msk [vmem:[#allocation3] sm:$0xff] %vm33_vm0, %v1648_v51  ;;  %v3231_v11 = vrot.slane %v3230_v39, 1  ;;  %v3565_v6 = vrot.slane %v3564_v18, 2  ;;  %v3396_v27 = vmax.f32 %v3394_v40, %v3395_v56 }
 0x84b   :  { %v3510_v17 = vmax.f32 %v3508_v31, %v3509_v20  ;;  %v3452_v12 = vmax.f32 %v3450_v16, %v3451_v50  ;;  %v6164_v54 = vsel %vm3599_vm12, %v3288_v55, %v5999_v60  ;;  %v3725_v28 = vsel %vm3597_vm15, %v3561_v44, %v5981_v15 }
 0x84c   :  { %v3232_v0 = vmax.f32 %v3230_v39, %v3231_v11  ;;  %v3566_v22 = vmax.f32 %v3564_v18, %v3565_v6  ;;  %v3397_v4 = vrot.slane %v3396_v27, 2  ;;  %v3707_v48 = vsel %vm3597_vm15, %v3505_v37, %v5975_v42 }
 0x84d   :  { %v3511_v30 = vrot.slane %v3510_v17, 1  ;;  %v3453_v63 = vrot.slane %v3452_v12, 2  ;;  %v6172_v9 = vsel %vm3599_vm12, %v3175_v35, %v6021_v26 }
 0x84e   :  { %v3567_v33 = vrot.slane %v3566_v22, 1  ;;  %v3398_v10 = vmax.f32 %v3396_v27, %v3397_v4  ;;  %v6176_v60 = vsel %vm3599_vm12, %v3232_v0, %v6017_v2 }
 0x84f   :  { %v3512_v45 = vmax.f32 %v3510_v17, %v3511_v30  ;;  %v3454_v15 = vmax.f32 %v3452_v12, %v3453_v63 }
 0x850   :  { %v3568_v44 = vmax.f32 %v3566_v22, %v3567_v33  ;;  %v3399_v61 = vrot.slane %v3398_v10, 1 }
 0x851   :  { %v3455_v34 = vrot.slane %v3454_v15, 1  ;;  %v6179_v57 = vsel %vm3599_vm12, %v3512_v45, %v3707_v48 }
 0x852   :  { %v3400_v42 = vmax.f32 %v3398_v10, %v3399_v61  ;;  %v6182_v37 = vsel %vm3599_vm12, %v3568_v44, %v3725_v28 }
 0x853   :  { %v3456_v26 = vmax.f32 %v3454_v15, %v3455_v34 }
 0x854   :  { %v4346_v59 = vpop.eup %4345  ;;  %v6185_v21 = vsel %vm3599_vm12, %v3400_v42, %v3671_v58 }
 0x855   :  { %v1650_v47 = vmul.f32 %v4346_v59, %v4344_v32  ;;  %v6188_v2 = vsel %vm3599_vm12, %v3456_v26, %v3689_v25 }
 0x857   :  { %v1651_v14 = vmax.f32 %v1650_v47, 0.0  ;;  %1654 = vst.msk [vmem:[#allocation2] sm:$0xff] %vm33_vm0, %v1650_v47  ;;  %v2082_v55 = vpop.permute.xlu1 %2081  ;;  %v2251_v5 = vpop.permute.xlu0 %2250 }
 0x858   :  { %v2660_v36 = vsel %vm679_vm1, %v6073_v19, %v2082_v55 }
 0x859   :  { %1653 = vst.msk [vmem:[#allocation5 + $0x38] sm:$0xff] %vm33_vm0, %v1651_v14  ;;  %v2693_v38 = vsel %vm2668_vm6, %v2660_v36, %v2251_v5  ;;  %vm3601_vm0 = vcmask 1046534  }
 0x85b   :  { %v2420_v52 = vpop.permute.xlu1 %2419  ;;  %v2589_v24 = vpop.permute.xlu0 %2588 }
 0x85c   :  { %v2726_v58 = vsel %vm2701_vm7, %v2693_v38, %v2420_v52 }
 0x85d   :  { %v2759_v41 = vsel %vm2734_vm8, %v2726_v58, %v2589_v24 }
 0x85e   :  { %4130 = vmatprep.mubr.msk.f32.mxu1 %vm2772_vm9, %v2759_v41 }
 0x85f   :  { %v2084_v25 = vpop.permute.xlu1 %2083  ;;  %v2253_v7 = vpop.permute.xlu0 %2252 }
 0x860   :  { %v2661_v23 = vsel %vm679_vm1, %v6077_v1, %v2084_v25  ;;  %v1663_v13 = vld [vmem:[#allocation5 + $0x38] sm:$0xff] }
 0x861   :  { %1888 = vxpose.xlu1.b32.start.end [1/1] (short) (narrow) %v1663_v13, 40  ;;  %v2694_v19 = vsel %vm2668_vm6, %v2661_v23, %v2253_v7 }
 0x863   :  { %v2422_v3 = vpop.permute.xlu1 %2421  ;;  %v2591_v62 = vpop.permute.xlu0 %2590 }
 0x864   :  { %v2727_v29 = vsel %vm2701_vm7, %v2694_v19, %v2422_v3 }
 0x865   :  { %v2760_v43 = vsel %vm2734_vm8, %v2727_v29, %v2591_v62 }
 0x866   :  { %4131 = vmatmul.mubr.msk.f32.gmra.mrb[22].mxu1 %vm2772_vm9, %v2760_v43 }
 0x867   :  { %v2086_v31 = vpop.permute.xlu1 %2085  ;;  %v2255_v40 = vpop.permute.xlu0 %2254 }
 0x868   :  { %v2662_v16 = vsel %vm679_vm1, %v6089_v53, %v2086_v31 }
 0x869   :  { %v2695_v51 = vsel %vm2668_vm6, %v2662_v16, %v2255_v40 }
 0x86b   :  { %v2424_v1 = vpop.permute.xlu1 %2423  ;;  %v2593_v39 = vpop.permute.xlu0 %2592 }
 0x86c   :  { %v2728_v18 = vsel %vm2701_vm7, %v2695_v51, %v2424_v1 }
 0x86d   :  { %v2761_v56 = vsel %vm2734_vm8, %v2728_v18, %v2593_v39 }
 0x86e   :  { %4133 = vmatprep.mubr.msk.f32.mxu1 %vm2772_vm9, %v2761_v56 }
 0x86f   :  { %v2088_v32 = vpop.permute.xlu1 %2087  ;;  %v2257_v35 = vpop.permute.xlu0 %2256 }
 0x870   :  { %v2663_v20 = vsel %vm679_vm1, %v6101_v46, %v2088_v32 }
 0x871   :  { %v2696_v50 = vsel %vm2668_vm6, %v2663_v20, %v2257_v35 }
 0x873   :  { %v2426_v11 = vpop.permute.xlu1 %2425  ;;  %v2595_v6 = vpop.permute.xlu0 %2594 }
 0x874   :  { %v2729_v53 = vsel %vm2701_vm7, %v2696_v50, %v2426_v11 }
 0x875   :  { %v2762_v27 = vsel %vm2734_vm8, %v2729_v53, %v2595_v6 }
 0x876   :  { %4134 = vmatmul.mubr.msk.f32.gmra.mrb[24].mxu1 %vm2772_vm9, %v2762_v27 }
 0x8e1   :  { %v6216_v17 = vpop.trf.xlu1 }
 0x8e2   :  { %v2193_v28 = vrot.slane %v6216_v17, 2  ;;  %v2024_v46 = vrot.slane %v6216_v17, 1  ;;  %v2362_v10 = vrot.slane %v6216_v17, 3  ;;  %v2531_v45 = vrot.slane %v6216_v17, 4 }
 0x8e5   :  { %v6218_v12 = vpop.trf.xlu1 }
 0x8e6   :  { %v2194_v0 = vrot.slane %v6218_v12, 2  ;;  %v2025_v22 = vrot.slane %v6218_v12, 1  ;;  %v2363_v30 = vrot.slane %v6218_v12, 3  ;;  %v2532_v63 = vrot.slane %v6218_v12, 4 }
 0x8e8   :  { %v2195_v4 = vsel %vm2129_vm3, %v2193_v28, %v2194_v0  ;;  %v2026_v48 = vsel %vm1960_vm2, %v2024_v46, %v2025_v22  ;;  %v2364_v15 = vsel %vm2298_vm4, %v2362_v10, %v2363_v30  ;;  %v2533_v44 = vsel %vm2467_vm5, %v2531_v45, %v2532_v63 }
 0x8e9   :  { %2258 = vrot.lane.b32.xlu0 %v2195_v4, %s4370_s1  ;;  %2089 = vrot.lane.b32.xlu1 %v2026_v48, %s4369_s28  ;;  %v6230_v33 = vpop.trf.xlu1 }
 0x8ea   :  { %v2365_v61 = vrot.slane %v6230_v33, 3  ;;  %v2027_v34 = vrot.slane %v6230_v33, 1  ;;  %v2196_v47 = vrot.slane %v6230_v33, 2  ;;  %v2534_v52 = vrot.slane %v6230_v33, 4 }
 0x8ec   :  { %v2366_v26 = vsel %vm2298_vm4, %v2363_v30, %v2365_v61  ;;  %v2028_v59 = vsel %vm1960_vm2, %v2025_v22, %v2027_v34  ;;  %v2197_v5 = vsel %vm2129_vm3, %v2194_v0, %v2196_v47  ;;  %v2535_v58 = vsel %vm2467_vm5, %v2532_v63, %v2534_v52 }
 0x8ed   :  { %2427 = vrot.lane.b32.xlu0 %v2364_v15, %s4371_s29  ;;  %2596 = vrot.lane.b32.xlu1 %v2533_v44, %s4372_s3  ;;  %v6240_v42 = vpop.trf.xlu1 }
 0x8ee   :  { %v2029_v14 = vrot.slane %v6240_v42, 1  ;;  %v2198_v25 = vrot.slane %v6240_v42, 2  ;;  %v2367_v19 = vrot.slane %v6240_v42, 3  ;;  %v2536_v43 = vrot.slane %v6240_v42, 4 }
 0x8f0   :  { %v2030_v36 = vsel %vm1960_vm2, %v2027_v34, %v2029_v14  ;;  %v2199_v23 = vsel %vm2129_vm3, %v2196_v47, %v2198_v25  ;;  %v2368_v62 = vsel %vm2298_vm4, %v2365_v61, %v2367_v19  ;;  %v2537_v31 = vsel %vm2467_vm5, %v2534_v52, %v2536_v43 }
 0x8f1   :  { %2429 = vrot.lane.b32.xlu0 %v2366_v26, %s4371_s29  ;;  %2091 = vrot.lane.b32.xlu1 %v2028_v59, %s4369_s28  ;;  %v1908_v55 = vpop.trf.xlu1 }
 0x8f2   :  { %v2031_v38 = vrot.slane %v1908_v55, 1  ;;  %v2200_v24 = vrot.slane %v1908_v55, 2  ;;  %v2369_v7 = vrot.slane %v1908_v55, 3  ;;  %v2538_v3 = vrot.slane %v1908_v55, 4 }
 0x8f4   :  { %v2032_v41 = vsel %vm1960_vm2, %v2029_v14, %v2031_v38  ;;  %v2201_v13 = vsel %vm2129_vm3, %v2198_v25, %v2200_v24  ;;  %v2370_v29 = vsel %vm2298_vm4, %v2367_v19, %v2369_v7  ;;  %v2539_v40 = vsel %vm2467_vm5, %v2536_v43, %v2538_v3 }
 0x8f5   :  { %2260 = vrot.lane.b32.xlu1 %v2197_v5, %s4370_s1  ;;  %2093 = vrot.lane.b32.xlu0 %v2030_v36, %s4369_s28  ;;  %vm3603_vm2 = vcmask 1047559   ;;  %vm4374_vm3 = vmmov 0   ;;  %vm3737_vm4 = vcmask 392192   ;;  %vm3739_vm5 = vcmask 457728  }
 0x8f9   :  { %2598 = vrot.lane.b32.xlu1 %v2535_v58, %s4372_s3  ;;  %2095 = vrot.lane.b32.xlu0 %v2032_v41, %s4369_s28 }
 0x8fd   :  { %2262 = vrot.lane.b32.xlu1 %v2199_v23, %s4370_s1  ;;  %2264 = vrot.lane.b32.xlu0 %v2201_v13, %s4370_s1 }
 0x901   :  { %2431 = vrot.lane.b32.xlu1 %v2368_v62, %s4371_s29  ;;  %2433 = vrot.lane.b32.xlu0 %v2370_v29, %s4371_s29 }
 0x905   :  { %2600 = vrot.lane.b32.xlu1 %v2537_v31, %s4372_s3  ;;  %2602 = vrot.lane.b32.xlu0 %v2539_v40, %s4372_s3 }
 0x939   :  { %v4132_v16 = vpop.f32.mrb[22].mxu1 }
 0x93a   :  { %v3126_v51 = vadd.f32 %v6144_v8, %v4132_v16  ;;  %v3055_v1 = vpop.f32.mrb[23].mxu1 }
 0x93b   :  { %v3125_v39 = vadd.f32 %v6144_v8, %v3055_v1 }
 0x93c   :  { %v3289_v18 = vsel %vm3133_vm10, %v3126_v51, -inf  ;;  %v3345_v56 = vsel %vm3190_vm11, %v3126_v51, -inf }
 0x93d   :  { %v3290_v32 = vrot.slane %v3289_v18, 4  ;;  %v3346_v35 = vrot.slane %v3345_v56, 4  ;;  %v3176_v20 = vsel %vm3133_vm10, %v3125_v39, -inf  ;;  %v3233_v50 = vsel %vm3190_vm11, %v3125_v39, -inf }
 0x93e   :  { %v3177_v11 = vrot.slane %v3176_v20, 4  ;;  %v3234_v6 = vrot.slane %v3233_v50, 4 }
 0x93f   :  { %v3291_v53 = vmax.f32 %v3289_v18, %v3290_v32  ;;  %v3347_v27 = vmax.f32 %v3345_v56, %v3346_v35 }
 0x940   :  { %v3178_v28 = vmax.f32 %v3176_v20, %v3177_v11  ;;  %v3235_v0 = vmax.f32 %v3233_v50, %v3234_v6 }
 0x941   :  { %v3292_v46 = vrot.slane %v3291_v53, 2  ;;  %v3348_v22 = vrot.slane %v3347_v27, 2 }
 0x942   :  { %v3179_v4 = vrot.slane %v3178_v28, 2  ;;  %v3236_v48 = vrot.slane %v3235_v0, 2 }
 0x943   :  { %v3293_v30 = vmax.f32 %v3291_v53, %v3292_v46  ;;  %v3349_v63 = vmax.f32 %v3347_v27, %v3348_v22 }
 0x944   :  { %v3180_v10 = vmax.f32 %v3178_v28, %v3179_v4  ;;  %v3237_v45 = vmax.f32 %v3235_v0, %v3236_v48 }
 0x945   :  { %v3294_v15 = vrot.slane %v3293_v30, 1  ;;  %v3350_v44 = vrot.slane %v3349_v63, 1 }
 0x946   :  { %v3181_v61 = vrot.slane %v3180_v10, 1  ;;  %v3238_v34 = vrot.slane %v3237_v45, 1 }
 0x947   :  { %v3295_v26 = vmax.f32 %v3293_v30, %v3294_v15  ;;  %v3351_v59 = vmax.f32 %v3349_v63, %v3350_v44 }
 0x948   :  { %v3182_v47 = vmax.f32 %v3180_v10, %v3181_v61  ;;  %v3239_v14 = vmax.f32 %v3237_v45, %v3238_v34 }
 0x949   :  { %v4135_v55 = vpop.f32.mrb[24].mxu1  ;;  %v6280_v5 = vsel %vm3601_vm0, %v3351_v59, %v6159_v49  ;;  %v6284_v36 = vsel %vm3601_vm0, %v3295_v26, %v6164_v54 }
 0x94a   :  { %v3128_v38 = vadd.f32 %v6144_v8, %v4135_v55  ;;  %v3065_v52 = vpop.f32.mrb[25].mxu1  ;;  %v6289_v24 = vsel %vm3601_vm0, %v3239_v14, %v6176_v60  ;;  %v6293_v58 = vsel %vm3601_vm0, %v3182_v47, %v6172_v9 }
 0x94b   :  { %v3127_v41 = vadd.f32 %v6144_v8, %v3065_v52 }
 0x94c   :  { %v3513_v49 = vsel %vm3133_vm10, %v3128_v38, -inf  ;;  %v3569_v25 = vsel %vm3190_vm11, %v3128_v38, -inf }
 0x94d   :  { %v3514_v7 = vrot.slane %v3513_v49, 4  ;;  %v3570_v54 = vrot.slane %v3569_v25, 4  ;;  %v3401_v23 = vsel %vm3133_vm10, %v3127_v41, -inf  ;;  %v3457_v13 = vsel %vm3190_vm11, %v3127_v41, -inf }
 0x94e   :  { %v3402_v19 = vrot.slane %v3401_v23, 4  ;;  %v3458_v3 = vrot.slane %v3457_v13, 4 }
 0x94f   :  { %v3515_v60 = vmax.f32 %v3513_v49, %v3514_v7  ;;  %v3571_v62 = vmax.f32 %v3569_v25, %v3570_v54 }
 0x950   :  { %v3403_v29 = vmax.f32 %v3401_v23, %v3402_v19  ;;  %v3459_v43 = vmax.f32 %v3457_v13, %v3458_v3 }
 0x951   :  { %v3516_v9 = vrot.slane %v3515_v60, 2  ;;  %v3572_v31 = vrot.slane %v3571_v62, 2 }
 0x952   :  { %v3404_v40 = vrot.slane %v3403_v29, 2  ;;  %v3460_v16 = vrot.slane %v3459_v43, 2 }
 0x953   :  { %v3517_v51 = vmax.f32 %v3515_v60, %v3516_v9  ;;  %v3573_v1 = vmax.f32 %v3571_v62, %v3572_v31 }
 0x954   :  { %v3405_v39 = vmax.f32 %v3403_v29, %v3404_v40  ;;  %v3461_v18 = vmax.f32 %v3459_v43, %v3460_v16  ;;  %v4373_v16 = vmov 0.0|0.0  }
 0x955   :  { %v3518_v56 = vrot.slane %v3517_v51, 1  ;;  %v3574_v32 = vrot.slane %v3573_v1, 1  ;;  %4169 = vmatprep.subr.bf16.mxu1 %v4373_v16 }
 0x956   :  { %v3406_v35 = vrot.slane %v3405_v39, 1  ;;  %v3462_v20 = vrot.slane %v3461_v18, 1 }
 0x957   :  { %v3519_v50 = vmax.f32 %v3517_v51, %v3518_v56  ;;  %v3575_v11 = vmax.f32 %v3573_v1, %v3574_v32  ;;  %v3742_v51 = vld [vmem:[%s6418_s6] sm:$0xff]  ;;  %v3743_v1 = vld [vmem:[%s6418_s6 + $0x8] sm:$0xff] }
 0x958   :  { %v3407_v6 = vmax.f32 %v3405_v39, %v3406_v35  ;;  %v3463_v53 = vmax.f32 %v3461_v18, %v3462_v20  ;;  %v4170_v56 = vpack.c.bf16 %v3743_v1, %v3742_v51  ;;  %v3748_v51 = vld [vmem:[%s6418_s6 + $0x30] sm:$0xff]  ;;  %v3749_v1 = vld [vmem:[%s6418_s6 + $0x38] sm:$0xff] }
 0x959   :  { %v6302_v27 = vsel %vm3601_vm0, %v3575_v11, %v6182_v37  ;;  %v6306_v28 = vsel %vm3601_vm0, %v3519_v50, %v6179_v57 }
 0x95a   :  { %v6310_v0 = vsel %vm3601_vm0, %v3463_v53, %v6188_v2  ;;  %v6314_v46 = vsel %vm3601_vm0, %v3407_v6, %v6185_v21  ;;  %4171 = vmatpush3.bf16.msra.mxu1 %v4170_v56  ;;  %v4179_v56 = vpack.c.bf16 %v3749_v1, %v3748_v51 }
 0x95b   :  { %v2259_v22 = vpop.permute.xlu0 %2258  ;;  %v2090_v4 = vpop.permute.xlu1 %2089  ;;  %4172 = vmatprep.subr.bf16.mxu1 %v4373_v16 }
 0x95c   :  { %v2664_v48 = vsel %vm679_vm1, %v6216_v17, %v2090_v4  ;;  %v3744_v4 = vld [vmem:[%s6418_s6 + $0x10] sm:$0xff] }
 0x95d   :  { %v2697_v37 = vsel %vm2668_vm6, %v2664_v48, %v2259_v22  ;;  %v3745_v48 = vld [vmem:[%s6418_s6 + $0x18] sm:$0xff] }
 0x95f   :  { %v2428_v30 = vpop.permute.xlu0 %2427  ;;  %v2597_v63 = vpop.permute.xlu1 %2596 }
 0x960   :  { %v2730_v57 = vsel %vm2701_vm7, %v2697_v37, %v2428_v30 }
 0x961   :  { %v2763_v10 = vsel %vm2734_vm8, %v2730_v57, %v2597_v63  ;;  %v4173_v63 = vpack.c.bf16 %v3745_v48, %v3744_v4 }
 0x962   :  { %4136 = vmatprep.mubr.msk.f32.mxu1 %vm2772_vm9, %v2763_v10 }
 0x963   :  { %v2430_v2 = vpop.permute.xlu0 %2429  ;;  %v2092_v45 = vpop.permute.xlu1 %2091  ;;  %4174 = vmatpush3.bf16.msra.mxu1 %v4173_v63 }
 0x964   :  { %v2665_v21 = vsel %vm679_vm1, %v6218_v12, %v2092_v45  ;;  %4175 = vmatprep.subr.bf16.mxu1 %v4373_v16 }
 0x967   :  { %v2094_v15 = vpop.permute.xlu0 %2093  ;;  %v2261_v44 = vpop.permute.xlu1 %2260 }
 0x968   :  { %v2698_v61 = vsel %vm2668_vm6, %v2665_v21, %v2261_v44  ;;  %v2666_v52 = vsel %vm679_vm1, %v6230_v33, %v2094_v15 }
 0x969   :  { %v2731_v34 = vsel %vm2701_vm7, %v2698_v61, %v2430_v2 }
 0x96b   :  { %v2096_v17 = vpop.permute.xlu0 %2095  ;;  %v2599_v26 = vpop.permute.xlu1 %2598 }
 0x96c   :  { %v2764_v59 = vsel %vm2734_vm8, %v2731_v34, %v2599_v26  ;;  %v2667_v12 = vsel %vm679_vm1, %v6240_v42, %v2096_v17 }
 0x96d   :  { %4137 = vmatmul.mubr.msk.f32.gmra.mrb[26].mxu1 %vm2772_vm9, %v2764_v59 }
 0x96f   :  { %v2265_v47 = vpop.permute.xlu0 %2264  ;;  %v2263_v14 = vpop.permute.xlu1 %2262 }
 0x970   :  { %v2700_v41 = vsel %vm2668_vm6, %v2667_v12, %v2265_v47  ;;  %v2699_v49 = vsel %vm2668_vm6, %v2666_v52, %v2263_v14 }
 0x973   :  { %v2434_v55 = vpop.permute.xlu0 %2433  ;;  %v2432_v38 = vpop.permute.xlu1 %2431 }
 0x974   :  { %v2733_v25 = vsel %vm2701_vm7, %v2700_v41, %v2434_v55  ;;  %v2732_v7 = vsel %vm2701_vm7, %v2699_v49, %v2432_v38 }
 0x977   :  { %v2603_v54 = vpop.permute.xlu0 %2602  ;;  %v2601_v23 = vpop.permute.xlu1 %2600 }
 0x978   :  { %v2766_v13 = vsel %vm2734_vm8, %v2733_v25, %v2603_v54  ;;  %v2765_v19 = vsel %vm2734_vm8, %v2732_v7, %v2601_v23 }
 0x979   :  { %4139 = vmatprep.mubr.msk.f32.mxu1 %vm2772_vm9, %v2765_v19  ;;  %v3746_v19 = vld [vmem:[%s6418_s6 + $0x20] sm:$0xff] }
 0x97a   :  { %4140 = vmatmul.mubr.msk.f32.gmra.mrb[28].mxu1 %vm2772_vm9, %v2766_v13 }
 0xa40   :  { %v4138_v33 = vpop.f32.mrb[26].mxu1 }
 0xa41   :  { %v3130_v42 = vadd.f32 %v6144_v8, %v4138_v33  ;;  %v3075_v3 = vpop.f32.mrb[27].mxu1  ;;  %v3747_v33 = vld [vmem:[%s6418_s6 + $0x28] sm:$0xff]  ;;  %s4375_s6 = smov 40  }
 0xa42   :  { %v3129_v60 = vadd.f32 %v6144_v8, %v3075_v3 }
 0xa43   :  { %v3296_v62 = vsel %vm3133_vm10, %v3130_v42, -inf  ;;  %v3352_v29 = vsel %vm3190_vm11, %v3130_v42, -inf }
 0xa44   :  { %v3297_v43 = vrot.slane %v3296_v62, 4  ;;  %v3353_v9 = vrot.slane %v3352_v29, 4  ;;  %v3183_v31 = vsel %vm3133_vm10, %v3129_v60, -inf  ;;  %v3240_v40 = vsel %vm3190_vm11, %v3129_v60, -inf }
 0xa45   :  { %v3184_v39 = vrot.slane %v3183_v31, 4  ;;  %v3241_v18 = vrot.slane %v3240_v40, 4  ;;  %v4176_v60 = vpack.c.bf16 %v3747_v33, %v3746_v19 }
 0xa46   :  { %v3298_v32 = vmax.f32 %v3296_v62, %v3297_v43  ;;  %v3354_v35 = vmax.f32 %v3352_v29, %v3353_v9 }
 0xa47   :  { %v3185_v20 = vmax.f32 %v3183_v31, %v3184_v39  ;;  %v3242_v50 = vmax.f32 %v3240_v40, %v3241_v18  ;;  %4177 = vmatpush3.bf16.msra.mxu1 %v4176_v60 }
 0xa48   :  { %v3299_v11 = vrot.slane %v3298_v32, 2  ;;  %v3355_v6 = vrot.slane %v3354_v35, 2  ;;  %4178 = vmatprep.subr.bf16.mxu1 %v4373_v16 }
 0xa49   :  { %v3186_v53 = vrot.slane %v3185_v20, 2  ;;  %v3243_v22 = vrot.slane %v3242_v50, 2 }
 0xa4a   :  { %v3300_v30 = vmax.f32 %v3298_v32, %v3299_v11  ;;  %v3356_v37 = vmax.f32 %v3354_v35, %v3355_v6  ;;  %v6665_v32 = vmov 0.0  }
 0xa4b   :  { %v3187_v57 = vmax.f32 %v3185_v20, %v3186_v53  ;;  %v3244_v10 = vmax.f32 %v3242_v50, %v3243_v22  ;;  %4158 = vmatprep.mubr.msk.f32.mxu1 %vm4374_vm3, %v6665_v32  ;;  %4180 = vmatpush3.bf16.msra.mxu1 %v4179_v56 }
 0xa4c   :  { %v3301_v2 = vrot.slane %v3300_v30, 1  ;;  %v3357_v45 = vrot.slane %v3356_v37, 1 }
 0xa4d   :  { %v3188_v21 = vrot.slane %v3187_v57, 1  ;;  %v3245_v15 = vrot.slane %v3244_v10, 1  ;;  %v4141_v44 = vpop.f32.mrb[28].mxu1 }
 0xa4e   :  { %v3302_v61 = vmax.f32 %v3300_v30, %v3301_v2  ;;  %v3358_v17 = vmax.f32 %v3356_v37, %v3357_v45  ;;  %v3132_v34 = vadd.f32 %v6144_v8, %v4141_v44  ;;  %v3085_v26 = vpop.f32.mrb[29].mxu1 }
 0xa4f   :  { %v3189_v59 = vmax.f32 %v3187_v57, %v3188_v21  ;;  %v3246_v47 = vmax.f32 %v3244_v10, %v3245_v15  ;;  %v3131_v14 = vadd.f32 %v6144_v8, %v3085_v26 }
 0xa50   :  { %v3520_v55 = vsel %vm3133_vm10, %v3132_v34, -inf  ;;  %v3576_v38 = vsel %vm3190_vm11, %v3132_v34, -inf  ;;  %v3656_v52 = vsel %vm3603_vm2, %v3358_v17, %v6280_v5  ;;  %v3638_v12 = vsel %vm3603_vm2, %v3302_v61, %v6284_v36  ;;  %v3931_v17 = vld [vmem:[%s6419_s7] ss:$0 sm:$0xff] }
 0xa51   :  { %v3521_v41 = vrot.slane %v3520_v55, 4  ;;  %v3577_v49 = vrot.slane %v3576_v38, 4  ;;  %v3408_v25 = vsel %vm3133_vm10, %v3131_v14, -inf  ;;  %v3464_v7 = vsel %vm3190_vm11, %v3131_v14, -inf  ;;  %3657 = vrot.lane.b32.xlu1 %v3656_v52, %s4371_s29  ;;  %3639 = vrot.lane.b32.xlu0 %v3638_v12, %s4370_s1 }
 0xa52   :  { %v3409_v8 = vrot.slane %v3408_v25, 4  ;;  %v3465_v54 = vrot.slane %v3464_v7, 4  ;;  %v3620_v23 = vsel %vm3603_vm2, %v3246_v47, %v6289_v24  ;;  %v3604_v5 = vsel %vm3603_vm2, %v3189_v59, %v6293_v58 }
 0xa53   :  { %v3522_v13 = vmax.f32 %v3520_v55, %v3521_v41  ;;  %v3578_v36 = vmax.f32 %v3576_v38, %v3577_v49  ;;  %vm3757_vm10 = vcmask 523264  }
 0xa54   :  { %v3410_v42 = vmax.f32 %v3408_v25, %v3409_v8  ;;  %v3466_v3 = vmax.f32 %v3464_v7, %v3465_v54 }
 0xa55   :  { %v3523_v62 = vrot.slane %v3522_v13, 2  ;;  %v3579_v29 = vrot.slane %v3578_v36, 2  ;;  %3621 = vrot.lane.b32.xlu1 %v3620_v23, %s4369_s28  ;;  %s4376_s28 = smov 56  }
 0xa56   :  { %v3411_v24 = vrot.slane %v3410_v42, 2  ;;  %v3467_v43 = vrot.slane %v3466_v3, 2 }
 0xa57   :  { %v3524_v58 = vmax.f32 %v3522_v13, %v3523_v62  ;;  %v3580_v9 = vmax.f32 %v3578_v36, %v3579_v29 }
 0xa58   :  { %v3412_v31 = vmax.f32 %v3410_v42, %v3411_v24  ;;  %v3468_v40 = vmax.f32 %v3466_v3, %v3467_v43 }
 0xa59   :  { %v3525_v39 = vrot.slane %v3524_v58, 1  ;;  %v3581_v18 = vrot.slane %v3580_v9, 1 }
 0xa5a   :  { %v3413_v35 = vrot.slane %v3412_v31, 1  ;;  %v3469_v20 = vrot.slane %v3468_v40, 1 }
 0xa5b   :  { %v3526_v50 = vmax.f32 %v3524_v58, %v3525_v39  ;;  %v3582_v16 = vmax.f32 %v3580_v9, %v3581_v18 }
 0xa5c   :  { %v3414_v11 = vmax.f32 %v3412_v31, %v3413_v35  ;;  %v3470_v6 = vmax.f32 %v3468_v40, %v3469_v20 }
 0xa5d   :  { %v3728_v53 = vsel %vm3603_vm2, %v3582_v16, %v6302_v27  ;;  %v3710_v22 = vsel %vm3603_vm2, %v3526_v50, %v6306_v28 }
 0xa5e   :  { %v3692_v4 = vsel %vm3603_vm2, %v3470_v6, %v6310_v0  ;;  %v3674_v48 = vsel %vm3603_vm2, %v3414_v11, %v6314_v46 }
 0xa5f   :  { %3693 = vrot.lane.b32.xlu1 %v3692_v4, %s4375_s6  ;;  %3675 = vrot.lane.b32.xlu0 %v3674_v48, %s4372_s3 }
 0xa63   :  { %3729 = vrot.lane.b32.xlu1 %v3728_v53, %s4376_s28  ;;  %3711 = vrot.lane.b32.xlu0 %v3710_v22, %s4377_s25 }
 0xac3   :  { %v3658_v30 = vpop.permute.xlu1 %3657  ;;  %v3640_v63 = vpop.permute.xlu0 %3639 }
 0xac7   :  { %v3622_v37 = vpop.permute.xlu1 %3621 }
 0xac8   :  { %v3732_v27 = vsel %vm679_vm1, %v3604_v5, %v3622_v37 }
 0xac9   :  { %v3733_v28 = vsel %vm2668_vm6, %v3732_v27, %v3640_v63 }
 0xaca   :  { %v3734_v0 = vsel %vm2701_vm7, %v3733_v28, %v3658_v30 }
 0xad1   :  { %v3676_v57 = vpop.permute.xlu0 %3675  ;;  %v3694_v10 = vpop.permute.xlu1 %3693 }
 0xad2   :  { %v3735_v46 = vsel %vm2734_vm8, %v3734_v0, %v3676_v57 }
 0xad3   :  { %v3736_v2 = vsel %vm2772_vm9, %v3735_v46, %v3694_v10 }
 0xad5   :  { %v3712_v45 = vpop.permute.xlu0 %3711  ;;  %v3730_v21 = vpop.permute.xlu1 %3729 }
 0xad6   :  { %v3738_v15 = vsel %vm3737_vm4, %v3736_v2, %v3712_v45 }
 0xad7   :  { %v3740_v44 = vsel %vm3739_vm5, %v3738_v15, %v3730_v21 }
 0xad8   :  { %v3741_v61 = vmax.f32 %v3740_v44, 0.0 }
 0xada   :  { %4159 = vmatmul.mubr.msk.f32.vlgmr.msra.gmra.mrb[30].mxu1 %vm3757_vm10, %v3741_v61 }
 0xbad   :  { %v3827_v34 = vpop.f32.mrb[30].mxu1 }
 0xbae   :  { %v3828_v26 = vadd.f32 %v3931_v17, %v3827_v34  ;;  %v4160_v59 = vpop.f32.mrb[31].mxu1 }
 0xbb0   :  { %v3933_v47 = vmul.f32 -1.442695, %v3828_v26 }
 0xbb2   :  { %4347 = vpow2.f32 %v3933_v47 }
 0xbbc   :  { %v4348_v14 = vpop.eup %4347 }
 0xbbd   :  { %v3834_v55 = vadd.f32 1.0, %v4348_v14 }
 0xbbf   :  { %4349 = vrcp.f32 %v3834_v55 }
 0xbc9   :  { %v4350_v38 = vpop.eup %4349 }
 0xbca   :  { %3837 = vst [vmem:[%s6420_s8] sm:$0xff] %v4350_v38 }

</bundles_post_ra>
